<compile_context>
chip_gen: v7x
topology: tpu7x:2x2x1
jax: 0.10.0
libtpu: 0.0.40
codegen_flags: <defaults>
</compile_context>

<pallas_src>
import math

import jax
import jax.numpy as jnp
from jax.experimental import pallas as pl
from jax.experimental.pallas import tpu as pltpu

# ---- model hyperparameters (small, consistent with the module's forward) ----
BATCH = 2          # batch
SEQ = 8            # sequence length
HIDDEN = 32        # bert.hidden
NUM_HEADS = 4
HEAD_DIM = HIDDEN // NUM_HEADS
FFN = 64
VOCAB = 8
NUM_LAYERS = 2
OUT_FEATURES = 8   # linear: hidden -> 8
MAX_POS = 64
LN_EPS = 1e-12
BS = BATCH * SEQ   # fused (batch*seq) slab rows


# ----------------------------- kernel helpers -------------------------------
def _layernorm(x, gamma, beta):
    mu = jnp.mean(x, axis=-1, keepdims=True)
    xc = x - mu
    var = jnp.mean(xc * xc, axis=-1, keepdims=True)
    inv = jax.lax.rsqrt(var + LN_EPS)
    return xc * inv * gamma + beta


def _gelu(x):
    # tanh approximation of GELU (elementwise f32; tanh routes to EUP)
    c = math.sqrt(2.0 / math.pi)
    return 0.5 * x * (1.0 + jnp.tanh(c * (x + 0.044715 * x * x * x)))


# --------------------------- single fused kernel -----------------------------
def fused_bert_kernel(ids_ref, tok_ref, pos_ref,
                      wq_ref, bq_ref, wk_ref, bk_ref, wv_ref, bv_ref,
                      wo_ref, bo_ref, g1_ref, be1_ref,
                      w1_ref, b1_ref, w2_ref, b2_ref, g2_ref, be2_ref,
                      hw_ref, hb_ref, o_ref, ctx_ref):
    # ---- embedding lookup: exact select-based gather over the tiny vocab ----
    ids = ids_ref[...]                                     # (BS, 1) int32
    h = jnp.zeros((BS, HIDDEN), jnp.float32)
    for v in range(VOCAB):                                 # VOCAB=8, unrolled
        h = jnp.where(ids == v, tok_ref[v:v + 1, :], h)    # (BS, H)

    pos = pos_ref[0:SEQ, :]                                # (S, H)
    h = h + jnp.concatenate([pos] * BATCH, axis=0)         # (BS, H)

    scale = 1.0 / math.sqrt(HEAD_DIM)

    # ---- NUM_LAYERS post-LN transformer encoder layers, fully in VMEM ----
    for l in range(NUM_LAYERS):
        hb = h.astype(jnp.bfloat16)
        # combined QKV projections over the whole (B*S, H) slab (bf16 -> f32 acc)
        q = jnp.dot(hb, wq_ref[l], preferred_element_type=jnp.float32) + bq_ref[l]
        k = jnp.dot(hb, wk_ref[l], preferred_element_type=jnp.float32) + bk_ref[l]
        vv = jnp.dot(hb, wv_ref[l], preferred_element_type=jnp.float32) + bv_ref[l]

        # per-batch, per-head attention (tiny (S,S)=(8,8) blocks, f32)
        for b in range(BATCH):
            r0 = b * SEQ
            for hd in range(NUM_HEADS):
                c0 = hd * HEAD_DIM
                qh = q[r0:r0 + SEQ, c0:c0 + HEAD_DIM]
                kh = k[r0:r0 + SEQ, c0:c0 + HEAD_DIM]
                vh = vv[r0:r0 + SEQ, c0:c0 + HEAD_DIM]
                s = jnp.dot(qh, kh.T, preferred_element_type=jnp.float32) * scale
                m = jnp.max(s, axis=-1, keepdims=True)
                e = jnp.exp(s - m)
                p = e * pl.reciprocal(jnp.sum(e, axis=-1, keepdims=True),
                                      approx=True)
                ctx_ref[r0:r0 + SEQ, c0:c0 + HEAD_DIM] = jnp.dot(
                    p, vh, preferred_element_type=jnp.float32)

        # single output projection over the full slab
        attn = jnp.dot(ctx_ref[...].astype(jnp.bfloat16), wo_ref[l],
                       preferred_element_type=jnp.float32) + bo_ref[l]
        h = _layernorm(h + attn, g1_ref[l], be1_ref[l])

        # feed-forward (bf16 matmul operands, f32 elementwise)
        inter = _gelu(jnp.dot(h.astype(jnp.bfloat16), w1_ref[l],
                              preferred_element_type=jnp.float32) + b1_ref[l])
        ffn = jnp.dot(inter.astype(jnp.bfloat16), w2_ref[l],
                      preferred_element_type=jnp.float32) + b2_ref[l]
        h = _layernorm(h + ffn, g2_ref[l], be2_ref[l])

    # ---- Linear(hidden -> 8) head, then emit (B, 2, S, 4) directly ----
    logits = jnp.dot(h.astype(jnp.bfloat16), hw_ref[...],
                     preferred_element_type=jnp.float32) + hb_ref[...]  # (BS, 8)
    for b in range(BATCH):
        blk = logits[b * SEQ:(b + 1) * SEQ, :]            # (S, 8)
        o_ref[b, 0] = blk[:, 0:4]                         # x.view(B,S,2,4).T(1,2)
        o_ref[b, 1] = blk[:, 4:8]


# ------------------------------ forward wrapper ------------------------------
def bert_custom_rna_reactivity(x, params, probs=None):
    # TODO(synk): BERTCustom's `probs` argument semantics are not defined in the
    # provided source; it is accepted here but unused.
    batch_size, seq_len = x.shape
    ids = x.reshape(batch_size * seq_len, 1).astype(jnp.int32)

    inputs = [ids, params["tok_emb"], params["pos_emb"],
              params["wq"], params["bq"], params["wk"], params["bk"],
              params["wv"], params["bv"], params["wo"], params["bo"],
              params["ln1_g"], params["ln1_b"],
              params["w1"], params["b1"], params["w2"], params["b2"],
              params["ln2_g"], params["ln2_b"],
              params["head_w"], params["head_b"]]

    def full_spec(a):
        nd = a.ndim
        return pl.BlockSpec(a.shape, lambda i, _nd=nd: (0,) * _nd)

    return pl.pallas_call(
        fused_bert_kernel,
        out_shape=jax.ShapeDtypeStruct((batch_size, 2, seq_len, 4), jnp.float32),
        grid_spec=pltpu.PrefetchScalarGridSpec(
            num_scalar_prefetch=0,
            grid=(1,),
            in_specs=[full_spec(a) for a in inputs],
            out_specs=pl.BlockSpec((batch_size, 2, seq_len, 4),
                                   lambda i: (0, 0, 0, 0)),
            scratch_shapes=[
                pltpu.VMEM((batch_size * seq_len, HIDDEN), jnp.float32)],
        ),
        compiler_params=pltpu.CompilerParams(
            dimension_semantics=("arbitrary",)),
    )(*inputs)


# ----------------------------- parameter setup ------------------------------
def init_params(key):
    keys = iter(jax.random.split(key, 12))

    def nrm(shape, dtype=jnp.float32):
        return (0.02 * jax.random.normal(next(keys), shape)).astype(dtype)

    L = NUM_LAYERS
    params = {
        # embeddings kept f32 (gather must stay exact)
        "tok_emb": nrm((VOCAB, HIDDEN)),
        "pos_emb": nrm((MAX_POS, HIDDEN)),
        # per-layer weights stacked on a leading layer axis; matmul weights bf16
        "wq": nrm((L, HIDDEN, HIDDEN), jnp.bfloat16),
        "wk": nrm((L, HIDDEN, HIDDEN), jnp.bfloat16),
        "wv": nrm((L, HIDDEN, HIDDEN), jnp.bfloat16),
        "wo": nrm((L, HIDDEN, HIDDEN), jnp.bfloat16),
        "bq": jnp.zeros((L, 1, HIDDEN), jnp.float32),
        "bk": jnp.zeros((L, 1, HIDDEN), jnp.float32),
        "bv": jnp.zeros((L, 1, HIDDEN), jnp.float32),
        "bo": jnp.zeros((L, 1, HIDDEN), jnp.float32),
        "ln1_g": jnp.ones((L, 1, HIDDEN), jnp.float32),
        "ln1_b": jnp.zeros((L, 1, HIDDEN), jnp.float32),
        "w1": nrm((L, HIDDEN, FFN), jnp.bfloat16),
        "b1": jnp.zeros((L, 1, FFN), jnp.float32),
        "w2": nrm((L, FFN, HIDDEN), jnp.bfloat16),
        "b2": jnp.zeros((L, 1, HIDDEN), jnp.float32),
        "ln2_g": jnp.ones((L, 1, HIDDEN), jnp.float32),
        "ln2_b": jnp.zeros((L, 1, HIDDEN), jnp.float32),
        # head
        "head_w": nrm((HIDDEN, OUT_FEATURES), jnp.bfloat16),
        "head_b": jnp.zeros((1, OUT_FEATURES), jnp.float32),
    }
    return params


if __name__ == "__main__":
    key = jax.random.PRNGKey(0)
    pkey, xkey = jax.random.split(key)
    params = init_params(pkey)

    x = jax.random.randint(xkey, (BATCH, SEQ), 0, VOCAB, dtype=jnp.int32)

    out = bert_custom_rna_reactivity(x, params)
    out = jax.block_until_ready(out)

    assert out.shape == (BATCH, 2, SEQ, 4), out.shape
    assert out.dtype == jnp.float32
    print("KERNEL_OK")
</pallas_src>

<mosaic_0001>
module attributes {stable_mosaic.version = 11 : i64} {
  func.func @fused_bert_kernel(%arg0: i32, %arg1: memref<16x1xi32, #tpu.memory_space<vmem>>, %arg2: memref<8x32xf32, #tpu.memory_space<vmem>>, %arg3: memref<64x32xf32, #tpu.memory_space<vmem>>, %arg4: memref<2x32x32xbf16, #tpu.memory_space<vmem>>, %arg5: memref<2x1x32xf32, #tpu.memory_space<vmem>>, %arg6: memref<2x32x32xbf16, #tpu.memory_space<vmem>>, %arg7: memref<2x1x32xf32, #tpu.memory_space<vmem>>, %arg8: memref<2x32x32xbf16, #tpu.memory_space<vmem>>, %arg9: memref<2x1x32xf32, #tpu.memory_space<vmem>>, %arg10: memref<2x32x32xbf16, #tpu.memory_space<vmem>>, %arg11: memref<2x1x32xf32, #tpu.memory_space<vmem>>, %arg12: memref<2x1x32xf32, #tpu.memory_space<vmem>>, %arg13: memref<2x1x32xf32, #tpu.memory_space<vmem>>, %arg14: memref<2x32x64xbf16, #tpu.memory_space<vmem>>, %arg15: memref<2x1x64xf32, #tpu.memory_space<vmem>>, %arg16: memref<2x64x32xbf16, #tpu.memory_space<vmem>>, %arg17: memref<2x1x32xf32, #tpu.memory_space<vmem>>, %arg18: memref<2x1x32xf32, #tpu.memory_space<vmem>>, %arg19: memref<2x1x32xf32, #tpu.memory_space<vmem>>, %arg20: memref<32x8xbf16, #tpu.memory_space<vmem>>, %arg21: memref<1x8xf32, #tpu.memory_space<vmem>>, %arg22: memref<2x2x8x4xf32, #tpu.memory_space<vmem>>, %arg23: memref<16x32xf32, #tpu.memory_space<vmem>>) attributes {dimension_semantics = [#tpu.dimension_semantics<arbitrary>], iteration_bounds = array<i64: 1>, scalar_prefetch = 0 : i64, scratch_operands = 1 : i64, tpu.core_type = #tpu.core_type<tc>, window_params = [{pipeline_mode = #tpu.pipeline_mode<synchronous>, transform_indices = @transform_0, window_bounds = array<i64: 16, 1>}, {pipeline_mode = #tpu.pipeline_mode<synchronous>, transform_indices = @transform_1, window_bounds = array<i64: 8, 32>}, {pipeline_mode = #tpu.pipeline_mode<synchronous>, transform_indices = @transform_2, window_bounds = array<i64: 64, 32>}, {pipeline_mode = #tpu.pipeline_mode<synchronous>, transform_indices = @transform_3, window_bounds = array<i64: 2, 32, 32>}, {pipeline_mode = #tpu.pipeline_mode<synchronous>, transform_indices = @transform_4, window_bounds = array<i64: 2, 1, 32>}, {pipeline_mode = #tpu.pipeline_mode<synchronous>, transform_indices = @transform_5, window_bounds = array<i64: 2, 32, 32>}, {pipeline_mode = #tpu.pipeline_mode<synchronous>, transform_indices = @transform_6, window_bounds = array<i64: 2, 1, 32>}, {pipeline_mode = #tpu.pipeline_mode<synchronous>, transform_indices = @transform_7, window_bounds = array<i64: 2, 32, 32>}, {pipeline_mode = #tpu.pipeline_mode<synchronous>, transform_indices = @transform_8, window_bounds = array<i64: 2, 1, 32>}, {pipeline_mode = #tpu.pipeline_mode<synchronous>, transform_indices = @transform_9, window_bounds = array<i64: 2, 32, 32>}, {pipeline_mode = #tpu.pipeline_mode<synchronous>, transform_indices = @transform_10, window_bounds = array<i64: 2, 1, 32>}, {pipeline_mode = #tpu.pipeline_mode<synchronous>, transform_indices = @transform_11, window_bounds = array<i64: 2, 1, 32>}, {pipeline_mode = #tpu.pipeline_mode<synchronous>, transform_indices = @transform_12, window_bounds = array<i64: 2, 1, 32>}, {pipeline_mode = #tpu.pipeline_mode<synchronous>, transform_indices = @transform_13, window_bounds = array<i64: 2, 32, 64>}, {pipeline_mode = #tpu.pipeline_mode<synchronous>, transform_indices = @transform_14, window_bounds = array<i64: 2, 1, 64>}, {pipeline_mode = #tpu.pipeline_mode<synchronous>, transform_indices = @transform_15, window_bounds = array<i64: 2, 64, 32>}, {pipeline_mode = #tpu.pipeline_mode<synchronous>, transform_indices = @transform_16, window_bounds = array<i64: 2, 1, 32>}, {pipeline_mode = #tpu.pipeline_mode<synchronous>, transform_indices = @transform_17, window_bounds = array<i64: 2, 1, 32>}, {pipeline_mode = #tpu.pipeline_mode<synchronous>, transform_indices = @transform_18, window_bounds = array<i64: 2, 1, 32>}, {pipeline_mode = #tpu.pipeline_mode<synchronous>, transform_indices = @transform_19, window_bounds = array<i64: 32, 8>}, {pipeline_mode = #tpu.pipeline_mode<synchronous>, transform_indices = @transform_20, window_bounds = array<i64: 1, 8>}, {pipeline_mode = #tpu.pipeline_mode<synchronous>, transform_indices = @transform_21, window_bounds = array<i64: 2, 2, 8, 4>}]} {
    %c0 = arith.constant 0 : index
    %c0_0 = arith.constant 0 : index
    %0 = vector.load %arg1[%c0, %c0_0] : memref<16x1xi32, #tpu.memory_space<vmem>>, vector<16x1xi32>
    %cst = arith.constant 0.000000e+00 : f32
    %1 = vector.broadcast %cst : f32 to vector<16x32xf32>
    %c0_i32 = arith.constant 0 : i32
    %2 = vector.broadcast %c0_i32 : i32 to vector<16x1xi32>
    %3 = arith.cmpi eq, %0, %2 : vector<16x1xi32>
    %c0_1 = arith.constant 0 : index
    %c0_2 = arith.constant 0 : index
    %4 = vector.load %arg2[%c0_1, %c0_2] : memref<8x32xf32, #tpu.memory_space<vmem>>, vector<1x32xf32>
    %5 = vector.shape_cast %3 : vector<16x1xi1> to vector<16x1xi1>
    %6 = vector.broadcast %5 : vector<16x1xi1> to vector<16x32xi1>
    %7 = vector.shape_cast %4 : vector<1x32xf32> to vector<1x32xf32>
    %8 = vector.broadcast %7 : vector<1x32xf32> to vector<16x32xf32>
    %9 = arith.select %6, %8, %1 : vector<16x32xi1>, vector<16x32xf32>
    %c1_i32 = arith.constant 1 : i32
    %10 = vector.broadcast %c1_i32 : i32 to vector<16x1xi32>
    %11 = arith.cmpi eq, %0, %10 : vector<16x1xi32>
    %c1 = arith.constant 1 : index
    %c0_3 = arith.constant 0 : index
    %12 = vector.load %arg2[%c1, %c0_3] : memref<8x32xf32, #tpu.memory_space<vmem>>, vector<1x32xf32>
    %13 = vector.shape_cast %11 : vector<16x1xi1> to vector<16x1xi1>
    %14 = vector.broadcast %13 : vector<16x1xi1> to vector<16x32xi1>
    %15 = vector.shape_cast %12 : vector<1x32xf32> to vector<1x32xf32>
    %16 = vector.broadcast %15 : vector<1x32xf32> to vector<16x32xf32>
    %17 = arith.select %14, %16, %9 : vector<16x32xi1>, vector<16x32xf32>
    %c2_i32 = arith.constant 2 : i32
    %18 = vector.broadcast %c2_i32 : i32 to vector<16x1xi32>
    %19 = arith.cmpi eq, %0, %18 : vector<16x1xi32>
    %c2 = arith.constant 2 : index
    %c0_4 = arith.constant 0 : index
    %20 = vector.load %arg2[%c2, %c0_4] : memref<8x32xf32, #tpu.memory_space<vmem>>, vector<1x32xf32>
    %21 = vector.shape_cast %19 : vector<16x1xi1> to vector<16x1xi1>
    %22 = vector.broadcast %21 : vector<16x1xi1> to vector<16x32xi1>
    %23 = vector.shape_cast %20 : vector<1x32xf32> to vector<1x32xf32>
    %24 = vector.broadcast %23 : vector<1x32xf32> to vector<16x32xf32>
    %25 = arith.select %22, %24, %17 : vector<16x32xi1>, vector<16x32xf32>
    %c3_i32 = arith.constant 3 : i32
    %26 = vector.broadcast %c3_i32 : i32 to vector<16x1xi32>
    %27 = arith.cmpi eq, %0, %26 : vector<16x1xi32>
    %c3 = arith.constant 3 : index
    %c0_5 = arith.constant 0 : index
    %28 = vector.load %arg2[%c3, %c0_5] : memref<8x32xf32, #tpu.memory_space<vmem>>, vector<1x32xf32>
    %29 = vector.shape_cast %27 : vector<16x1xi1> to vector<16x1xi1>
    %30 = vector.broadcast %29 : vector<16x1xi1> to vector<16x32xi1>
    %31 = vector.shape_cast %28 : vector<1x32xf32> to vector<1x32xf32>
    %32 = vector.broadcast %31 : vector<1x32xf32> to vector<16x32xf32>
    %33 = arith.select %30, %32, %25 : vector<16x32xi1>, vector<16x32xf32>
    %c4_i32 = arith.constant 4 : i32
    %34 = vector.broadcast %c4_i32 : i32 to vector<16x1xi32>
    %35 = arith.cmpi eq, %0, %34 : vector<16x1xi32>
    %c4 = arith.constant 4 : index
    %c0_6 = arith.constant 0 : index
    %36 = vector.load %arg2[%c4, %c0_6] : memref<8x32xf32, #tpu.memory_space<vmem>>, vector<1x32xf32>
    %37 = vector.shape_cast %35 : vector<16x1xi1> to vector<16x1xi1>
    %38 = vector.broadcast %37 : vector<16x1xi1> to vector<16x32xi1>
    %39 = vector.shape_cast %36 : vector<1x32xf32> to vector<1x32xf32>
    %40 = vector.broadcast %39 : vector<1x32xf32> to vector<16x32xf32>
    %41 = arith.select %38, %40, %33 : vector<16x32xi1>, vector<16x32xf32>
    %c5_i32 = arith.constant 5 : i32
    %42 = vector.broadcast %c5_i32 : i32 to vector<16x1xi32>
    %43 = arith.cmpi eq, %0, %42 : vector<16x1xi32>
    %c5 = arith.constant 5 : index
    %c0_7 = arith.constant 0 : index
    %44 = vector.load %arg2[%c5, %c0_7] : memref<8x32xf32, #tpu.memory_space<vmem>>, vector<1x32xf32>
    %45 = vector.shape_cast %43 : vector<16x1xi1> to vector<16x1xi1>
    %46 = vector.broadcast %45 : vector<16x1xi1> to vector<16x32xi1>
    %47 = vector.shape_cast %44 : vector<1x32xf32> to vector<1x32xf32>
    %48 = vector.broadcast %47 : vector<1x32xf32> to vector<16x32xf32>
    %49 = arith.select %46, %48, %41 : vector<16x32xi1>, vector<16x32xf32>
    %c6_i32 = arith.constant 6 : i32
    %50 = vector.broadcast %c6_i32 : i32 to vector<16x1xi32>
    %51 = arith.cmpi eq, %0, %50 : vector<16x1xi32>
    %c6 = arith.constant 6 : index
    %c0_8 = arith.constant 0 : index
    %52 = vector.load %arg2[%c6, %c0_8] : memref<8x32xf32, #tpu.memory_space<vmem>>, vector<1x32xf32>
    %53 = vector.shape_cast %51 : vector<16x1xi1> to vector<16x1xi1>
    %54 = vector.broadcast %53 : vector<16x1xi1> to vector<16x32xi1>
    %55 = vector.shape_cast %52 : vector<1x32xf32> to vector<1x32xf32>
    %56 = vector.broadcast %55 : vector<1x32xf32> to vector<16x32xf32>
    %57 = arith.select %54, %56, %49 : vector<16x32xi1>, vector<16x32xf32>
    %c7_i32 = arith.constant 7 : i32
    %58 = vector.broadcast %c7_i32 : i32 to vector<16x1xi32>
    %59 = arith.cmpi eq, %0, %58 : vector<16x1xi32>
    %c7 = arith.constant 7 : index
    %c0_9 = arith.constant 0 : index
    %60 = vector.load %arg2[%c7, %c0_9] : memref<8x32xf32, #tpu.memory_space<vmem>>, vector<1x32xf32>
    %61 = vector.shape_cast %59 : vector<16x1xi1> to vector<16x1xi1>
    %62 = vector.broadcast %61 : vector<16x1xi1> to vector<16x32xi1>
    %63 = vector.shape_cast %60 : vector<1x32xf32> to vector<1x32xf32>
    %64 = vector.broadcast %63 : vector<1x32xf32> to vector<16x32xf32>
    %65 = arith.select %62, %64, %57 : vector<16x32xi1>, vector<16x32xf32>
    %c0_10 = arith.constant 0 : index
    %c0_11 = arith.constant 0 : index
    %66 = vector.load %arg3[%c0_10, %c0_11] : memref<64x32xf32, #tpu.memory_space<vmem>>, vector<8x32xf32>
    %67 = tpu.concatenate %66, %66 in 0 : vector<8x32xf32>, vector<8x32xf32> -> vector<16x32xf32>
    %68 = arith.addf %65, %67 : vector<16x32xf32>
    %69 = arith.truncf %68 : vector<16x32xf32> to vector<16x32xbf16>
    %c0_12 = arith.constant 0 : index
    %c0_13 = arith.constant 0 : index
    %c0_14 = arith.constant 0 : index
    %70 = vector.load %arg4[%c0_12, %c0_13, %c0_14] : memref<2x32x32xbf16, #tpu.memory_space<vmem>>, vector<1x32x32xbf16>
    %71 = vector.shape_cast %70 : vector<1x32x32xbf16> to vector<32x32xbf16>
    %cst_15 = arith.constant dense<0.000000e+00> : vector<16x32xf32>
    %72 = tpu.matmul %69, %71, %cst_15 {dimension_numbers = #tpu.dot_dimension_numbers<[1], [0], [0], [1], [0, 0, 1, 1], [], []>} : vector<16x32xbf16>, vector<32x32xbf16>, vector<16x32xf32> -> vector<16x32xf32>
    %c0_16 = arith.constant 0 : index
    %c0_17 = arith.constant 0 : index
    %c0_18 = arith.constant 0 : index
    %73 = vector.load %arg5[%c0_16, %c0_17, %c0_18] : memref<2x1x32xf32, #tpu.memory_space<vmem>>, vector<1x1x32xf32>
    %74 = vector.shape_cast %73 : vector<1x1x32xf32> to vector<1x32xf32>
    %75 = vector.broadcast %74 : vector<1x32xf32> to vector<16x32xf32>
    %76 = arith.addf %72, %75 : vector<16x32xf32>
    %c0_19 = arith.constant 0 : index
    %c0_20 = arith.constant 0 : index
    %c0_21 = arith.constant 0 : index
    %77 = vector.load %arg6[%c0_19, %c0_20, %c0_21] : memref<2x32x32xbf16, #tpu.memory_space<vmem>>, vector<1x32x32xbf16>
    %78 = vector.shape_cast %77 : vector<1x32x32xbf16> to vector<32x32xbf16>
    %cst_22 = arith.constant dense<0.000000e+00> : vector<16x32xf32>
    %79 = tpu.matmul %69, %78, %cst_22 {dimension_numbers = #tpu.dot_dimension_numbers<[1], [0], [0], [1], [0, 0, 1, 1], [], []>} : vector<16x32xbf16>, vector<32x32xbf16>, vector<16x32xf32> -> vector<16x32xf32>
    %c0_23 = arith.constant 0 : index
    %c0_24 = arith.constant 0 : index
    %c0_25 = arith.constant 0 : index
    %80 = vector.load %arg7[%c0_23, %c0_24, %c0_25] : memref<2x1x32xf32, #tpu.memory_space<vmem>>, vector<1x1x32xf32>
    %81 = vector.shape_cast %80 : vector<1x1x32xf32> to vector<1x32xf32>
    %82 = vector.broadcast %81 : vector<1x32xf32> to vector<16x32xf32>
    %83 = arith.addf %79, %82 : vector<16x32xf32>
    %c0_26 = arith.constant 0 : index
    %c0_27 = arith.constant 0 : index
    %c0_28 = arith.constant 0 : index
    %84 = vector.load %arg8[%c0_26, %c0_27, %c0_28] : memref<2x32x32xbf16, #tpu.memory_space<vmem>>, vector<1x32x32xbf16>
    %85 = vector.shape_cast %84 : vector<1x32x32xbf16> to vector<32x32xbf16>
    %cst_29 = arith.constant dense<0.000000e+00> : vector<16x32xf32>
    %86 = tpu.matmul %69, %85, %cst_29 {dimension_numbers = #tpu.dot_dimension_numbers<[1], [0], [0], [1], [0, 0, 1, 1], [], []>} : vector<16x32xbf16>, vector<32x32xbf16>, vector<16x32xf32> -> vector<16x32xf32>
    %c0_30 = arith.constant 0 : index
    %c0_31 = arith.constant 0 : index
    %c0_32 = arith.constant 0 : index
    %87 = vector.load %arg9[%c0_30, %c0_31, %c0_32] : memref<2x1x32xf32, #tpu.memory_space<vmem>>, vector<1x1x32xf32>
    %88 = vector.shape_cast %87 : vector<1x1x32xf32> to vector<1x32xf32>
    %89 = vector.broadcast %88 : vector<1x32xf32> to vector<16x32xf32>
    %90 = arith.addf %86, %89 : vector<16x32xf32>
    %91 = vector.extract_strided_slice %76 {offsets = [0, 0], sizes = [8, 8], strides = [1, 1]} : vector<16x32xf32> to vector<8x8xf32>
    %92 = vector.extract_strided_slice %83 {offsets = [0, 0], sizes = [8, 8], strides = [1, 1]} : vector<16x32xf32> to vector<8x8xf32>
    %93 = vector.extract_strided_slice %90 {offsets = [0, 0], sizes = [8, 8], strides = [1, 1]} : vector<16x32xf32> to vector<8x8xf32>
    %94 = tpu.transpose %92, [1, 0] : vector<8x8xf32> -> vector<8x8xf32>
    %cst_33 = arith.constant dense<0.000000e+00> : vector<8x8xf32>
    %95 = tpu.matmul %91, %94, %cst_33 {dimension_numbers = #tpu.dot_dimension_numbers<[1], [0], [0], [1], [0, 0, 1, 1], [], []>} : vector<8x8xf32>, vector<8x8xf32>, vector<8x8xf32> -> vector<8x8xf32>
    %cst_34 = arith.constant 0.353553385 : f32
    %96 = vector.broadcast %cst_34 : f32 to vector<8x8xf32>
    %97 = arith.mulf %95, %96 : vector<8x8xf32>
    %cst_35 = arith.constant dense<0xFF800000> : vector<8xf32>
    %98 = vector.multi_reduction <maximumf>, %97, %cst_35 [1] : vector<8x8xf32> to vector<8xf32>
    %99 = vector.shape_cast %98 : vector<8xf32> to vector<8x1xf32>
    %100 = vector.broadcast %99 : vector<8x1xf32> to vector<8x8xf32>
    %101 = arith.subf %97, %100 : vector<8x8xf32>
    %102 = math.exp %101 : vector<8x8xf32>
    %cst_36 = arith.constant dense<0.000000e+00> : vector<8xf32>
    %103 = vector.multi_reduction <add>, %102, %cst_36 [1] : vector<8x8xf32> to vector<8xf32>
    %104 = vector.shape_cast %103 : vector<8xf32> to vector<8x1xf32>
    %105 = tpu.reciprocal %104 {approx = true} : vector<8x1xf32> -> vector<8x1xf32>
    %106 = vector.broadcast %105 : vector<8x1xf32> to vector<8x8xf32>
    %107 = arith.mulf %102, %106 : vector<8x8xf32>
    %cst_37 = arith.constant dense<0.000000e+00> : vector<8x8xf32>
    %108 = tpu.matmul %107, %93, %cst_37 {dimension_numbers = #tpu.dot_dimension_numbers<[1], [0], [0], [1], [0, 0, 1, 1], [], []>} : vector<8x8xf32>, vector<8x8xf32>, vector<8x8xf32> -> vector<8x8xf32>
    %c0_38 = arith.constant 0 : index
    %c0_39 = arith.constant 0 : index
    %109 = vector.load %arg23[%c0_38, %c0_39] : memref<16x32xf32, #tpu.memory_space<vmem>>, vector<8x8xf32>
    tpu.vector_store %arg23[%c0_38, %c0_39], %108 {strides = array<i32>} : memref<16x32xf32, #tpu.memory_space<vmem>>, vector<8x8xf32>,
    %110 = vector.extract_strided_slice %76 {offsets = [0, 8], sizes = [8, 8], strides = [1, 1]} : vector<16x32xf32> to vector<8x8xf32>
    %111 = vector.extract_strided_slice %83 {offsets = [0, 8], sizes = [8, 8], strides = [1, 1]} : vector<16x32xf32> to vector<8x8xf32>
    %112 = vector.extract_strided_slice %90 {offsets = [0, 8], sizes = [8, 8], strides = [1, 1]} : vector<16x32xf32> to vector<8x8xf32>
    %113 = tpu.transpose %111, [1, 0] : vector<8x8xf32> -> vector<8x8xf32>
    %cst_40 = arith.constant dense<0.000000e+00> : vector<8x8xf32>
    %114 = tpu.matmul %110, %113, %cst_40 {dimension_numbers = #tpu.dot_dimension_numbers<[1], [0], [0], [1], [0, 0, 1, 1], [], []>} : vector<8x8xf32>, vector<8x8xf32>, vector<8x8xf32> -> vector<8x8xf32>
    %cst_41 = arith.constant 0.353553385 : f32
    %115 = vector.broadcast %cst_41 : f32 to vector<8x8xf32>
    %116 = arith.mulf %114, %115 : vector<8x8xf32>
    %cst_42 = arith.constant dense<0xFF800000> : vector<8xf32>
    %117 = vector.multi_reduction <maximumf>, %116, %cst_42 [1] : vector<8x8xf32> to vector<8xf32>
    %118 = vector.shape_cast %117 : vector<8xf32> to vector<8x1xf32>
    %119 = vector.broadcast %118 : vector<8x1xf32> to vector<8x8xf32>
    %120 = arith.subf %116, %119 : vector<8x8xf32>
    %121 = math.exp %120 : vector<8x8xf32>
    %cst_43 = arith.constant dense<0.000000e+00> : vector<8xf32>
    %122 = vector.multi_reduction <add>, %121, %cst_43 [1] : vector<8x8xf32> to vector<8xf32>
    %123 = vector.shape_cast %122 : vector<8xf32> to vector<8x1xf32>
    %124 = tpu.reciprocal %123 {approx = true} : vector<8x1xf32> -> vector<8x1xf32>
    %125 = vector.broadcast %124 : vector<8x1xf32> to vector<8x8xf32>
    %126 = arith.mulf %121, %125 : vector<8x8xf32>
    %cst_44 = arith.constant dense<0.000000e+00> : vector<8x8xf32>
    %127 = tpu.matmul %126, %112, %cst_44 {dimension_numbers = #tpu.dot_dimension_numbers<[1], [0], [0], [1], [0, 0, 1, 1], [], []>} : vector<8x8xf32>, vector<8x8xf32>, vector<8x8xf32> -> vector<8x8xf32>
    %c0_45 = arith.constant 0 : index
    %c8 = arith.constant 8 : index
    %128 = vector.load %arg23[%c0_45, %c8] : memref<16x32xf32, #tpu.memory_space<vmem>>, vector<8x8xf32>
    tpu.vector_store %arg23[%c0_45, %c8], %127 {strides = array<i32>} : memref<16x32xf32, #tpu.memory_space<vmem>>, vector<8x8xf32>,
    %129 = vector.extract_strided_slice %76 {offsets = [0, 16], sizes = [8, 8], strides = [1, 1]} : vector<16x32xf32> to vector<8x8xf32>
    %130 = vector.extract_strided_slice %83 {offsets = [0, 16], sizes = [8, 8], strides = [1, 1]} : vector<16x32xf32> to vector<8x8xf32>
    %131 = vector.extract_strided_slice %90 {offsets = [0, 16], sizes = [8, 8], strides = [1, 1]} : vector<16x32xf32> to vector<8x8xf32>
    %132 = tpu.transpose %130, [1, 0] : vector<8x8xf32> -> vector<8x8xf32>
    %cst_46 = arith.constant dense<0.000000e+00> : vector<8x8xf32>
    %133 = tpu.matmul %129, %132, %cst_46 {dimension_numbers = #tpu.dot_dimension_numbers<[1], [0], [0], [1], [0, 0, 1, 1], [], []>} : vector<8x8xf32>, vector<8x8xf32>, vector<8x8xf32> -> vector<8x8xf32>
    %cst_47 = arith.constant 0.353553385 : f32
    %134 = vector.broadcast %cst_47 : f32 to vector<8x8xf32>
    %135 = arith.mulf %133, %134 : vector<8x8xf32>
    %cst_48 = arith.constant dense<0xFF800000> : vector<8xf32>
    %136 = vector.multi_reduction <maximumf>, %135, %cst_48 [1] : vector<8x8xf32> to vector<8xf32>
    %137 = vector.shape_cast %136 : vector<8xf32> to vector<8x1xf32>
    %138 = vector.broadcast %137 : vector<8x1xf32> to vector<8x8xf32>
    %139 = arith.subf %135, %138 : vector<8x8xf32>
    %140 = math.exp %139 : vector<8x8xf32>
    %cst_49 = arith.constant dense<0.000000e+00> : vector<8xf32>
    %141 = vector.multi_reduction <add>, %140, %cst_49 [1] : vector<8x8xf32> to vector<8xf32>
    %142 = vector.shape_cast %141 : vector<8xf32> to vector<8x1xf32>
    %143 = tpu.reciprocal %142 {approx = true} : vector<8x1xf32> -> vector<8x1xf32>
    %144 = vector.broadcast %143 : vector<8x1xf32> to vector<8x8xf32>
    %145 = arith.mulf %140, %144 : vector<8x8xf32>
    %cst_50 = arith.constant dense<0.000000e+00> : vector<8x8xf32>
    %146 = tpu.matmul %145, %131, %cst_50 {dimension_numbers = #tpu.dot_dimension_numbers<[1], [0], [0], [1], [0, 0, 1, 1], [], []>} : vector<8x8xf32>, vector<8x8xf32>, vector<8x8xf32> -> vector<8x8xf32>
    %c0_51 = arith.constant 0 : index
    %c16 = arith.constant 16 : index
    %147 = vector.load %arg23[%c0_51, %c16] : memref<16x32xf32, #tpu.memory_space<vmem>>, vector<8x8xf32>
    tpu.vector_store %arg23[%c0_51, %c16], %146 {strides = array<i32>} : memref<16x32xf32, #tpu.memory_space<vmem>>, vector<8x8xf32>,
    %148 = vector.extract_strided_slice %76 {offsets = [0, 24], sizes = [8, 8], strides = [1, 1]} : vector<16x32xf32> to vector<8x8xf32>
    %149 = vector.extract_strided_slice %83 {offsets = [0, 24], sizes = [8, 8], strides = [1, 1]} : vector<16x32xf32> to vector<8x8xf32>
    %150 = vector.extract_strided_slice %90 {offsets = [0, 24], sizes = [8, 8], strides = [1, 1]} : vector<16x32xf32> to vector<8x8xf32>
    %151 = tpu.transpose %149, [1, 0] : vector<8x8xf32> -> vector<8x8xf32>
    %cst_52 = arith.constant dense<0.000000e+00> : vector<8x8xf32>
    %152 = tpu.matmul %148, %151, %cst_52 {dimension_numbers = #tpu.dot_dimension_numbers<[1], [0], [0], [1], [0, 0, 1, 1], [], []>} : vector<8x8xf32>, vector<8x8xf32>, vector<8x8xf32> -> vector<8x8xf32>
    %cst_53 = arith.constant 0.353553385 : f32
    %153 = vector.broadcast %cst_53 : f32 to vector<8x8xf32>
    %154 = arith.mulf %152, %153 : vector<8x8xf32>
    %cst_54 = arith.constant dense<0xFF800000> : vector<8xf32>
    %155 = vector.multi_reduction <maximumf>, %154, %cst_54 [1] : vector<8x8xf32> to vector<8xf32>
    %156 = vector.shape_cast %155 : vector<8xf32> to vector<8x1xf32>
    %157 = vector.broadcast %156 : vector<8x1xf32> to vector<8x8xf32>
    %158 = arith.subf %154, %157 : vector<8x8xf32>
    %159 = math.exp %158 : vector<8x8xf32>
    %cst_55 = arith.constant dense<0.000000e+00> : vector<8xf32>
    %160 = vector.multi_reduction <add>, %159, %cst_55 [1] : vector<8x8xf32> to vector<8xf32>
    %161 = vector.shape_cast %160 : vector<8xf32> to vector<8x1xf32>
    %162 = tpu.reciprocal %161 {approx = true} : vector<8x1xf32> -> vector<8x1xf32>
    %163 = vector.broadcast %162 : vector<8x1xf32> to vector<8x8xf32>
    %164 = arith.mulf %159, %163 : vector<8x8xf32>
    %cst_56 = arith.constant dense<0.000000e+00> : vector<8x8xf32>
    %165 = tpu.matmul %164, %150, %cst_56 {dimension_numbers = #tpu.dot_dimension_numbers<[1], [0], [0], [1], [0, 0, 1, 1], [], []>} : vector<8x8xf32>, vector<8x8xf32>, vector<8x8xf32> -> vector<8x8xf32>
    %c0_57 = arith.constant 0 : index
    %c24 = arith.constant 24 : index
    %166 = vector.load %arg23[%c0_57, %c24] : memref<16x32xf32, #tpu.memory_space<vmem>>, vector<8x8xf32>
    tpu.vector_store %arg23[%c0_57, %c24], %165 {strides = array<i32>} : memref<16x32xf32, #tpu.memory_space<vmem>>, vector<8x8xf32>,
    %167 = vector.extract_strided_slice %76 {offsets = [8, 0], sizes = [8, 8], strides = [1, 1]} : vector<16x32xf32> to vector<8x8xf32>
    %168 = vector.extract_strided_slice %83 {offsets = [8, 0], sizes = [8, 8], strides = [1, 1]} : vector<16x32xf32> to vector<8x8xf32>
    %169 = vector.extract_strided_slice %90 {offsets = [8, 0], sizes = [8, 8], strides = [1, 1]} : vector<16x32xf32> to vector<8x8xf32>
    %170 = tpu.transpose %168, [1, 0] : vector<8x8xf32> -> vector<8x8xf32>
    %cst_58 = arith.constant dense<0.000000e+00> : vector<8x8xf32>
    %171 = tpu.matmul %167, %170, %cst_58 {dimension_numbers = #tpu.dot_dimension_numbers<[1], [0], [0], [1], [0, 0, 1, 1], [], []>} : vector<8x8xf32>, vector<8x8xf32>, vector<8x8xf32> -> vector<8x8xf32>
    %cst_59 = arith.constant 0.353553385 : f32
    %172 = vector.broadcast %cst_59 : f32 to vector<8x8xf32>
    %173 = arith.mulf %171, %172 : vector<8x8xf32>
    %cst_60 = arith.constant dense<0xFF800000> : vector<8xf32>
    %174 = vector.multi_reduction <maximumf>, %173, %cst_60 [1] : vector<8x8xf32> to vector<8xf32>
    %175 = vector.shape_cast %174 : vector<8xf32> to vector<8x1xf32>
    %176 = vector.broadcast %175 : vector<8x1xf32> to vector<8x8xf32>
    %177 = arith.subf %173, %176 : vector<8x8xf32>
    %178 = math.exp %177 : vector<8x8xf32>
    %cst_61 = arith.constant dense<0.000000e+00> : vector<8xf32>
    %179 = vector.multi_reduction <add>, %178, %cst_61 [1] : vector<8x8xf32> to vector<8xf32>
    %180 = vector.shape_cast %179 : vector<8xf32> to vector<8x1xf32>
    %181 = tpu.reciprocal %180 {approx = true} : vector<8x1xf32> -> vector<8x1xf32>
    %182 = vector.broadcast %181 : vector<8x1xf32> to vector<8x8xf32>
    %183 = arith.mulf %178, %182 : vector<8x8xf32>
    %cst_62 = arith.constant dense<0.000000e+00> : vector<8x8xf32>
    %184 = tpu.matmul %183, %169, %cst_62 {dimension_numbers = #tpu.dot_dimension_numbers<[1], [0], [0], [1], [0, 0, 1, 1], [], []>} : vector<8x8xf32>, vector<8x8xf32>, vector<8x8xf32> -> vector<8x8xf32>
    %c8_63 = arith.constant 8 : index
    %c0_64 = arith.constant 0 : index
    %185 = vector.load %arg23[%c8_63, %c0_64] : memref<16x32xf32, #tpu.memory_space<vmem>>, vector<8x8xf32>
    tpu.vector_store %arg23[%c8_63, %c0_64], %184 {strides = array<i32>} : memref<16x32xf32, #tpu.memory_space<vmem>>, vector<8x8xf32>,
    %186 = vector.extract_strided_slice %76 {offsets = [8, 8], sizes = [8, 8], strides = [1, 1]} : vector<16x32xf32> to vector<8x8xf32>
    %187 = vector.extract_strided_slice %83 {offsets = [8, 8], sizes = [8, 8], strides = [1, 1]} : vector<16x32xf32> to vector<8x8xf32>
    %188 = vector.extract_strided_slice %90 {offsets = [8, 8], sizes = [8, 8], strides = [1, 1]} : vector<16x32xf32> to vector<8x8xf32>
    %189 = tpu.transpose %187, [1, 0] : vector<8x8xf32> -> vector<8x8xf32>
    %cst_65 = arith.constant dense<0.000000e+00> : vector<8x8xf32>
    %190 = tpu.matmul %186, %189, %cst_65 {dimension_numbers = #tpu.dot_dimension_numbers<[1], [0], [0], [1], [0, 0, 1, 1], [], []>} : vector<8x8xf32>, vector<8x8xf32>, vector<8x8xf32> -> vector<8x8xf32>
    %cst_66 = arith.constant 0.353553385 : f32
    %191 = vector.broadcast %cst_66 : f32 to vector<8x8xf32>
    %192 = arith.mulf %190, %191 : vector<8x8xf32>
    %cst_67 = arith.constant dense<0xFF800000> : vector<8xf32>
    %193 = vector.multi_reduction <maximumf>, %192, %cst_67 [1] : vector<8x8xf32> to vector<8xf32>
    %194 = vector.shape_cast %193 : vector<8xf32> to vector<8x1xf32>
    %195 = vector.broadcast %194 : vector<8x1xf32> to vector<8x8xf32>
    %196 = arith.subf %192, %195 : vector<8x8xf32>
    %197 = math.exp %196 : vector<8x8xf32>
    %cst_68 = arith.constant dense<0.000000e+00> : vector<8xf32>
    %198 = vector.multi_reduction <add>, %197, %cst_68 [1] : vector<8x8xf32> to vector<8xf32>
    %199 = vector.shape_cast %198 : vector<8xf32> to vector<8x1xf32>
    %200 = tpu.reciprocal %199 {approx = true} : vector<8x1xf32> -> vector<8x1xf32>
    %201 = vector.broadcast %200 : vector<8x1xf32> to vector<8x8xf32>
    %202 = arith.mulf %197, %201 : vector<8x8xf32>
    %cst_69 = arith.constant dense<0.000000e+00> : vector<8x8xf32>
    %203 = tpu.matmul %202, %188, %cst_69 {dimension_numbers = #tpu.dot_dimension_numbers<[1], [0], [0], [1], [0, 0, 1, 1], [], []>} : vector<8x8xf32>, vector<8x8xf32>, vector<8x8xf32> -> vector<8x8xf32>
    %c8_70 = arith.constant 8 : index
    %c8_71 = arith.constant 8 : index
    %204 = vector.load %arg23[%c8_70, %c8_71] : memref<16x32xf32, #tpu.memory_space<vmem>>, vector<8x8xf32>
    tpu.vector_store %arg23[%c8_70, %c8_71], %203 {strides = array<i32>} : memref<16x32xf32, #tpu.memory_space<vmem>>, vector<8x8xf32>,
    %205 = vector.extract_strided_slice %76 {offsets = [8, 16], sizes = [8, 8], strides = [1, 1]} : vector<16x32xf32> to vector<8x8xf32>
    %206 = vector.extract_strided_slice %83 {offsets = [8, 16], sizes = [8, 8], strides = [1, 1]} : vector<16x32xf32> to vector<8x8xf32>
    %207 = vector.extract_strided_slice %90 {offsets = [8, 16], sizes = [8, 8], strides = [1, 1]} : vector<16x32xf32> to vector<8x8xf32>
    %208 = tpu.transpose %206, [1, 0] : vector<8x8xf32> -> vector<8x8xf32>
    %cst_72 = arith.constant dense<0.000000e+00> : vector<8x8xf32>
    %209 = tpu.matmul %205, %208, %cst_72 {dimension_numbers = #tpu.dot_dimension_numbers<[1], [0], [0], [1], [0, 0, 1, 1], [], []>} : vector<8x8xf32>, vector<8x8xf32>, vector<8x8xf32> -> vector<8x8xf32>
    %cst_73 = arith.constant 0.353553385 : f32
    %210 = vector.broadcast %cst_73 : f32 to vector<8x8xf32>
    %211 = arith.mulf %209, %210 : vector<8x8xf32>
    %cst_74 = arith.constant dense<0xFF800000> : vector<8xf32>
    %212 = vector.multi_reduction <maximumf>, %211, %cst_74 [1] : vector<8x8xf32> to vector<8xf32>
    %213 = vector.shape_cast %212 : vector<8xf32> to vector<8x1xf32>
    %214 = vector.broadcast %213 : vector<8x1xf32> to vector<8x8xf32>
    %215 = arith.subf %211, %214 : vector<8x8xf32>
    %216 = math.exp %215 : vector<8x8xf32>
    %cst_75 = arith.constant dense<0.000000e+00> : vector<8xf32>
    %217 = vector.multi_reduction <add>, %216, %cst_75 [1] : vector<8x8xf32> to vector<8xf32>
    %218 = vector.shape_cast %217 : vector<8xf32> to vector<8x1xf32>
    %219 = tpu.reciprocal %218 {approx = true} : vector<8x1xf32> -> vector<8x1xf32>
    %220 = vector.broadcast %219 : vector<8x1xf32> to vector<8x8xf32>
    %221 = arith.mulf %216, %220 : vector<8x8xf32>
    %cst_76 = arith.constant dense<0.000000e+00> : vector<8x8xf32>
    %222 = tpu.matmul %221, %207, %cst_76 {dimension_numbers = #tpu.dot_dimension_numbers<[1], [0], [0], [1], [0, 0, 1, 1], [], []>} : vector<8x8xf32>, vector<8x8xf32>, vector<8x8xf32> -> vector<8x8xf32>
    %c8_77 = arith.constant 8 : index
    %c16_78 = arith.constant 16 : index
    %223 = vector.load %arg23[%c8_77, %c16_78] : memref<16x32xf32, #tpu.memory_space<vmem>>, vector<8x8xf32>
    tpu.vector_store %arg23[%c8_77, %c16_78], %222 {strides = array<i32>} : memref<16x32xf32, #tpu.memory_space<vmem>>, vector<8x8xf32>,
    %224 = vector.extract_strided_slice %76 {offsets = [8, 24], sizes = [8, 8], strides = [1, 1]} : vector<16x32xf32> to vector<8x8xf32>
    %225 = vector.extract_strided_slice %83 {offsets = [8, 24], sizes = [8, 8], strides = [1, 1]} : vector<16x32xf32> to vector<8x8xf32>
    %226 = vector.extract_strided_slice %90 {offsets = [8, 24], sizes = [8, 8], strides = [1, 1]} : vector<16x32xf32> to vector<8x8xf32>
    %227 = tpu.transpose %225, [1, 0] : vector<8x8xf32> -> vector<8x8xf32>
    %cst_79 = arith.constant dense<0.000000e+00> : vector<8x8xf32>
    %228 = tpu.matmul %224, %227, %cst_79 {dimension_numbers = #tpu.dot_dimension_numbers<[1], [0], [0], [1], [0, 0, 1, 1], [], []>} : vector<8x8xf32>, vector<8x8xf32>, vector<8x8xf32> -> vector<8x8xf32>
    %cst_80 = arith.constant 0.353553385 : f32
    %229 = vector.broadcast %cst_80 : f32 to vector<8x8xf32>
    %230 = arith.mulf %228, %229 : vector<8x8xf32>
    %cst_81 = arith.constant dense<0xFF800000> : vector<8xf32>
    %231 = vector.multi_reduction <maximumf>, %230, %cst_81 [1] : vector<8x8xf32> to vector<8xf32>
    %232 = vector.shape_cast %231 : vector<8xf32> to vector<8x1xf32>
    %233 = vector.broadcast %232 : vector<8x1xf32> to vector<8x8xf32>
    %234 = arith.subf %230, %233 : vector<8x8xf32>
    %235 = math.exp %234 : vector<8x8xf32>
    %cst_82 = arith.constant dense<0.000000e+00> : vector<8xf32>
    %236 = vector.multi_reduction <add>, %235, %cst_82 [1] : vector<8x8xf32> to vector<8xf32>
    %237 = vector.shape_cast %236 : vector<8xf32> to vector<8x1xf32>
    %238 = tpu.reciprocal %237 {approx = true} : vector<8x1xf32> -> vector<8x1xf32>
    %239 = vector.broadcast %238 : vector<8x1xf32> to vector<8x8xf32>
    %240 = arith.mulf %235, %239 : vector<8x8xf32>
    %cst_83 = arith.constant dense<0.000000e+00> : vector<8x8xf32>
    %241 = tpu.matmul %240, %226, %cst_83 {dimension_numbers = #tpu.dot_dimension_numbers<[1], [0], [0], [1], [0, 0, 1, 1], [], []>} : vector<8x8xf32>, vector<8x8xf32>, vector<8x8xf32> -> vector<8x8xf32>
    %c8_84 = arith.constant 8 : index
    %c24_85 = arith.constant 24 : index
    %242 = vector.load %arg23[%c8_84, %c24_85] : memref<16x32xf32, #tpu.memory_space<vmem>>, vector<8x8xf32>
    tpu.vector_store %arg23[%c8_84, %c24_85], %241 {strides = array<i32>} : memref<16x32xf32, #tpu.memory_space<vmem>>, vector<8x8xf32>,
    %c0_86 = arith.constant 0 : index
    %c0_87 = arith.constant 0 : index
    %243 = vector.load %arg23[%c0_86, %c0_87] : memref<16x32xf32, #tpu.memory_space<vmem>>, vector<16x32xf32>
    %244 = arith.truncf %243 : vector<16x32xf32> to vector<16x32xbf16>
    %c0_88 = arith.constant 0 : index
    %c0_89 = arith.constant 0 : index
    %c0_90 = arith.constant 0 : index
    %245 = vector.load %arg10[%c0_88, %c0_89, %c0_90] : memref<2x32x32xbf16, #tpu.memory_space<vmem>>, vector<1x32x32xbf16>
    %246 = vector.shape_cast %245 : vector<1x32x32xbf16> to vector<32x32xbf16>
    %cst_91 = arith.constant dense<0.000000e+00> : vector<16x32xf32>
    %247 = tpu.matmul %244, %246, %cst_91 {dimension_numbers = #tpu.dot_dimension_numbers<[1], [0], [0], [1], [0, 0, 1, 1], [], []>} : vector<16x32xbf16>, vector<32x32xbf16>, vector<16x32xf32> -> vector<16x32xf32>
    %c0_92 = arith.constant 0 : index
    %c0_93 = arith.constant 0 : index
    %c0_94 = arith.constant 0 : index
    %248 = vector.load %arg11[%c0_92, %c0_93, %c0_94] : memref<2x1x32xf32, #tpu.memory_space<vmem>>, vector<1x1x32xf32>
    %249 = vector.shape_cast %248 : vector<1x1x32xf32> to vector<1x32xf32>
    %250 = vector.broadcast %249 : vector<1x32xf32> to vector<16x32xf32>
    %251 = arith.addf %247, %250 : vector<16x32xf32>
    %252 = arith.addf %68, %251 : vector<16x32xf32>
    %c0_95 = arith.constant 0 : index
    %c0_96 = arith.constant 0 : index
    %c0_97 = arith.constant 0 : index
    %253 = vector.load %arg12[%c0_95, %c0_96, %c0_97] : memref<2x1x32xf32, #tpu.memory_space<vmem>>, vector<1x1x32xf32>
    %254 = vector.shape_cast %253 : vector<1x1x32xf32> to vector<1x32xf32>
    %c0_98 = arith.constant 0 : index
    %c0_99 = arith.constant 0 : index
    %c0_100 = arith.constant 0 : index
    %255 = vector.load %arg13[%c0_98, %c0_99, %c0_100] : memref<2x1x32xf32, #tpu.memory_space<vmem>>, vector<1x1x32xf32>
    %256 = vector.shape_cast %255 : vector<1x1x32xf32> to vector<1x32xf32>
    %cst_101 = arith.constant dense<0.000000e+00> : vector<16xf32>
    %257 = vector.multi_reduction <add>, %252, %cst_101 [1] : vector<16x32xf32> to vector<16xf32>
    %258 = vector.shape_cast %257 : vector<16xf32> to vector<16x1xf32>
    %cst_102 = arith.constant 3.200000e+01 : f32
    %259 = vector.broadcast %cst_102 : f32 to vector<16x1xf32>
    %260 = arith.divf %258, %259 : vector<16x1xf32>
    %261 = vector.broadcast %260 : vector<16x1xf32> to vector<16x32xf32>
    %262 = arith.subf %252, %261 : vector<16x32xf32>
    %263 = arith.mulf %262, %262 : vector<16x32xf32>
    %cst_103 = arith.constant dense<0.000000e+00> : vector<16xf32>
    %264 = vector.multi_reduction <add>, %263, %cst_103 [1] : vector<16x32xf32> to vector<16xf32>
    %265 = vector.shape_cast %264 : vector<16xf32> to vector<16x1xf32>
    %cst_104 = arith.constant 3.200000e+01 : f32
    %266 = vector.broadcast %cst_104 : f32 to vector<16x1xf32>
    %267 = arith.divf %265, %266 : vector<16x1xf32>
    %cst_105 = arith.constant 9.99999996E-13 : f32
    %268 = vector.broadcast %cst_105 : f32 to vector<16x1xf32>
    %269 = arith.addf %267, %268 : vector<16x1xf32>
    %270 = math.rsqrt %269 : vector<16x1xf32>
    %271 = vector.broadcast %270 : vector<16x1xf32> to vector<16x32xf32>
    %272 = arith.mulf %262, %271 : vector<16x32xf32>
    %273 = vector.broadcast %254 : vector<1x32xf32> to vector<16x32xf32>
    %274 = arith.mulf %272, %273 : vector<16x32xf32>
    %275 = vector.broadcast %256 : vector<1x32xf32> to vector<16x32xf32>
    %276 = arith.addf %274, %275 : vector<16x32xf32>
    %277 = arith.truncf %276 : vector<16x32xf32> to vector<16x32xbf16>
    %c0_106 = arith.constant 0 : index
    %c0_107 = arith.constant 0 : index
    %c0_108 = arith.constant 0 : index
    %278 = vector.load %arg14[%c0_106, %c0_107, %c0_108] : memref<2x32x64xbf16, #tpu.memory_space<vmem>>, vector<1x32x64xbf16>
    %279 = vector.shape_cast %278 : vector<1x32x64xbf16> to vector<32x64xbf16>
    %cst_109 = arith.constant dense<0.000000e+00> : vector<16x64xf32>
    %280 = tpu.matmul %277, %279, %cst_109 {dimension_numbers = #tpu.dot_dimension_numbers<[1], [0], [0], [1], [0, 0, 1, 1], [], []>} : vector<16x32xbf16>, vector<32x64xbf16>, vector<16x64xf32> -> vector<16x64xf32>
    %c0_110 = arith.constant 0 : index
    %c0_111 = arith.constant 0 : index
    %c0_112 = arith.constant 0 : index
    %281 = vector.load %arg15[%c0_110, %c0_111, %c0_112] : memref<2x1x64xf32, #tpu.memory_space<vmem>>, vector<1x1x64xf32>
    %282 = vector.shape_cast %281 : vector<1x1x64xf32> to vector<1x64xf32>
    %283 = vector.broadcast %282 : vector<1x64xf32> to vector<16x64xf32>
    %284 = arith.addf %280, %283 : vector<16x64xf32>
    %cst_113 = arith.constant 5.000000e-01 : f32
    %285 = vector.broadcast %cst_113 : f32 to vector<16x64xf32>
    %286 = arith.mulf %285, %284 : vector<16x64xf32>
    %cst_114 = arith.constant 4.471500e-02 : f32
    %287 = vector.broadcast %cst_114 : f32 to vector<16x64xf32>
    %288 = arith.mulf %287, %284 : vector<16x64xf32>
    %289 = arith.mulf %288, %284 : vector<16x64xf32>
    %290 = arith.mulf %289, %284 : vector<16x64xf32>
    %291 = arith.addf %284, %290 : vector<16x64xf32>
    %cst_115 = arith.constant 0.797884583 : f32
    %292 = vector.broadcast %cst_115 : f32 to vector<16x64xf32>
    %293 = arith.mulf %292, %291 : vector<16x64xf32>
    %294 = math.tanh %293 : vector<16x64xf32>
    %cst_116 = arith.constant 1.000000e+00 : f32
    %295 = vector.broadcast %cst_116 : f32 to vector<16x64xf32>
    %296 = arith.addf %295, %294 : vector<16x64xf32>
    %297 = arith.mulf %286, %296 : vector<16x64xf32>
    %298 = arith.truncf %297 : vector<16x64xf32> to vector<16x64xbf16>
    %c0_117 = arith.constant 0 : index
    %c0_118 = arith.constant 0 : index
    %c0_119 = arith.constant 0 : index
    %299 = vector.load %arg16[%c0_117, %c0_118, %c0_119] : memref<2x64x32xbf16, #tpu.memory_space<vmem>>, vector<1x64x32xbf16>
    %300 = vector.shape_cast %299 : vector<1x64x32xbf16> to vector<64x32xbf16>
    %cst_120 = arith.constant dense<0.000000e+00> : vector<16x32xf32>
    %301 = tpu.matmul %298, %300, %cst_120 {dimension_numbers = #tpu.dot_dimension_numbers<[1], [0], [0], [1], [0, 0, 1, 1], [], []>} : vector<16x64xbf16>, vector<64x32xbf16>, vector<16x32xf32> -> vector<16x32xf32>
    %c0_121 = arith.constant 0 : index
    %c0_122 = arith.constant 0 : index
    %c0_123 = arith.constant 0 : index
    %302 = vector.load %arg17[%c0_121, %c0_122, %c0_123] : memref<2x1x32xf32, #tpu.memory_space<vmem>>, vector<1x1x32xf32>
    %303 = vector.shape_cast %302 : vector<1x1x32xf32> to vector<1x32xf32>
    %304 = vector.broadcast %303 : vector<1x32xf32> to vector<16x32xf32>
    %305 = arith.addf %301, %304 : vector<16x32xf32>
    %306 = arith.addf %276, %305 : vector<16x32xf32>
    %c0_124 = arith.constant 0 : index
    %c0_125 = arith.constant 0 : index
    %c0_126 = arith.constant 0 : index
    %307 = vector.load %arg18[%c0_124, %c0_125, %c0_126] : memref<2x1x32xf32, #tpu.memory_space<vmem>>, vector<1x1x32xf32>
    %308 = vector.shape_cast %307 : vector<1x1x32xf32> to vector<1x32xf32>
    %c0_127 = arith.constant 0 : index
    %c0_128 = arith.constant 0 : index
    %c0_129 = arith.constant 0 : index
    %309 = vector.load %arg19[%c0_127, %c0_128, %c0_129] : memref<2x1x32xf32, #tpu.memory_space<vmem>>, vector<1x1x32xf32>
    %310 = vector.shape_cast %309 : vector<1x1x32xf32> to vector<1x32xf32>
    %cst_130 = arith.constant dense<0.000000e+00> : vector<16xf32>
    %311 = vector.multi_reduction <add>, %306, %cst_130 [1] : vector<16x32xf32> to vector<16xf32>
    %312 = vector.shape_cast %311 : vector<16xf32> to vector<16x1xf32>
    %cst_131 = arith.constant 3.200000e+01 : f32
    %313 = vector.broadcast %cst_131 : f32 to vector<16x1xf32>
    %314 = arith.divf %312, %313 : vector<16x1xf32>
    %315 = vector.broadcast %314 : vector<16x1xf32> to vector<16x32xf32>
    %316 = arith.subf %306, %315 : vector<16x32xf32>
    %317 = arith.mulf %316, %316 : vector<16x32xf32>
    %cst_132 = arith.constant dense<0.000000e+00> : vector<16xf32>
    %318 = vector.multi_reduction <add>, %317, %cst_132 [1] : vector<16x32xf32> to vector<16xf32>
    %319 = vector.shape_cast %318 : vector<16xf32> to vector<16x1xf32>
    %cst_133 = arith.constant 3.200000e+01 : f32
    %320 = vector.broadcast %cst_133 : f32 to vector<16x1xf32>
    %321 = arith.divf %319, %320 : vector<16x1xf32>
    %cst_134 = arith.constant 9.99999996E-13 : f32
    %322 = vector.broadcast %cst_134 : f32 to vector<16x1xf32>
    %323 = arith.addf %321, %322 : vector<16x1xf32>
    %324 = math.rsqrt %323 : vector<16x1xf32>
    %325 = vector.broadcast %324 : vector<16x1xf32> to vector<16x32xf32>
    %326 = arith.mulf %316, %325 : vector<16x32xf32>
    %327 = vector.broadcast %308 : vector<1x32xf32> to vector<16x32xf32>
    %328 = arith.mulf %326, %327 : vector<16x32xf32>
    %329 = vector.broadcast %310 : vector<1x32xf32> to vector<16x32xf32>
    %330 = arith.addf %328, %329 : vector<16x32xf32>
    %331 = arith.truncf %330 : vector<16x32xf32> to vector<16x32xbf16>
    %c1_135 = arith.constant 1 : index
    %c0_136 = arith.constant 0 : index
    %c0_137 = arith.constant 0 : index
    %332 = vector.load %arg4[%c1_135, %c0_136, %c0_137] : memref<2x32x32xbf16, #tpu.memory_space<vmem>>, vector<1x32x32xbf16>
    %333 = vector.shape_cast %332 : vector<1x32x32xbf16> to vector<32x32xbf16>
    %cst_138 = arith.constant dense<0.000000e+00> : vector<16x32xf32>
    %334 = tpu.matmul %331, %333, %cst_138 {dimension_numbers = #tpu.dot_dimension_numbers<[1], [0], [0], [1], [0, 0, 1, 1], [], []>} : vector<16x32xbf16>, vector<32x32xbf16>, vector<16x32xf32> -> vector<16x32xf32>
    %c1_139 = arith.constant 1 : index
    %c0_140 = arith.constant 0 : index
    %c0_141 = arith.constant 0 : index
    %335 = vector.load %arg5[%c1_139, %c0_140, %c0_141] : memref<2x1x32xf32, #tpu.memory_space<vmem>>, vector<1x1x32xf32>
    %336 = vector.shape_cast %335 : vector<1x1x32xf32> to vector<1x32xf32>
    %337 = vector.broadcast %336 : vector<1x32xf32> to vector<16x32xf32>
    %338 = arith.addf %334, %337 : vector<16x32xf32>
    %c1_142 = arith.constant 1 : index
    %c0_143 = arith.constant 0 : index
    %c0_144 = arith.constant 0 : index
    %339 = vector.load %arg6[%c1_142, %c0_143, %c0_144] : memref<2x32x32xbf16, #tpu.memory_space<vmem>>, vector<1x32x32xbf16>
    %340 = vector.shape_cast %339 : vector<1x32x32xbf16> to vector<32x32xbf16>
    %cst_145 = arith.constant dense<0.000000e+00> : vector<16x32xf32>
    %341 = tpu.matmul %331, %340, %cst_145 {dimension_numbers = #tpu.dot_dimension_numbers<[1], [0], [0], [1], [0, 0, 1, 1], [], []>} : vector<16x32xbf16>, vector<32x32xbf16>, vector<16x32xf32> -> vector<16x32xf32>
    %c1_146 = arith.constant 1 : index
    %c0_147 = arith.constant 0 : index
    %c0_148 = arith.constant 0 : index
    %342 = vector.load %arg7[%c1_146, %c0_147, %c0_148] : memref<2x1x32xf32, #tpu.memory_space<vmem>>, vector<1x1x32xf32>
    %343 = vector.shape_cast %342 : vector<1x1x32xf32> to vector<1x32xf32>
    %344 = vector.broadcast %343 : vector<1x32xf32> to vector<16x32xf32>
    %345 = arith.addf %341, %344 : vector<16x32xf32>
    %c1_149 = arith.constant 1 : index
    %c0_150 = arith.constant 0 : index
    %c0_151 = arith.constant 0 : index
    %346 = vector.load %arg8[%c1_149, %c0_150, %c0_151] : memref<2x32x32xbf16, #tpu.memory_space<vmem>>, vector<1x32x32xbf16>
    %347 = vector.shape_cast %346 : vector<1x32x32xbf16> to vector<32x32xbf16>
    %cst_152 = arith.constant dense<0.000000e+00> : vector<16x32xf32>
    %348 = tpu.matmul %331, %347, %cst_152 {dimension_numbers = #tpu.dot_dimension_numbers<[1], [0], [0], [1], [0, 0, 1, 1], [], []>} : vector<16x32xbf16>, vector<32x32xbf16>, vector<16x32xf32> -> vector<16x32xf32>
    %c1_153 = arith.constant 1 : index
    %c0_154 = arith.constant 0 : index
    %c0_155 = arith.constant 0 : index
    %349 = vector.load %arg9[%c1_153, %c0_154, %c0_155] : memref<2x1x32xf32, #tpu.memory_space<vmem>>, vector<1x1x32xf32>
    %350 = vector.shape_cast %349 : vector<1x1x32xf32> to vector<1x32xf32>
    %351 = vector.broadcast %350 : vector<1x32xf32> to vector<16x32xf32>
    %352 = arith.addf %348, %351 : vector<16x32xf32>
    %353 = vector.extract_strided_slice %338 {offsets = [0, 0], sizes = [8, 8], strides = [1, 1]} : vector<16x32xf32> to vector<8x8xf32>
    %354 = vector.extract_strided_slice %345 {offsets = [0, 0], sizes = [8, 8], strides = [1, 1]} : vector<16x32xf32> to vector<8x8xf32>
    %355 = vector.extract_strided_slice %352 {offsets = [0, 0], sizes = [8, 8], strides = [1, 1]} : vector<16x32xf32> to vector<8x8xf32>
    %356 = tpu.transpose %354, [1, 0] : vector<8x8xf32> -> vector<8x8xf32>
    %cst_156 = arith.constant dense<0.000000e+00> : vector<8x8xf32>
    %357 = tpu.matmul %353, %356, %cst_156 {dimension_numbers = #tpu.dot_dimension_numbers<[1], [0], [0], [1], [0, 0, 1, 1], [], []>} : vector<8x8xf32>, vector<8x8xf32>, vector<8x8xf32> -> vector<8x8xf32>
    %cst_157 = arith.constant 0.353553385 : f32
    %358 = vector.broadcast %cst_157 : f32 to vector<8x8xf32>
    %359 = arith.mulf %357, %358 : vector<8x8xf32>
    %cst_158 = arith.constant dense<0xFF800000> : vector<8xf32>
    %360 = vector.multi_reduction <maximumf>, %359, %cst_158 [1] : vector<8x8xf32> to vector<8xf32>
    %361 = vector.shape_cast %360 : vector<8xf32> to vector<8x1xf32>
    %362 = vector.broadcast %361 : vector<8x1xf32> to vector<8x8xf32>
    %363 = arith.subf %359, %362 : vector<8x8xf32>
    %364 = math.exp %363 : vector<8x8xf32>
    %cst_159 = arith.constant dense<0.000000e+00> : vector<8xf32>
    %365 = vector.multi_reduction <add>, %364, %cst_159 [1] : vector<8x8xf32> to vector<8xf32>
    %366 = vector.shape_cast %365 : vector<8xf32> to vector<8x1xf32>
    %367 = tpu.reciprocal %366 {approx = true} : vector<8x1xf32> -> vector<8x1xf32>
    %368 = vector.broadcast %367 : vector<8x1xf32> to vector<8x8xf32>
    %369 = arith.mulf %364, %368 : vector<8x8xf32>
    %cst_160 = arith.constant dense<0.000000e+00> : vector<8x8xf32>
    %370 = tpu.matmul %369, %355, %cst_160 {dimension_numbers = #tpu.dot_dimension_numbers<[1], [0], [0], [1], [0, 0, 1, 1], [], []>} : vector<8x8xf32>, vector<8x8xf32>, vector<8x8xf32> -> vector<8x8xf32>
    %c0_161 = arith.constant 0 : index
    %c0_162 = arith.constant 0 : index
    %371 = vector.load %arg23[%c0_161, %c0_162] : memref<16x32xf32, #tpu.memory_space<vmem>>, vector<8x8xf32>
    tpu.vector_store %arg23[%c0_161, %c0_162], %370 {strides = array<i32>} : memref<16x32xf32, #tpu.memory_space<vmem>>, vector<8x8xf32>,
    %372 = vector.extract_strided_slice %338 {offsets = [0, 8], sizes = [8, 8], strides = [1, 1]} : vector<16x32xf32> to vector<8x8xf32>
    %373 = vector.extract_strided_slice %345 {offsets = [0, 8], sizes = [8, 8], strides = [1, 1]} : vector<16x32xf32> to vector<8x8xf32>
    %374 = vector.extract_strided_slice %352 {offsets = [0, 8], sizes = [8, 8], strides = [1, 1]} : vector<16x32xf32> to vector<8x8xf32>
    %375 = tpu.transpose %373, [1, 0] : vector<8x8xf32> -> vector<8x8xf32>
    %cst_163 = arith.constant dense<0.000000e+00> : vector<8x8xf32>
    %376 = tpu.matmul %372, %375, %cst_163 {dimension_numbers = #tpu.dot_dimension_numbers<[1], [0], [0], [1], [0, 0, 1, 1], [], []>} : vector<8x8xf32>, vector<8x8xf32>, vector<8x8xf32> -> vector<8x8xf32>
    %cst_164 = arith.constant 0.353553385 : f32
    %377 = vector.broadcast %cst_164 : f32 to vector<8x8xf32>
    %378 = arith.mulf %376, %377 : vector<8x8xf32>
    %cst_165 = arith.constant dense<0xFF800000> : vector<8xf32>
    %379 = vector.multi_reduction <maximumf>, %378, %cst_165 [1] : vector<8x8xf32> to vector<8xf32>
    %380 = vector.shape_cast %379 : vector<8xf32> to vector<8x1xf32>
    %381 = vector.broadcast %380 : vector<8x1xf32> to vector<8x8xf32>
    %382 = arith.subf %378, %381 : vector<8x8xf32>
    %383 = math.exp %382 : vector<8x8xf32>
    %cst_166 = arith.constant dense<0.000000e+00> : vector<8xf32>
    %384 = vector.multi_reduction <add>, %383, %cst_166 [1] : vector<8x8xf32> to vector<8xf32>
    %385 = vector.shape_cast %384 : vector<8xf32> to vector<8x1xf32>
    %386 = tpu.reciprocal %385 {approx = true} : vector<8x1xf32> -> vector<8x1xf32>
    %387 = vector.broadcast %386 : vector<8x1xf32> to vector<8x8xf32>
    %388 = arith.mulf %383, %387 : vector<8x8xf32>
    %cst_167 = arith.constant dense<0.000000e+00> : vector<8x8xf32>
    %389 = tpu.matmul %388, %374, %cst_167 {dimension_numbers = #tpu.dot_dimension_numbers<[1], [0], [0], [1], [0, 0, 1, 1], [], []>} : vector<8x8xf32>, vector<8x8xf32>, vector<8x8xf32> -> vector<8x8xf32>
    %c0_168 = arith.constant 0 : index
    %c8_169 = arith.constant 8 : index
    %390 = vector.load %arg23[%c0_168, %c8_169] : memref<16x32xf32, #tpu.memory_space<vmem>>, vector<8x8xf32>
    tpu.vector_store %arg23[%c0_168, %c8_169], %389 {strides = array<i32>} : memref<16x32xf32, #tpu.memory_space<vmem>>, vector<8x8xf32>,
    %391 = vector.extract_strided_slice %338 {offsets = [0, 16], sizes = [8, 8], strides = [1, 1]} : vector<16x32xf32> to vector<8x8xf32>
    %392 = vector.extract_strided_slice %345 {offsets = [0, 16], sizes = [8, 8], strides = [1, 1]} : vector<16x32xf32> to vector<8x8xf32>
    %393 = vector.extract_strided_slice %352 {offsets = [0, 16], sizes = [8, 8], strides = [1, 1]} : vector<16x32xf32> to vector<8x8xf32>
    %394 = tpu.transpose %392, [1, 0] : vector<8x8xf32> -> vector<8x8xf32>
    %cst_170 = arith.constant dense<0.000000e+00> : vector<8x8xf32>
    %395 = tpu.matmul %391, %394, %cst_170 {dimension_numbers = #tpu.dot_dimension_numbers<[1], [0], [0], [1], [0, 0, 1, 1], [], []>} : vector<8x8xf32>, vector<8x8xf32>, vector<8x8xf32> -> vector<8x8xf32>
    %cst_171 = arith.constant 0.353553385 : f32
    %396 = vector.broadcast %cst_171 : f32 to vector<8x8xf32>
    %397 = arith.mulf %395, %396 : vector<8x8xf32>
    %cst_172 = arith.constant dense<0xFF800000> : vector<8xf32>
    %398 = vector.multi_reduction <maximumf>, %397, %cst_172 [1] : vector<8x8xf32> to vector<8xf32>
    %399 = vector.shape_cast %398 : vector<8xf32> to vector<8x1xf32>
    %400 = vector.broadcast %399 : vector<8x1xf32> to vector<8x8xf32>
    %401 = arith.subf %397, %400 : vector<8x8xf32>
    %402 = math.exp %401 : vector<8x8xf32>
    %cst_173 = arith.constant dense<0.000000e+00> : vector<8xf32>
    %403 = vector.multi_reduction <add>, %402, %cst_173 [1] : vector<8x8xf32> to vector<8xf32>
    %404 = vector.shape_cast %403 : vector<8xf32> to vector<8x1xf32>
    %405 = tpu.reciprocal %404 {approx = true} : vector<8x1xf32> -> vector<8x1xf32>
    %406 = vector.broadcast %405 : vector<8x1xf32> to vector<8x8xf32>
    %407 = arith.mulf %402, %406 : vector<8x8xf32>
    %cst_174 = arith.constant dense<0.000000e+00> : vector<8x8xf32>
    %408 = tpu.matmul %407, %393, %cst_174 {dimension_numbers = #tpu.dot_dimension_numbers<[1], [0], [0], [1], [0, 0, 1, 1], [], []>} : vector<8x8xf32>, vector<8x8xf32>, vector<8x8xf32> -> vector<8x8xf32>
    %c0_175 = arith.constant 0 : index
    %c16_176 = arith.constant 16 : index
    %409 = vector.load %arg23[%c0_175, %c16_176] : memref<16x32xf32, #tpu.memory_space<vmem>>, vector<8x8xf32>
    tpu.vector_store %arg23[%c0_175, %c16_176], %408 {strides = array<i32>} : memref<16x32xf32, #tpu.memory_space<vmem>>, vector<8x8xf32>,
    %410 = vector.extract_strided_slice %338 {offsets = [0, 24], sizes = [8, 8], strides = [1, 1]} : vector<16x32xf32> to vector<8x8xf32>
    %411 = vector.extract_strided_slice %345 {offsets = [0, 24], sizes = [8, 8], strides = [1, 1]} : vector<16x32xf32> to vector<8x8xf32>
    %412 = vector.extract_strided_slice %352 {offsets = [0, 24], sizes = [8, 8], strides = [1, 1]} : vector<16x32xf32> to vector<8x8xf32>
    %413 = tpu.transpose %411, [1, 0] : vector<8x8xf32> -> vector<8x8xf32>
    %cst_177 = arith.constant dense<0.000000e+00> : vector<8x8xf32>
    %414 = tpu.matmul %410, %413, %cst_177 {dimension_numbers = #tpu.dot_dimension_numbers<[1], [0], [0], [1], [0, 0, 1, 1], [], []>} : vector<8x8xf32>, vector<8x8xf32>, vector<8x8xf32> -> vector<8x8xf32>
    %cst_178 = arith.constant 0.353553385 : f32
    %415 = vector.broadcast %cst_178 : f32 to vector<8x8xf32>
    %416 = arith.mulf %414, %415 : vector<8x8xf32>
    %cst_179 = arith.constant dense<0xFF800000> : vector<8xf32>
    %417 = vector.multi_reduction <maximumf>, %416, %cst_179 [1] : vector<8x8xf32> to vector<8xf32>
    %418 = vector.shape_cast %417 : vector<8xf32> to vector<8x1xf32>
    %419 = vector.broadcast %418 : vector<8x1xf32> to vector<8x8xf32>
    %420 = arith.subf %416, %419 : vector<8x8xf32>
    %421 = math.exp %420 : vector<8x8xf32>
    %cst_180 = arith.constant dense<0.000000e+00> : vector<8xf32>
    %422 = vector.multi_reduction <add>, %421, %cst_180 [1] : vector<8x8xf32> to vector<8xf32>
    %423 = vector.shape_cast %422 : vector<8xf32> to vector<8x1xf32>
    %424 = tpu.reciprocal %423 {approx = true} : vector<8x1xf32> -> vector<8x1xf32>
    %425 = vector.broadcast %424 : vector<8x1xf32> to vector<8x8xf32>
    %426 = arith.mulf %421, %425 : vector<8x8xf32>
    %cst_181 = arith.constant dense<0.000000e+00> : vector<8x8xf32>
    %427 = tpu.matmul %426, %412, %cst_181 {dimension_numbers = #tpu.dot_dimension_numbers<[1], [0], [0], [1], [0, 0, 1, 1], [], []>} : vector<8x8xf32>, vector<8x8xf32>, vector<8x8xf32> -> vector<8x8xf32>
    %c0_182 = arith.constant 0 : index
    %c24_183 = arith.constant 24 : index
    %428 = vector.load %arg23[%c0_182, %c24_183] : memref<16x32xf32, #tpu.memory_space<vmem>>, vector<8x8xf32>
    tpu.vector_store %arg23[%c0_182, %c24_183], %427 {strides = array<i32>} : memref<16x32xf32, #tpu.memory_space<vmem>>, vector<8x8xf32>,
    %429 = vector.extract_strided_slice %338 {offsets = [8, 0], sizes = [8, 8], strides = [1, 1]} : vector<16x32xf32> to vector<8x8xf32>
    %430 = vector.extract_strided_slice %345 {offsets = [8, 0], sizes = [8, 8], strides = [1, 1]} : vector<16x32xf32> to vector<8x8xf32>
    %431 = vector.extract_strided_slice %352 {offsets = [8, 0], sizes = [8, 8], strides = [1, 1]} : vector<16x32xf32> to vector<8x8xf32>
    %432 = tpu.transpose %430, [1, 0] : vector<8x8xf32> -> vector<8x8xf32>
    %cst_184 = arith.constant dense<0.000000e+00> : vector<8x8xf32>
    %433 = tpu.matmul %429, %432, %cst_184 {dimension_numbers = #tpu.dot_dimension_numbers<[1], [0], [0], [1], [0, 0, 1, 1], [], []>} : vector<8x8xf32>, vector<8x8xf32>, vector<8x8xf32> -> vector<8x8xf32>
    %cst_185 = arith.constant 0.353553385 : f32
    %434 = vector.broadcast %cst_185 : f32 to vector<8x8xf32>
    %435 = arith.mulf %433, %434 : vector<8x8xf32>
    %cst_186 = arith.constant dense<0xFF800000> : vector<8xf32>
    %436 = vector.multi_reduction <maximumf>, %435, %cst_186 [1] : vector<8x8xf32> to vector<8xf32>
    %437 = vector.shape_cast %436 : vector<8xf32> to vector<8x1xf32>
    %438 = vector.broadcast %437 : vector<8x1xf32> to vector<8x8xf32>
    %439 = arith.subf %435, %438 : vector<8x8xf32>
    %440 = math.exp %439 : vector<8x8xf32>
    %cst_187 = arith.constant dense<0.000000e+00> : vector<8xf32>
    %441 = vector.multi_reduction <add>, %440, %cst_187 [1] : vector<8x8xf32> to vector<8xf32>
    %442 = vector.shape_cast %441 : vector<8xf32> to vector<8x1xf32>
    %443 = tpu.reciprocal %442 {approx = true} : vector<8x1xf32> -> vector<8x1xf32>
    %444 = vector.broadcast %443 : vector<8x1xf32> to vector<8x8xf32>
    %445 = arith.mulf %440, %444 : vector<8x8xf32>
    %cst_188 = arith.constant dense<0.000000e+00> : vector<8x8xf32>
    %446 = tpu.matmul %445, %431, %cst_188 {dimension_numbers = #tpu.dot_dimension_numbers<[1], [0], [0], [1], [0, 0, 1, 1], [], []>} : vector<8x8xf32>, vector<8x8xf32>, vector<8x8xf32> -> vector<8x8xf32>
    %c8_189 = arith.constant 8 : index
    %c0_190 = arith.constant 0 : index
    %447 = vector.load %arg23[%c8_189, %c0_190] : memref<16x32xf32, #tpu.memory_space<vmem>>, vector<8x8xf32>
    tpu.vector_store %arg23[%c8_189, %c0_190], %446 {strides = array<i32>} : memref<16x32xf32, #tpu.memory_space<vmem>>, vector<8x8xf32>,
    %448 = vector.extract_strided_slice %338 {offsets = [8, 8], sizes = [8, 8], strides = [1, 1]} : vector<16x32xf32> to vector<8x8xf32>
    %449 = vector.extract_strided_slice %345 {offsets = [8, 8], sizes = [8, 8], strides = [1, 1]} : vector<16x32xf32> to vector<8x8xf32>
    %450 = vector.extract_strided_slice %352 {offsets = [8, 8], sizes = [8, 8], strides = [1, 1]} : vector<16x32xf32> to vector<8x8xf32>
    %451 = tpu.transpose %449, [1, 0] : vector<8x8xf32> -> vector<8x8xf32>
    %cst_191 = arith.constant dense<0.000000e+00> : vector<8x8xf32>
    %452 = tpu.matmul %448, %451, %cst_191 {dimension_numbers = #tpu.dot_dimension_numbers<[1], [0], [0], [1], [0, 0, 1, 1], [], []>} : vector<8x8xf32>, vector<8x8xf32>, vector<8x8xf32> -> vector<8x8xf32>
    %cst_192 = arith.constant 0.353553385 : f32
    %453 = vector.broadcast %cst_192 : f32 to vector<8x8xf32>
    %454 = arith.mulf %452, %453 : vector<8x8xf32>
    %cst_193 = arith.constant dense<0xFF800000> : vector<8xf32>
    %455 = vector.multi_reduction <maximumf>, %454, %cst_193 [1] : vector<8x8xf32> to vector<8xf32>
    %456 = vector.shape_cast %455 : vector<8xf32> to vector<8x1xf32>
    %457 = vector.broadcast %456 : vector<8x1xf32> to vector<8x8xf32>
    %458 = arith.subf %454, %457 : vector<8x8xf32>
    %459 = math.exp %458 : vector<8x8xf32>
    %cst_194 = arith.constant dense<0.000000e+00> : vector<8xf32>
    %460 = vector.multi_reduction <add>, %459, %cst_194 [1] : vector<8x8xf32> to vector<8xf32>
    %461 = vector.shape_cast %460 : vector<8xf32> to vector<8x1xf32>
    %462 = tpu.reciprocal %461 {approx = true} : vector<8x1xf32> -> vector<8x1xf32>
    %463 = vector.broadcast %462 : vector<8x1xf32> to vector<8x8xf32>
    %464 = arith.mulf %459, %463 : vector<8x8xf32>
    %cst_195 = arith.constant dense<0.000000e+00> : vector<8x8xf32>
    %465 = tpu.matmul %464, %450, %cst_195 {dimension_numbers = #tpu.dot_dimension_numbers<[1], [0], [0], [1], [0, 0, 1, 1], [], []>} : vector<8x8xf32>, vector<8x8xf32>, vector<8x8xf32> -> vector<8x8xf32>
    %c8_196 = arith.constant 8 : index
    %c8_197 = arith.constant 8 : index
    %466 = vector.load %arg23[%c8_196, %c8_197] : memref<16x32xf32, #tpu.memory_space<vmem>>, vector<8x8xf32>
    tpu.vector_store %arg23[%c8_196, %c8_197], %465 {strides = array<i32>} : memref<16x32xf32, #tpu.memory_space<vmem>>, vector<8x8xf32>,
    %467 = vector.extract_strided_slice %338 {offsets = [8, 16], sizes = [8, 8], strides = [1, 1]} : vector<16x32xf32> to vector<8x8xf32>
    %468 = vector.extract_strided_slice %345 {offsets = [8, 16], sizes = [8, 8], strides = [1, 1]} : vector<16x32xf32> to vector<8x8xf32>
    %469 = vector.extract_strided_slice %352 {offsets = [8, 16], sizes = [8, 8], strides = [1, 1]} : vector<16x32xf32> to vector<8x8xf32>
    %470 = tpu.transpose %468, [1, 0] : vector<8x8xf32> -> vector<8x8xf32>
    %cst_198 = arith.constant dense<0.000000e+00> : vector<8x8xf32>
    %471 = tpu.matmul %467, %470, %cst_198 {dimension_numbers = #tpu.dot_dimension_numbers<[1], [0], [0], [1], [0, 0, 1, 1], [], []>} : vector<8x8xf32>, vector<8x8xf32>, vector<8x8xf32> -> vector<8x8xf32>
    %cst_199 = arith.constant 0.353553385 : f32
    %472 = vector.broadcast %cst_199 : f32 to vector<8x8xf32>
    %473 = arith.mulf %471, %472 : vector<8x8xf32>
    %cst_200 = arith.constant dense<0xFF800000> : vector<8xf32>
    %474 = vector.multi_reduction <maximumf>, %473, %cst_200 [1] : vector<8x8xf32> to vector<8xf32>
    %475 = vector.shape_cast %474 : vector<8xf32> to vector<8x1xf32>
    %476 = vector.broadcast %475 : vector<8x1xf32> to vector<8x8xf32>
    %477 = arith.subf %473, %476 : vector<8x8xf32>
    %478 = math.exp %477 : vector<8x8xf32>
    %cst_201 = arith.constant dense<0.000000e+00> : vector<8xf32>
    %479 = vector.multi_reduction <add>, %478, %cst_201 [1] : vector<8x8xf32> to vector<8xf32>
    %480 = vector.shape_cast %479 : vector<8xf32> to vector<8x1xf32>
    %481 = tpu.reciprocal %480 {approx = true} : vector<8x1xf32> -> vector<8x1xf32>
    %482 = vector.broadcast %481 : vector<8x1xf32> to vector<8x8xf32>
    %483 = arith.mulf %478, %482 : vector<8x8xf32>
    %cst_202 = arith.constant dense<0.000000e+00> : vector<8x8xf32>
    %484 = tpu.matmul %483, %469, %cst_202 {dimension_numbers = #tpu.dot_dimension_numbers<[1], [0], [0], [1], [0, 0, 1, 1], [], []>} : vector<8x8xf32>, vector<8x8xf32>, vector<8x8xf32> -> vector<8x8xf32>
    %c8_203 = arith.constant 8 : index
    %c16_204 = arith.constant 16 : index
    %485 = vector.load %arg23[%c8_203, %c16_204] : memref<16x32xf32, #tpu.memory_space<vmem>>, vector<8x8xf32>
    tpu.vector_store %arg23[%c8_203, %c16_204], %484 {strides = array<i32>} : memref<16x32xf32, #tpu.memory_space<vmem>>, vector<8x8xf32>,
    %486 = vector.extract_strided_slice %338 {offsets = [8, 24], sizes = [8, 8], strides = [1, 1]} : vector<16x32xf32> to vector<8x8xf32>
    %487 = vector.extract_strided_slice %345 {offsets = [8, 24], sizes = [8, 8], strides = [1, 1]} : vector<16x32xf32> to vector<8x8xf32>
    %488 = vector.extract_strided_slice %352 {offsets = [8, 24], sizes = [8, 8], strides = [1, 1]} : vector<16x32xf32> to vector<8x8xf32>
    %489 = tpu.transpose %487, [1, 0] : vector<8x8xf32> -> vector<8x8xf32>
    %cst_205 = arith.constant dense<0.000000e+00> : vector<8x8xf32>
    %490 = tpu.matmul %486, %489, %cst_205 {dimension_numbers = #tpu.dot_dimension_numbers<[1], [0], [0], [1], [0, 0, 1, 1], [], []>} : vector<8x8xf32>, vector<8x8xf32>, vector<8x8xf32> -> vector<8x8xf32>
    %cst_206 = arith.constant 0.353553385 : f32
    %491 = vector.broadcast %cst_206 : f32 to vector<8x8xf32>
    %492 = arith.mulf %490, %491 : vector<8x8xf32>
    %cst_207 = arith.constant dense<0xFF800000> : vector<8xf32>
    %493 = vector.multi_reduction <maximumf>, %492, %cst_207 [1] : vector<8x8xf32> to vector<8xf32>
    %494 = vector.shape_cast %493 : vector<8xf32> to vector<8x1xf32>
    %495 = vector.broadcast %494 : vector<8x1xf32> to vector<8x8xf32>
    %496 = arith.subf %492, %495 : vector<8x8xf32>
    %497 = math.exp %496 : vector<8x8xf32>
    %cst_208 = arith.constant dense<0.000000e+00> : vector<8xf32>
    %498 = vector.multi_reduction <add>, %497, %cst_208 [1] : vector<8x8xf32> to vector<8xf32>
    %499 = vector.shape_cast %498 : vector<8xf32> to vector<8x1xf32>
    %500 = tpu.reciprocal %499 {approx = true} : vector<8x1xf32> -> vector<8x1xf32>
    %501 = vector.broadcast %500 : vector<8x1xf32> to vector<8x8xf32>
    %502 = arith.mulf %497, %501 : vector<8x8xf32>
    %cst_209 = arith.constant dense<0.000000e+00> : vector<8x8xf32>
    %503 = tpu.matmul %502, %488, %cst_209 {dimension_numbers = #tpu.dot_dimension_numbers<[1], [0], [0], [1], [0, 0, 1, 1], [], []>} : vector<8x8xf32>, vector<8x8xf32>, vector<8x8xf32> -> vector<8x8xf32>
    %c8_210 = arith.constant 8 : index
    %c24_211 = arith.constant 24 : index
    %504 = vector.load %arg23[%c8_210, %c24_211] : memref<16x32xf32, #tpu.memory_space<vmem>>, vector<8x8xf32>
    tpu.vector_store %arg23[%c8_210, %c24_211], %503 {strides = array<i32>} : memref<16x32xf32, #tpu.memory_space<vmem>>, vector<8x8xf32>,
    %c0_212 = arith.constant 0 : index
    %c0_213 = arith.constant 0 : index
    %505 = vector.load %arg23[%c0_212, %c0_213] : memref<16x32xf32, #tpu.memory_space<vmem>>, vector<16x32xf32>
    %506 = arith.truncf %505 : vector<16x32xf32> to vector<16x32xbf16>
    %c1_214 = arith.constant 1 : index
    %c0_215 = arith.constant 0 : index
    %c0_216 = arith.constant 0 : index
    %507 = vector.load %arg10[%c1_214, %c0_215, %c0_216] : memref<2x32x32xbf16, #tpu.memory_space<vmem>>, vector<1x32x32xbf16>
    %508 = vector.shape_cast %507 : vector<1x32x32xbf16> to vector<32x32xbf16>
    %cst_217 = arith.constant dense<0.000000e+00> : vector<16x32xf32>
    %509 = tpu.matmul %506, %508, %cst_217 {dimension_numbers = #tpu.dot_dimension_numbers<[1], [0], [0], [1], [0, 0, 1, 1], [], []>} : vector<16x32xbf16>, vector<32x32xbf16>, vector<16x32xf32> -> vector<16x32xf32>
    %c1_218 = arith.constant 1 : index
    %c0_219 = arith.constant 0 : index
    %c0_220 = arith.constant 0 : index
    %510 = vector.load %arg11[%c1_218, %c0_219, %c0_220] : memref<2x1x32xf32, #tpu.memory_space<vmem>>, vector<1x1x32xf32>
    %511 = vector.shape_cast %510 : vector<1x1x32xf32> to vector<1x32xf32>
    %512 = vector.broadcast %511 : vector<1x32xf32> to vector<16x32xf32>
    %513 = arith.addf %509, %512 : vector<16x32xf32>
    %514 = arith.addf %330, %513 : vector<16x32xf32>
    %c1_221 = arith.constant 1 : index
    %c0_222 = arith.constant 0 : index
    %c0_223 = arith.constant 0 : index
    %515 = vector.load %arg12[%c1_221, %c0_222, %c0_223] : memref<2x1x32xf32, #tpu.memory_space<vmem>>, vector<1x1x32xf32>
    %516 = vector.shape_cast %515 : vector<1x1x32xf32> to vector<1x32xf32>
    %c1_224 = arith.constant 1 : index
    %c0_225 = arith.constant 0 : index
    %c0_226 = arith.constant 0 : index
    %517 = vector.load %arg13[%c1_224, %c0_225, %c0_226] : memref<2x1x32xf32, #tpu.memory_space<vmem>>, vector<1x1x32xf32>
    %518 = vector.shape_cast %517 : vector<1x1x32xf32> to vector<1x32xf32>
    %cst_227 = arith.constant dense<0.000000e+00> : vector<16xf32>
    %519 = vector.multi_reduction <add>, %514, %cst_227 [1] : vector<16x32xf32> to vector<16xf32>
    %520 = vector.shape_cast %519 : vector<16xf32> to vector<16x1xf32>
    %cst_228 = arith.constant 3.200000e+01 : f32
    %521 = vector.broadcast %cst_228 : f32 to vector<16x1xf32>
    %522 = arith.divf %520, %521 : vector<16x1xf32>
    %523 = vector.broadcast %522 : vector<16x1xf32> to vector<16x32xf32>
    %524 = arith.subf %514, %523 : vector<16x32xf32>
    %525 = arith.mulf %524, %524 : vector<16x32xf32>
    %cst_229 = arith.constant dense<0.000000e+00> : vector<16xf32>
    %526 = vector.multi_reduction <add>, %525, %cst_229 [1] : vector<16x32xf32> to vector<16xf32>
    %527 = vector.shape_cast %526 : vector<16xf32> to vector<16x1xf32>
    %cst_230 = arith.constant 3.200000e+01 : f32
    %528 = vector.broadcast %cst_230 : f32 to vector<16x1xf32>
    %529 = arith.divf %527, %528 : vector<16x1xf32>
    %cst_231 = arith.constant 9.99999996E-13 : f32
    %530 = vector.broadcast %cst_231 : f32 to vector<16x1xf32>
    %531 = arith.addf %529, %530 : vector<16x1xf32>
    %532 = math.rsqrt %531 : vector<16x1xf32>
    %533 = vector.broadcast %532 : vector<16x1xf32> to vector<16x32xf32>
    %534 = arith.mulf %524, %533 : vector<16x32xf32>
    %535 = vector.broadcast %516 : vector<1x32xf32> to vector<16x32xf32>
    %536 = arith.mulf %534, %535 : vector<16x32xf32>
    %537 = vector.broadcast %518 : vector<1x32xf32> to vector<16x32xf32>
    %538 = arith.addf %536, %537 : vector<16x32xf32>
    %539 = arith.truncf %538 : vector<16x32xf32> to vector<16x32xbf16>
    %c1_232 = arith.constant 1 : index
    %c0_233 = arith.constant 0 : index
    %c0_234 = arith.constant 0 : index
    %540 = vector.load %arg14[%c1_232, %c0_233, %c0_234] : memref<2x32x64xbf16, #tpu.memory_space<vmem>>, vector<1x32x64xbf16>
    %541 = vector.shape_cast %540 : vector<1x32x64xbf16> to vector<32x64xbf16>
    %cst_235 = arith.constant dense<0.000000e+00> : vector<16x64xf32>
    %542 = tpu.matmul %539, %541, %cst_235 {dimension_numbers = #tpu.dot_dimension_numbers<[1], [0], [0], [1], [0, 0, 1, 1], [], []>} : vector<16x32xbf16>, vector<32x64xbf16>, vector<16x64xf32> -> vector<16x64xf32>
    %c1_236 = arith.constant 1 : index
    %c0_237 = arith.constant 0 : index
    %c0_238 = arith.constant 0 : index
    %543 = vector.load %arg15[%c1_236, %c0_237, %c0_238] : memref<2x1x64xf32, #tpu.memory_space<vmem>>, vector<1x1x64xf32>
    %544 = vector.shape_cast %543 : vector<1x1x64xf32> to vector<1x64xf32>
    %545 = vector.broadcast %544 : vector<1x64xf32> to vector<16x64xf32>
    %546 = arith.addf %542, %545 : vector<16x64xf32>
    %cst_239 = arith.constant 5.000000e-01 : f32
    %547 = vector.broadcast %cst_239 : f32 to vector<16x64xf32>
    %548 = arith.mulf %547, %546 : vector<16x64xf32>
    %cst_240 = arith.constant 4.471500e-02 : f32
    %549 = vector.broadcast %cst_240 : f32 to vector<16x64xf32>
    %550 = arith.mulf %549, %546 : vector<16x64xf32>
    %551 = arith.mulf %550, %546 : vector<16x64xf32>
    %552 = arith.mulf %551, %546 : vector<16x64xf32>
    %553 = arith.addf %546, %552 : vector<16x64xf32>
    %cst_241 = arith.constant 0.797884583 : f32
    %554 = vector.broadcast %cst_241 : f32 to vector<16x64xf32>
    %555 = arith.mulf %554, %553 : vector<16x64xf32>
    %556 = math.tanh %555 : vector<16x64xf32>
    %cst_242 = arith.constant 1.000000e+00 : f32
    %557 = vector.broadcast %cst_242 : f32 to vector<16x64xf32>
    %558 = arith.addf %557, %556 : vector<16x64xf32>
    %559 = arith.mulf %548, %558 : vector<16x64xf32>
    %560 = arith.truncf %559 : vector<16x64xf32> to vector<16x64xbf16>
    %c1_243 = arith.constant 1 : index
    %c0_244 = arith.constant 0 : index
    %c0_245 = arith.constant 0 : index
    %561 = vector.load %arg16[%c1_243, %c0_244, %c0_245] : memref<2x64x32xbf16, #tpu.memory_space<vmem>>, vector<1x64x32xbf16>
    %562 = vector.shape_cast %561 : vector<1x64x32xbf16> to vector<64x32xbf16>
    %cst_246 = arith.constant dense<0.000000e+00> : vector<16x32xf32>
    %563 = tpu.matmul %560, %562, %cst_246 {dimension_numbers = #tpu.dot_dimension_numbers<[1], [0], [0], [1], [0, 0, 1, 1], [], []>} : vector<16x64xbf16>, vector<64x32xbf16>, vector<16x32xf32> -> vector<16x32xf32>
    %c1_247 = arith.constant 1 : index
    %c0_248 = arith.constant 0 : index
    %c0_249 = arith.constant 0 : index
    %564 = vector.load %arg17[%c1_247, %c0_248, %c0_249] : memref<2x1x32xf32, #tpu.memory_space<vmem>>, vector<1x1x32xf32>
    %565 = vector.shape_cast %564 : vector<1x1x32xf32> to vector<1x32xf32>
    %566 = vector.broadcast %565 : vector<1x32xf32> to vector<16x32xf32>
    %567 = arith.addf %563, %566 : vector<16x32xf32>
    %568 = arith.addf %538, %567 : vector<16x32xf32>
    %c1_250 = arith.constant 1 : index
    %c0_251 = arith.constant 0 : index
    %c0_252 = arith.constant 0 : index
    %569 = vector.load %arg18[%c1_250, %c0_251, %c0_252] : memref<2x1x32xf32, #tpu.memory_space<vmem>>, vector<1x1x32xf32>
    %570 = vector.shape_cast %569 : vector<1x1x32xf32> to vector<1x32xf32>
    %c1_253 = arith.constant 1 : index
    %c0_254 = arith.constant 0 : index
    %c0_255 = arith.constant 0 : index
    %571 = vector.load %arg19[%c1_253, %c0_254, %c0_255] : memref<2x1x32xf32, #tpu.memory_space<vmem>>, vector<1x1x32xf32>
    %572 = vector.shape_cast %571 : vector<1x1x32xf32> to vector<1x32xf32>
    %cst_256 = arith.constant dense<0.000000e+00> : vector<16xf32>
    %573 = vector.multi_reduction <add>, %568, %cst_256 [1] : vector<16x32xf32> to vector<16xf32>
    %574 = vector.shape_cast %573 : vector<16xf32> to vector<16x1xf32>
    %cst_257 = arith.constant 3.200000e+01 : f32
    %575 = vector.broadcast %cst_257 : f32 to vector<16x1xf32>
    %576 = arith.divf %574, %575 : vector<16x1xf32>
    %577 = vector.broadcast %576 : vector<16x1xf32> to vector<16x32xf32>
    %578 = arith.subf %568, %577 : vector<16x32xf32>
    %579 = arith.mulf %578, %578 : vector<16x32xf32>
    %cst_258 = arith.constant dense<0.000000e+00> : vector<16xf32>
    %580 = vector.multi_reduction <add>, %579, %cst_258 [1] : vector<16x32xf32> to vector<16xf32>
    %581 = vector.shape_cast %580 : vector<16xf32> to vector<16x1xf32>
    %cst_259 = arith.constant 3.200000e+01 : f32
    %582 = vector.broadcast %cst_259 : f32 to vector<16x1xf32>
    %583 = arith.divf %581, %582 : vector<16x1xf32>
    %cst_260 = arith.constant 9.99999996E-13 : f32
    %584 = vector.broadcast %cst_260 : f32 to vector<16x1xf32>
    %585 = arith.addf %583, %584 : vector<16x1xf32>
    %586 = math.rsqrt %585 : vector<16x1xf32>
    %587 = vector.broadcast %586 : vector<16x1xf32> to vector<16x32xf32>
    %588 = arith.mulf %578, %587 : vector<16x32xf32>
    %589 = vector.broadcast %570 : vector<1x32xf32> to vector<16x32xf32>
    %590 = arith.mulf %588, %589 : vector<16x32xf32>
    %591 = vector.broadcast %572 : vector<1x32xf32> to vector<16x32xf32>
    %592 = arith.addf %590, %591 : vector<16x32xf32>
    %593 = arith.truncf %592 : vector<16x32xf32> to vector<16x32xbf16>
    %c0_261 = arith.constant 0 : index
    %c0_262 = arith.constant 0 : index
    %594 = vector.load %arg20[%c0_261, %c0_262] : memref<32x8xbf16, #tpu.memory_space<vmem>>, vector<32x8xbf16>
    %cst_263 = arith.constant dense<0.000000e+00> : vector<16x8xf32>
    %595 = tpu.matmul %593, %594, %cst_263 {dimension_numbers = #tpu.dot_dimension_numbers<[1], [0], [0], [1], [0, 0, 1, 1], [], []>} : vector<16x32xbf16>, vector<32x8xbf16>, vector<16x8xf32> -> vector<16x8xf32>
    %c0_264 = arith.constant 0 : index
    %c0_265 = arith.constant 0 : index
    %596 = vector.load %arg21[%c0_264, %c0_265] : memref<1x8xf32, #tpu.memory_space<vmem>>, vector<1x8xf32>
    %597 = vector.broadcast %596 : vector<1x8xf32> to vector<16x8xf32>
    %598 = arith.addf %595, %597 : vector<16x8xf32>
    %599 = vector.extract_strided_slice %598 {offsets = [0, 0], sizes = [8, 8], strides = [1, 1]} : vector<16x8xf32> to vector<8x8xf32>
    %600 = vector.extract_strided_slice %599 {offsets = [0, 0], sizes = [8, 4], strides = [1, 1]} : vector<8x8xf32> to vector<8x4xf32>
    %c0_266 = arith.constant 0 : index
    %c0_267 = arith.constant 0 : index
    %c0_268 = arith.constant 0 : index
    %c0_269 = arith.constant 0 : index
    %601 = vector.load %arg22[%c0_266, %c0_267, %c0_268, %c0_269] : memref<2x2x8x4xf32, #tpu.memory_space<vmem>>, vector<1x1x8x4xf32>
    %602 = vector.shape_cast %601 : vector<1x1x8x4xf32> to vector<8x4xf32>
    %603 = vector.shape_cast %600 : vector<8x4xf32> to vector<1x1x8x4xf32>
    tpu.vector_store %arg22[%c0_266, %c0_267, %c0_268, %c0_269], %603 {strides = array<i32>} : memref<2x2x8x4xf32, #tpu.memory_space<vmem>>, vector<1x1x8x4xf32>,
    %604 = vector.extract_strided_slice %599 {offsets = [0, 4], sizes = [8, 4], strides = [1, 1]} : vector<8x8xf32> to vector<8x4xf32>
    %c0_270 = arith.constant 0 : index
    %c1_271 = arith.constant 1 : index
    %c0_272 = arith.constant 0 : index
    %c0_273 = arith.constant 0 : index
    %605 = vector.load %arg22[%c0_270, %c1_271, %c0_272, %c0_273] : memref<2x2x8x4xf32, #tpu.memory_space<vmem>>, vector<1x1x8x4xf32>
    %606 = vector.shape_cast %605 : vector<1x1x8x4xf32> to vector<8x4xf32>
    %607 = vector.shape_cast %604 : vector<8x4xf32> to vector<1x1x8x4xf32>
    tpu.vector_store %arg22[%c0_270, %c1_271, %c0_272, %c0_273], %607 {strides = array<i32>} : memref<2x2x8x4xf32, #tpu.memory_space<vmem>>, vector<1x1x8x4xf32>,
    %608 = vector.extract_strided_slice %598 {offsets = [8, 0], sizes = [8, 8], strides = [1, 1]} : vector<16x8xf32> to vector<8x8xf32>
    %609 = vector.extract_strided_slice %608 {offsets = [0, 0], sizes = [8, 4], strides = [1, 1]} : vector<8x8xf32> to vector<8x4xf32>
    %c1_274 = arith.constant 1 : index
    %c0_275 = arith.constant 0 : index
    %c0_276 = arith.constant 0 : index
    %c0_277 = arith.constant 0 : index
    %610 = vector.load %arg22[%c1_274, %c0_275, %c0_276, %c0_277] : memref<2x2x8x4xf32, #tpu.memory_space<vmem>>, vector<1x1x8x4xf32>
    %611 = vector.shape_cast %610 : vector<1x1x8x4xf32> to vector<8x4xf32>
    %612 = vector.shape_cast %609 : vector<8x4xf32> to vector<1x1x8x4xf32>
    tpu.vector_store %arg22[%c1_274, %c0_275, %c0_276, %c0_277], %612 {strides = array<i32>} : memref<2x2x8x4xf32, #tpu.memory_space<vmem>>, vector<1x1x8x4xf32>,
    %613 = vector.extract_strided_slice %608 {offsets = [0, 4], sizes = [8, 4], strides = [1, 1]} : vector<8x8xf32> to vector<8x4xf32>
    %c1_278 = arith.constant 1 : index
    %c1_279 = arith.constant 1 : index
    %c0_280 = arith.constant 0 : index
    %c0_281 = arith.constant 0 : index
    %614 = vector.load %arg22[%c1_278, %c1_279, %c0_280, %c0_281] : memref<2x2x8x4xf32, #tpu.memory_space<vmem>>, vector<1x1x8x4xf32>
    %615 = vector.shape_cast %614 : vector<1x1x8x4xf32> to vector<8x4xf32>
    %616 = vector.shape_cast %613 : vector<8x4xf32> to vector<1x1x8x4xf32>
    tpu.vector_store %arg22[%c1_278, %c1_279, %c0_280, %c0_281], %616 {strides = array<i32>} : memref<2x2x8x4xf32, #tpu.memory_space<vmem>>, vector<1x1x8x4xf32>,
    return
  }
  func.func @transform_0(%arg0: i32) -> (i32, i32) {
    %c0_i32 = arith.constant 0 : i32
    %c0_i32_0 = arith.constant 0 : i32
    %c0_i32_1 = arith.constant 0 : i32
    return %c0_i32, %c0_i32_0 : i32, i32
  }
  func.func @transform_1(%arg0: i32) -> (i32, i32) {
    %c0_i32 = arith.constant 0 : i32
    %c0_i32_0 = arith.constant 0 : i32
    %c0_i32_1 = arith.constant 0 : i32
    return %c0_i32, %c0_i32_0 : i32, i32
  }
  func.func @transform_2(%arg0: i32) -> (i32, i32) {
    %c0_i32 = arith.constant 0 : i32
    %c0_i32_0 = arith.constant 0 : i32
    %c0_i32_1 = arith.constant 0 : i32
    return %c0_i32, %c0_i32_0 : i32, i32
  }
  func.func @transform_3(%arg0: i32) -> (i32, i32, i32) {
    %c0_i32 = arith.constant 0 : i32
    %c0_i32_0 = arith.constant 0 : i32
    %c0_i32_1 = arith.constant 0 : i32
    %c0_i32_2 = arith.constant 0 : i32
    return %c0_i32, %c0_i32_0, %c0_i32_1 : i32, i32, i32
  }
  func.func @transform_4(%arg0: i32) -> (i32, i32, i32) {
    %c0_i32 = arith.constant 0 : i32
    %c0_i32_0 = arith.constant 0 : i32
    %c0_i32_1 = arith.constant 0 : i32
    %c0_i32_2 = arith.constant 0 : i32
    return %c0_i32, %c0_i32_0, %c0_i32_1 : i32, i32, i32
  }
  func.func @transform_5(%arg0: i32) -> (i32, i32, i32) {
    %c0_i32 = arith.constant 0 : i32
    %c0_i32_0 = arith.constant 0 : i32
    %c0_i32_1 = arith.constant 0 : i32
    %c0_i32_2 = arith.constant 0 : i32
    return %c0_i32, %c0_i32_0, %c0_i32_1 : i32, i32, i32
  }
  func.func @transform_6(%arg0: i32) -> (i32, i32, i32) {
    %c0_i32 = arith.constant 0 : i32
    %c0_i32_0 = arith.constant 0 : i32
    %c0_i32_1 = arith.constant 0 : i32
    %c0_i32_2 = arith.constant 0 : i32
    return %c0_i32, %c0_i32_0, %c0_i32_1 : i32, i32, i32
  }
  func.func @transform_7(%arg0: i32) -> (i32, i32, i32) {
    %c0_i32 = arith.constant 0 : i32
    %c0_i32_0 = arith.constant 0 : i32
    %c0_i32_1 = arith.constant 0 : i32
    %c0_i32_2 = arith.constant 0 : i32
    return %c0_i32, %c0_i32_0, %c0_i32_1 : i32, i32, i32
  }
  func.func @transform_8(%arg0: i32) -> (i32, i32, i32) {
    %c0_i32 = arith.constant 0 : i32
    %c0_i32_0 = arith.constant 0 : i32
    %c0_i32_1 = arith.constant 0 : i32
    %c0_i32_2 = arith.constant 0 : i32
    return %c0_i32, %c0_i32_0, %c0_i32_1 : i32, i32, i32
  }
  func.func @transform_9(%arg0: i32) -> (i32, i32, i32) {
    %c0_i32 = arith.constant 0 : i32
    %c0_i32_0 = arith.constant 0 : i32
    %c0_i32_1 = arith.constant 0 : i32
    %c0_i32_2 = arith.constant 0 : i32
    return %c0_i32, %c0_i32_0, %c0_i32_1 : i32, i32, i32
  }
  func.func @transform_10(%arg0: i32) -> (i32, i32, i32) {
    %c0_i32 = arith.constant 0 : i32
    %c0_i32_0 = arith.constant 0 : i32
    %c0_i32_1 = arith.constant 0 : i32
    %c0_i32_2 = arith.constant 0 : i32
    return %c0_i32, %c0_i32_0, %c0_i32_1 : i32, i32, i32
  }
  func.func @transform_11(%arg0: i32) -> (i32, i32, i32) {
    %c0_i32 = arith.constant 0 : i32
    %c0_i32_0 = arith.constant 0 : i32
    %c0_i32_1 = arith.constant 0 : i32
    %c0_i32_2 = arith.constant 0 : i32
    return %c0_i32, %c0_i32_0, %c0_i32_1 : i32, i32, i32
  }
  func.func @transform_12(%arg0: i32) -> (i32, i32, i32) {
    %c0_i32 = arith.constant 0 : i32
    %c0_i32_0 = arith.constant 0 : i32
    %c0_i32_1 = arith.constant 0 : i32
    %c0_i32_2 = arith.constant 0 : i32
    return %c0_i32, %c0_i32_0, %c0_i32_1 : i32, i32, i32
  }
  func.func @transform_13(%arg0: i32) -> (i32, i32, i32) {
    %c0_i32 = arith.constant 0 : i32
    %c0_i32_0 = arith.constant 0 : i32
    %c0_i32_1 = arith.constant 0 : i32
    %c0_i32_2 = arith.constant 0 : i32
    return %c0_i32, %c0_i32_0, %c0_i32_1 : i32, i32, i32
  }
  func.func @transform_14(%arg0: i32) -> (i32, i32, i32) {
    %c0_i32 = arith.constant 0 : i32
    %c0_i32_0 = arith.constant 0 : i32
    %c0_i32_1 = arith.constant 0 : i32
    %c0_i32_2 = arith.constant 0 : i32
    return %c0_i32, %c0_i32_0, %c0_i32_1 : i32, i32, i32
  }
  func.func @transform_15(%arg0: i32) -> (i32, i32, i32) {
    %c0_i32 = arith.constant 0 : i32
    %c0_i32_0 = arith.constant 0 : i32
    %c0_i32_1 = arith.constant 0 : i32
    %c0_i32_2 = arith.constant 0 : i32
    return %c0_i32, %c0_i32_0, %c0_i32_1 : i32, i32, i32
  }
  func.func @transform_16(%arg0: i32) -> (i32, i32, i32) {
    %c0_i32 = arith.constant 0 : i32
    %c0_i32_0 = arith.constant 0 : i32
    %c0_i32_1 = arith.constant 0 : i32
    %c0_i32_2 = arith.constant 0 : i32
    return %c0_i32, %c0_i32_0, %c0_i32_1 : i32, i32, i32
  }
  func.func @transform_17(%arg0: i32) -> (i32, i32, i32) {
    %c0_i32 = arith.constant 0 : i32
    %c0_i32_0 = arith.constant 0 : i32
    %c0_i32_1 = arith.constant 0 : i32
    %c0_i32_2 = arith.constant 0 : i32
    return %c0_i32, %c0_i32_0, %c0_i32_1 : i32, i32, i32
  }
  func.func @transform_18(%arg0: i32) -> (i32, i32, i32) {
    %c0_i32 = arith.constant 0 : i32
    %c0_i32_0 = arith.constant 0 : i32
    %c0_i32_1 = arith.constant 0 : i32
    %c0_i32_2 = arith.constant 0 : i32
    return %c0_i32, %c0_i32_0, %c0_i32_1 : i32, i32, i32
  }
  func.func @transform_19(%arg0: i32) -> (i32, i32) {
    %c0_i32 = arith.constant 0 : i32
    %c0_i32_0 = arith.constant 0 : i32
    %c0_i32_1 = arith.constant 0 : i32
    return %c0_i32, %c0_i32_0 : i32, i32
  }
  func.func @transform_20(%arg0: i32) -> (i32, i32) {
    %c0_i32 = arith.constant 0 : i32
    %c0_i32_0 = arith.constant 0 : i32
    %c0_i32_1 = arith.constant 0 : i32
    return %c0_i32, %c0_i32_0 : i32, i32
  }
  func.func @transform_21(%arg0: i32) -> (i32, i32, i32, i32) {
    %c0_i32 = arith.constant 0 : i32
    %c0_i32_0 = arith.constant 0 : i32
    %c0_i32_1 = arith.constant 0 : i32
    %c0_i32_2 = arith.constant 0 : i32
    %c0_i32_3 = arith.constant 0 : i32
    return %c0_i32, %c0_i32_0, %c0_i32_1, %c0_i32_2 : i32, i32, i32, i32
  }
}

</mosaic_0001>

<bundles_post_ra>
// kernel: tpu_custom_call.1
= control target key start
LH: loop header
LB: loop body
LE: loop exit
PB: predicated region body
PF: predicated region fallthrough
CT: control target
= control target key end

     0   :  { %v4767_v0 = vmov 0   ;;  %v4768_v20 = vmov 0.0   ;;  %s4773_s30 = smov 8   ;;  %s5517_s23 = smov 16   ;;  %s5488_s0 = inlined_call_operand.vmem [shape: s32[16,1], index: 0, kind: input, shape index: {}]   ;;  %s5489_s3 = inlined_call_operand.vmem [shape: bf16[2,32,32], index: 3, kind: input, shape index: {}]   ;;  %s5490_s5 = inlined_call_operand.vmem [shape: bf16[2,32,32], index: 5, kind: input, shape index: {}]   ;;  %s5491_s7 = inlined_call_operand.vmem [shape: bf16[2,32,32], index: 7, kind: input, shape index: {}]   ;;  %s5492_s1 = inlined_call_operand.vmem [shape: f32[8,32], index: 1, kind: input, shape index: {}]   ;;  %s5493_s2 = inlined_call_operand.vmem [shape: f32[64,32], index: 2, kind: input, shape index: {}]   ;;  %s5494_s4 = inlined_call_operand.vmem [shape: f32[2,1,32], index: 4, kind: input, shape index: {}]   ;;  %s5495_s6 = inlined_call_operand.vmem [shape: f32[2,1,32], index: 6, kind: input, shape index: {}]   ;;  %s5496_s8 = inlined_call_operand.vmem [shape: f32[2,1,32], index: 8, kind: input, shape index: {}]   ;;  %s5497_s9 = inlined_call_operand.vmem [shape: bf16[2,32,32], index: 9, kind: input, shape index: {}]   ;;  %s5498_s10 = inlined_call_operand.vmem [shape: f32[2,1,32], index: 10, kind: input, shape index: {}]   ;;  %s5499_s13 = inlined_call_operand.vmem [shape: bf16[2,32,64], index: 13, kind: input, shape index: {}]   ;;  %s5500_s11 = inlined_call_operand.vmem [shape: f32[2,1,32], index: 11, kind: input, shape index: {}]   ;;  %s5501_s12 = inlined_call_operand.vmem [shape: f32[2,1,32], index: 12, kind: input, shape index: {}]   ;;  %s5502_s15 = inlined_call_operand.vmem [shape: bf16[2,64,32], index: 15, kind: input, shape index: {}]   ;;  %s5503_s14 = inlined_call_operand.vmem [shape: f32[2,1,64], index: 14, kind: input, shape index: {}]   ;;  %s5504_s16 = inlined_call_operand.vmem [shape: f32[2,1,32], index: 16, kind: input, shape index: {}]   ;;  %s5505_s17 = inlined_call_operand.vmem [shape: f32[2,1,32], index: 17, kind: input, shape index: {}]   ;;  %s5506_s18 = inlined_call_operand.vmem [shape: f32[2,1,32], index: 18, kind: input, shape index: {}]   ;;  %s5507_s19 = inlined_call_operand.vmem [shape: bf16[32,8], index: 19, kind: input, shape index: {}]   ;;  %s5508_s20 = inlined_call_operand.vmem [shape: f32[1,8], index: 20, kind: input, shape index: {}]   ;;  %s5509_s21 = inlined_call_operand.vmem [shape: f32[2,2,8,4], index: 21, kind: output, shape index: {}]  }
   0x1   :  { %5519 = sst [smem:[#allocation3_spill]] %s5488_s0  ;;  %4648 = vset.pattern.permute.xlu1 %v4767_v0  ;;  %4647 = vset.pattern.permute.xlu0 %v4767_v0 }
   0x2   :  { %5520 = sst [smem:[#allocation4_spill]] %s5489_s3  ;;  %s5525_s26 = sld [smem:[#allocation3_spill]]  ;;  %4365 = vmatprep.subr.bf16.mxu0 %v4768_v20  ;;  %4373 = vmatprep.subr.bf16.mxu1 %v4768_v20 }
   0x3   :  { %5521 = sst [smem:[#allocation5_spill]] %s5490_s5  ;;  %s5526_s0 = sld [smem:[#allocation4_spill]] }
   0x4   :  { %5522 = sst [smem:[#allocation6_spill]] %s5491_s7  ;;  %s4770_s7 = smov 120  }
   0x5   :  { %5523 = sst [smem:[#allocation7_spill]] %s5492_s1  ;;  %s5530_s22 = sld [smem:[#allocation6_spill]] }
   0x6   :  { %5524 = sst [smem:[#allocation8_spill]] %s5493_s2  ;;  %s5527_s2 = sld [smem:[#allocation5_spill]] }
   0x7   :  { %s5529_s1 = sld [smem:[#allocation8_spill]]  ;;  %s5515_s3 = smov 24  }
   0x8   :  { %v69_v1 = vld [vmem:[%s5525_s26] sm:$0xff]  ;;  %v70_v2 = vld [vmem:[%s5525_s26 + $0x8] sm:$0xff]  ;;  %s5528_s26 = sld [smem:[#allocation7_spill]] }
   0x9   :  { %vm90_vm0 = vcmp.eq.s32.totalorder %v69_v1, 1  ;;  %vm71_vm1 = vcmp.eq.s32.totalorder %v69_v1, 0  ;;  %vm91_vm2 = vcmp.eq.s32.totalorder %v70_v2, 1  ;;  %vm72_vm3 = vcmp.eq.s32.totalorder %v70_v2, 0  ;;  %v4649_v19 = vld [vmem:[%s5526_s0] sm:$0xff]   ;;  %v4651_v22 = vld [vmem:[%s5526_s0 + $0x8] sm:$0xff]  }
   0xa   :  { %v93_v3 = vsel %vm90_vm0, 1, %v4767_v0  ;;  %v74_v4 = vsel %vm71_vm1, 1, %v4767_v0  ;;  %v94_v5 = vsel %vm91_vm2, 1, %v4767_v0  ;;  %v75_v6 = vsel %vm72_vm3, 1, %v4767_v0  ;;  %4366 = vmatpush3.bf16.msra.mxu0 %v4649_v19 }
   0xb   :  { %96 = vperm.xlu1 %4648, %v93_v3   ;;  %77 = vperm.xlu0 %4647, %v74_v4   ;;  %vm110_vm4 = vcmp.eq.s32.totalorder %v70_v2, 2  ;;  %vm109_vm5 = vcmp.eq.s32.totalorder %v69_v1, 2  ;;  %vm129_vm6 = vcmp.eq.s32.totalorder %v70_v2, 3  ;;  %vm128_vm7 = vcmp.eq.s32.totalorder %v69_v1, 3  ;;  %v4653_v3 = vld [vmem:[%s5530_s22] sm:$0xff]  }
   0xc   :  { %v113_v7 = vsel %vm110_vm4, 1, %v4767_v0  ;;  %v112_v8 = vsel %vm109_vm5, 1, %v4767_v0  ;;  %v132_v9 = vsel %vm129_vm6, 1, %v4767_v0  ;;  %v131_v10 = vsel %vm128_vm7, 1, %v4767_v0  ;;  %v4650_v21 = vld [vmem:[%s5527_s2] sm:$0xff]   ;;  %4367 = vmatprep.subr.bf16.mxu0 %v4768_v20  ;;  %v4652_v23 = vld [vmem:[%s5527_s2 + $0x8] sm:$0xff]  }
   0xd   :  { %vm148_vm8 = vcmp.eq.s32.totalorder %v70_v2, 4  ;;  %vm147_vm9 = vcmp.eq.s32.totalorder %v69_v1, 4  ;;  %vm167_vm10 = vcmp.eq.s32.totalorder %v70_v2, 5  ;;  %vm166_vm11 = vcmp.eq.s32.totalorder %v69_v1, 5  ;;  %4374 = vmatpush3.bf16.msra.mxu1 %v4650_v21  ;;  %v223_v58 = vld [vmem:[%s5529_s1] sm:$0xff]  ;;  %s4771_s1 = smov 112  }
   0xe   :  { %v151_v11 = vsel %vm148_vm8, 1, %v4767_v0  ;;  %v150_v12 = vsel %vm147_vm9, 1, %v4767_v0  ;;  %v170_v13 = vsel %vm167_vm10, 1, %v4767_v0  ;;  %v169_v14 = vsel %vm166_vm11, 1, %v4767_v0  ;;  %4375 = vmatprep.subr.bf16.mxu1 %v4768_v20  ;;  %4368 = vmatpush3.bf16.msra.mxu0 %v4651_v22  ;;  %v4097_v34 = vld [vmem:[%s5528_s26] ss:$0 sm:$0xff] }
   0xf   :  { %99 = vperm.xlu1 %4648, %v94_v5   ;;  %80 = vperm.xlu0 %4647, %v75_v6   ;;  %vm186_vm12 = vcmp.eq.s32.totalorder %v70_v2, 6  ;;  %vm185_vm13 = vcmp.eq.s32.totalorder %v69_v1, 6  ;;  %vm205_vm14 = vcmp.eq.s32.totalorder %v70_v2, 7  ;;  %vm204_vm15 = vcmp.eq.s32.totalorder %v69_v1, 7  ;;  %v4098_v37 = vld [vmem:[%s5528_s26 + $0x1] ss:$0 sm:$0xff] }
  0x10   :  { %v189_v15 = vsel %vm186_vm12, 1, %v4767_v0  ;;  %v188_v16 = vsel %vm185_vm13, 1, %v4767_v0  ;;  %v208_v17 = vsel %vm205_vm14, 1, %v4767_v0  ;;  %v207_v18 = vsel %vm204_vm15, 1, %v4767_v0  ;;  %4381 = vmatprep.subr.bf16.mxu0 %v4768_v20  ;;  %v4099_v40 = vld [vmem:[%s5528_s26 + $0x2] ss:$0 sm:$0xff] }
  0x11   :  { %4376 = vmatpush3.bf16.msra.mxu1 %v4652_v23  ;;  %vm4769_vm0 = vmmov 0   ;;  %v4100_v41 = vld [vmem:[%s5528_s26 + $0x3] ss:$0 sm:$0xff]  ;;  %v4101_v44 = vld [vmem:[%s5528_s26 + $0x4] ss:$0 sm:$0xff]  ;;  %v4654_v5 = vld [vmem:[%s5530_s22 + $0x8] sm:$0xff]  }
  0x12   :  { %4369 = vmatprep.mubr.msk.bf16.mxu0 %vm4769_vm0, %v4768_v20  ;;  %4377 = vmatprep.mubr.msk.bf16.mxu1 %vm4769_vm0, %v4768_v20  ;;  %v4102_v49 = vld [vmem:[%s5528_s26 + $0x5] ss:$0 sm:$0xff]  ;;  %v4103_v52 = vld [vmem:[%s5528_s26 + $0x6] ss:$0 sm:$0xff]  ;;  %v4104_v55 = vld [vmem:[%s5528_s26 + $0x7] ss:$0 sm:$0xff] }
  0x13   :  { %118 = vperm.xlu1 %4648, %v113_v7   ;;  %115 = vperm.xlu0 %4647, %v112_v8   ;;  %v4105_v6 = vld [vmem:[%s5494_s4] ss:$0 sm:$0xff]  ;;  %s4772_s26 = smov 104  }
  0x14   :  { %4389 = vmatprep.subr.mxu1 %v4768_v20  ;;  %v4109_v7 = vld [vmem:[%s5495_s6] ss:$0 sm:$0xff] }
  0x15   :  { %v4113_v21 = vld [vmem:[%s5496_s8] ss:$0 sm:$0xff] }
  0x17   :  { %137 = vperm.xlu1 %4648, %v132_v9   ;;  %134 = vperm.xlu0 %4647, %v131_v10  }
  0x1b   :  { %156 = vperm.xlu1 %4648, %v151_v11   ;;  %153 = vperm.xlu0 %4647, %v150_v12  }
  0x1f   :  { %175 = vperm.xlu1 %4648, %v170_v13   ;;  %172 = vperm.xlu0 %4647, %v169_v14  }
  0x23   :  { %194 = vperm.xlu1 %4648, %v189_v15   ;;  %191 = vperm.xlu0 %4647, %v188_v16  }
  0x27   :  { %213 = vperm.xlu1 %4648, %v208_v17   ;;  %210 = vperm.xlu0 %4647, %v207_v18  }
  0x8a   :  { %v97_v24 = vpop.permute.xlu1 %96  ;;  %v78_v25 = vpop.permute.xlu0 %77 }
  0x8b   :  { %vm82_vm1 = vcmp.eq.s32.totalorder %v78_v25, 1  ;;  %vm101_vm3 = vcmp.eq.s32.totalorder %v97_v24, 1 }
  0x8c   :  { %v88_v38 = vsel %vm82_vm1, %v4097_v34, 0.0 }
  0x8d   :  { %v107_v42 = vsel %vm101_vm3, %v4098_v37, %v88_v38  ;;  %vm423_vm3 = vcmask 64512  }
  0x8e   :  { %v100_v26 = vpop.permute.xlu1 %99  ;;  %v81_v27 = vpop.permute.xlu0 %80 }
  0x8f   :  { %vm83_vm2 = vcmp.eq.s32.totalorder %v81_v27, 1  ;;  %vm102_vm4 = vcmp.eq.s32.totalorder %v100_v26, 1 }
  0x90   :  { %v89_v39 = vsel %vm83_vm2, %v4097_v34, 0.0  ;;  %vm250_vm2 = vcmask 261120  }
  0x91   :  { %v108_v43 = vsel %vm102_vm4, %v4098_v37, %v89_v39  ;;  %vm757_vm4 = vcmask 130112  }
  0x92   :  { %v119_v28 = vpop.permute.xlu1 %118  ;;  %v116_v29 = vpop.permute.xlu0 %115 }
  0x93   :  { %vm121_vm5 = vcmp.eq.s32.totalorder %v119_v28, 1  ;;  %vm120_vm6 = vcmp.eq.s32.totalorder %v116_v29, 1 }
  0x94   :  { %v127_v47 = vsel %vm121_vm5, %v4099_v40, %v108_v43  ;;  %v126_v48 = vsel %vm120_vm6, %v4099_v40, %v107_v42  ;;  %vm929_vm5 = vcmask 195712   ;;  %vm1101_vm6 = vcmask 261312  }
  0x96   :  { %v138_v30 = vpop.permute.xlu1 %137  ;;  %v135_v31 = vpop.permute.xlu0 %134 }
  0x97   :  { %vm140_vm7 = vcmp.eq.s32.totalorder %v138_v30, 1  ;;  %vm139_vm8 = vcmp.eq.s32.totalorder %v135_v31, 1 }
  0x98   :  { %v146_v50 = vsel %vm140_vm7, %v4100_v41, %v127_v47  ;;  %v145_v51 = vsel %vm139_vm8, %v4100_v41, %v126_v48  ;;  %vm2022_vm7 = vcmask 523264  }
  0x9a   :  { %v157_v32 = vpop.permute.xlu1 %156  ;;  %v154_v33 = vpop.permute.xlu0 %153 }
  0x9b   :  { %vm159_vm9 = vcmp.eq.s32.totalorder %v157_v32, 1  ;;  %vm158_vm10 = vcmp.eq.s32.totalorder %v154_v33, 1 }
  0x9c   :  { %v165_v53 = vsel %vm159_vm9, %v4101_v44, %v146_v50  ;;  %v164_v54 = vsel %vm158_vm10, %v4101_v44, %v145_v51 }
  0x9e   :  { %v176_v35 = vpop.permute.xlu1 %175  ;;  %v173_v36 = vpop.permute.xlu0 %172 }
  0x9f   :  { %vm178_vm11 = vcmp.eq.s32.totalorder %v176_v35, 1  ;;  %vm177_vm12 = vcmp.eq.s32.totalorder %v173_v36, 1 }
  0xa0   :  { %v184_v56 = vsel %vm178_vm11, %v4102_v49, %v165_v53  ;;  %v183_v57 = vsel %vm177_vm12, %v4102_v49, %v164_v54 }
  0xa2   :  { %v195_v45 = vpop.permute.xlu1 %194  ;;  %v192_v46 = vpop.permute.xlu0 %191 }
  0xa3   :  { %vm197_vm13 = vcmp.eq.s32.totalorder %v195_v45, 1  ;;  %vm196_vm14 = vcmp.eq.s32.totalorder %v192_v46, 1 }
  0xa4   :  { %v203_v61 = vsel %vm197_vm13, %v4103_v52, %v184_v56  ;;  %v202_v62 = vsel %vm196_vm14, %v4103_v52, %v183_v57 }
  0xa6   :  { %v214_v59 = vpop.permute.xlu1 %213  ;;  %v211_v60 = vpop.permute.xlu0 %210 }
  0xa7   :  { %vm216_vm15 = vcmp.eq.s32.totalorder %v214_v59, 1  ;;  %vm215_vm1 = vcmp.eq.s32.totalorder %v211_v60, 1 }
  0xa8   :  { %v222_v63 = vsel %vm216_vm15, %v4104_v55, %v203_v61  ;;  %v221_v0 = vsel %vm215_vm1, %v4104_v55, %v202_v62 }
  0xa9   :  { %v4942_v1 = vadd.f32 %v223_v58, %v222_v63  ;;  %v4944_v2 = vadd.f32 %v223_v58, %v221_v0 }
  0xab   :  { %v226_v4 = vpack.c.bf16 %v4942_v1, %v4944_v2 }
  0xad   :  { %4370 = vmatmul.mubr.msk.bf16.vlgmr.msra.gmra.mrb[0].mxu0 %vm250_vm2, %v226_v4  ;;  %4378 = vmatmul.mubr.msk.bf16.vlgmr.msra.gmra.mrb[0].mxu1 %vm250_vm2, %v226_v4 }
  0xae   :  { %4382 = vmatpush3.bf16.msra.mxu0 %v4653_v3  ;;  %4385 = vmatprep.mubr.msk.bf16.mxu0 %vm4769_vm0, %v4768_v20 }
  0xaf   :  { %4383 = vmatprep.subr.bf16.mxu0 %v4768_v20  ;;  %4391 = vmatprep.mubr.msk.f32.mxu1 %vm4769_vm0, %v4768_v20 }
  0xb2   :  { %4384 = vmatpush3.bf16.msra.mxu0 %v4654_v5 }
  0xb3   :  { %4409 = vmatprep.subr.mxu0 %v4768_v20 }
  0xb5   :  { %4386 = vmatmul.mubr.msk.bf16.vlgmr.msra.gmra.mrb[4].mxu0 %vm250_vm2, %v226_v4 }
  0xb6   :  { %4411 = vmatprep.mubr.msk.f32.mxu0 %vm4769_vm0, %v4768_v20 }
 0x180   :  { %v288_v8 = vpop.f32.mrb[0].mxu0  ;;  %v352_v9 = vpop.f32.mrb[0].mxu1 }
 0x181   :  { %v289_v10 = vadd.f32 %v4105_v6, %v288_v8  ;;  %v353_v11 = vadd.f32 %v4109_v7, %v352_v9  ;;  %v4371_v12 = vpop.f32.mrb[1].mxu0  ;;  %v4379_v13 = vpop.f32.mrb[1].mxu1 }
 0x182   :  { %v291_v14 = vpop.f32.mrb[2].mxu0  ;;  %v355_v15 = vpop.f32.mrb[2].mxu1 }
 0x183   :  { %v4971_v16 = vadd.f32 %v4105_v6, %v291_v14  ;;  %v356_v17 = vadd.f32 %v4109_v7, %v355_v15  ;;  %v4380_v18 = vpop.f32.mrb[3].mxu1  ;;  %4390 = vmatpush3.xpose.msk.msra.mxu1 %vm423_vm3, %v353_v11  ;;  %586 = vrot.lane.b32.xlu1 %v289_v10, %s4770_s7  ;;  %v4372_v19 = vpop.f32.mrb[3].mxu0 }
 0x184   :  { %4394 = vmatprep.subr.mxu1 %v4768_v20 }
 0x186   :  { %4392 = vmatmul.mubr.msk.f32.vlgmr.msra.gmra.mrb[4].mxu1 %vm423_vm3, %v289_v10 }
 0x187   :  { %4396 = vmatprep.mubr.msk.f32.mxu1 %vm4769_vm0, %v4768_v20 }
 0x188   :  { %v416_v22 = vpop.f32.mrb[4].mxu0 }
 0x189   :  { %v4982_v23 = vadd.f32 %v4113_v21, %v416_v22  ;;  %v4387_v24 = vpop.f32.mrb[5].mxu0 }
 0x18a   :  { %v419_v25 = vpop.f32.mrb[6].mxu0 }
 0x18b   :  { %v4984_v26 = vadd.f32 %v4113_v21, %v419_v25  ;;  %v4388_v27 = vpop.f32.mrb[7].mxu0  ;;  %4395 = vmatpush3.msra.mxu1 %v4982_v23 }
 0x18c   :  { %4399 = vmatprep.subr.mxu1 %v4768_v20 }
 0x1f5   :  { %v587_v39 = vpop.permute.xlu1 %586 }
 0x259   :  { %v496_v28 = vpop.f32.mrb[4].mxu1 }
 0x25a   :  { %v500_v29 = vmul.f32 0.35355338, %v496_v28  ;;  %v4393_v30 = vpop.f32.mrb[5].mxu1 }
 0x25c   :  { %v501_v31 = vsel %vm423_vm3, %v500_v29, -inf }
 0x25d   :  { %502 = vmax.xlane.f32.xlu0 %v501_v31 }
 0x273   :  { %588 = vrot.lane.b32.xlu0 %v353_v11, %s4770_s7 }
 0x277   :  { %761 = vrot.lane.b32.xlu0 %v353_v11, %s4771_s1 }
 0x27b   :  { %933 = vrot.lane.b32.xlu0 %v353_v11, %s4772_s26 }
 0x27f   :  { %1267 = vrot.lane.b32.xlu0 %v356_v17, %s4770_s7 }
 0x283   :  { %1439 = vrot.lane.b32.xlu0 %v356_v17, %s4771_s1 }
 0x287   :  { %1610 = vrot.lane.b32.xlu0 %v356_v17, %s4772_s26 }
 0x2ea   :  { %v503_v32 = vpop.xlane.xlu0 %502 }
 0x2eb   :  { %v504_v33 = vsub.f32 %v500_v29, %v503_v32 }
 0x2ed   :  { %v505_v34 = vmul.f32 1.442695, %v504_v33 }
 0x2ee   :  { %v589_v35 = vpop.permute.xlu0 %588 }
 0x2ef   :  { %4679 = vpow2.f32 %v505_v34 }
 0x2f2   :  { %v762_v36 = vpop.permute.xlu0 %761 }
 0x2f3   :  { %4410 = vmatpush3.xpose.msk.msra.mxu0 %vm423_vm3, %v762_v36 }
 0x2f4   :  { %4419 = vmatprep.subr.mxu0 %v4768_v20 }
 0x2f6   :  { %v934_v41 = vpop.permute.xlu0 %933 }
 0x2f9   :  { %v4680_v37 = vpop.eup %4679 }
 0x2fa   :  { %v507_v38 = vsel %vm423_vm3, %v4680_v37, 0.0  ;;  %v1268_v44 = vpop.permute.xlu0 %1267 }
 0x2fb   :  { %508 = vadd.xlane.f32.xlu1 %v507_v38 }
 0x2fe   :  { %v1440_v48 = vpop.permute.xlu0 %1439 }
 0x302   :  { %v1611_v50 = vpop.permute.xlu0 %1610 }
 0x30c   :  { %759 = vrot.lane.b32.xlu1 %v289_v10, %s4771_s1 }
 0x310   :  { %931 = vrot.lane.b32.xlu1 %v289_v10, %s4772_s26 }
 0x314   :  { %1265 = vrot.lane.b32.xlu1 %v4971_v16, %s4770_s7 }
 0x318   :  { %1437 = vrot.lane.b32.xlu1 %v4971_v16, %s4771_s1 }
 0x31c   :  { %1608 = vrot.lane.b32.xlu1 %v4971_v16, %s4772_s26 }
 0x388   :  { %v509_v40 = vpop.xlane.xlu1 %508 }
 0x389   :  { %4681 = vrcp.f32 %v509_v40 }
 0x38c   :  { %v760_v42 = vpop.permute.xlu1 %759 }
 0x38d   :  { %4412 = vmatmul.mubr.msk.f32.vlgmr.msra.gmra.mrb[8].mxu0 %vm423_vm3, %v760_v42 }
 0x38e   :  { %4420 = vmatpush3.xpose.msk.msra.mxu0 %vm423_vm3, %v934_v41  ;;  %4421 = vmatprep.mubr.msk.f32.mxu0 %vm4769_vm0, %v4768_v20 }
 0x38f   :  { %4429 = vmatprep.subr.mxu0 %v4768_v20 }
 0x390   :  { %v932_v43 = vpop.permute.xlu1 %931 }
 0x391   :  { %4422 = vmatmul.mubr.msk.f32.vlgmr.msra.gmra.mrb[10].mxu0 %vm423_vm3, %v932_v43 }
 0x392   :  { %4430 = vmatpush3.xpose.msk.msra.mxu0 %vm423_vm3, %v356_v17  ;;  %4431 = vmatprep.mubr.msk.f32.mxu0 %vm4769_vm0, %v4768_v20 }
 0x393   :  { %v4682_v45 = vpop.eup %4681  ;;  %4439 = vmatprep.subr.mxu0 %v4768_v20 }
 0x394   :  { %v511_v46 = vmul.f32 %v4682_v45, %v4680_v37  ;;  %v1266_v47 = vpop.permute.xlu1 %1265 }
 0x395   :  { %4432 = vmatmul.mubr.msk.f32.vlgmr.msra.gmra.mrb[12].mxu0 %vm423_vm3, %v4971_v16 }
 0x396   :  { %4440 = vmatpush3.xpose.msk.msra.mxu0 %vm423_vm3, %v1268_v44  ;;  %4397 = vmatmul.mubr.msk.f32.vlgmr.msra.gmra.mrb[6].mxu1 %vm423_vm3, %v511_v46 }
 0x397   :  { %4400 = vmatpush3.xpose.msk.msra.mxu1 %vm423_vm3, %v589_v35  ;;  %4441 = vmatprep.mubr.msk.f32.mxu0 %vm4769_vm0, %v4768_v20 }
 0x398   :  { %4449 = vmatprep.subr.mxu0 %v4768_v20  ;;  %4401 = vmatprep.mubr.msk.f32.mxu1 %vm4769_vm0, %v4768_v20  ;;  %v1438_v49 = vpop.permute.xlu1 %1437 }
 0x399   :  { %4442 = vmatmul.mubr.msk.f32.vlgmr.msra.gmra.mrb[14].mxu0 %vm423_vm3, %v1266_v47  ;;  %4404 = vmatprep.subr.mxu1 %v4768_v20 }
 0x39a   :  { %4450 = vmatpush3.xpose.msk.msra.mxu0 %vm423_vm3, %v1440_v48  ;;  %4402 = vmatmul.mubr.msk.f32.vlgmr.msra.gmra.mrb[8].mxu1 %vm423_vm3, %v587_v39 }
 0x39b   :  { %4451 = vmatprep.mubr.msk.f32.mxu0 %vm4769_vm0, %v4768_v20  ;;  %4459 = vmatprep.subr.mxu0 %v4768_v20 }
 0x39c   :  { %4406 = vmatprep.mubr.msk.f32.mxu1 %vm4769_vm0, %v4768_v20  ;;  %v1609_v51 = vpop.permute.xlu1 %1608 }
 0x39d   :  { %4452 = vmatmul.mubr.msk.f32.vlgmr.msra.gmra.mrb[16].mxu0 %vm423_vm3, %v1438_v49 }
 0x39e   :  { %4460 = vmatpush3.xpose.msk.msra.mxu0 %vm423_vm3, %v1611_v50  ;;  %4461 = vmatprep.mubr.msk.f32.mxu0 %vm4769_vm0, %v4768_v20 }
 0x39f   :  { %4469 = vmatprep.subr.bf16.mxu0 %v4768_v20 }
 0x3a1   :  { %4462 = vmatmul.mubr.msk.f32.vlgmr.msra.gmra.mrb[18].mxu0 %vm423_vm3, %v1609_v51 }
 0x3a2   :  { %4473 = vmatprep.mubr.msk.bf16.mxu0 %vm4769_vm0, %v4768_v20 }
 0x460   :  { %v833_v52 = vpop.f32.mrb[8].mxu0 }
 0x461   :  { %v837_v53 = vmul.f32 0.35355338, %v833_v52  ;;  %v4413_v54 = vpop.f32.mrb[9].mxu0 }
 0x463   :  { %v838_v55 = vsel %vm423_vm3, %v837_v53, -inf }
 0x464   :  { %839 = vmax.xlane.f32.xlu1 %v838_v55  ;;  %v1005_v56 = vpop.f32.mrb[10].mxu0 }
 0x465   :  { %v4423_v57 = vpop.f32.mrb[11].mxu0  ;;  %v1009_v7 = vmul.f32 0.35355338, %v1005_v56 }
 0x467   :  { %v1010_v13 = vsel %vm423_vm3, %v1009_v7, -inf }
 0x468   :  { %v1175_v58 = vpop.f32.mrb[12].mxu0 }
 0x469   :  { %v581_v59 = vpop.f32.mrb[6].mxu1  ;;  %v4433_v60 = vpop.f32.mrb[13].mxu0  ;;  %v1179_v11 = vmul.f32 0.35355338, %v1175_v58 }
 0x46a   :  { %585 = vst.msk [vmem:[#allocation2] sm:$0xff] %vm423_vm3, %v581_v59  ;;  %v4398_v61 = vpop.f32.mrb[7].mxu1 }
 0x46b   :  { %v1180_v18 = vsel %vm423_vm3, %v1179_v11, -inf }
 0x46c   :  { %v1339_v62 = vpop.f32.mrb[14].mxu0 }
 0x46d   :  { %v1343_v63 = vmul.f32 0.35355338, %v1339_v62  ;;  %v660_v0 = vpop.f32.mrb[8].mxu1  ;;  %v4443_v3 = vpop.f32.mrb[15].mxu0 }
 0x46e   :  { %v664_v4 = vmul.f32 0.35355338, %v660_v0  ;;  %v4403_v5 = vpop.f32.mrb[9].mxu1 }
 0x46f   :  { %v1344_v6 = vsel %vm423_vm3, %v1343_v63, -inf }
 0x470   :  { %1345 = vmax.xlane.f32.xlu1 %v1344_v6  ;;  %v1511_v8 = vpop.f32.mrb[16].mxu0  ;;  %v665_v9 = vsel %vm423_vm3, %v664_v4, -inf }
 0x471   :  { %666 = vmax.xlane.f32.xlu0 %v665_v9  ;;  %v4453_v10 = vpop.f32.mrb[17].mxu0  ;;  %v1515_v17 = vmul.f32 0.35355338, %v1511_v8 }
 0x473   :  { %v1516_v19 = vsel %vm423_vm3, %v1515_v17, -inf }
 0x474   :  { %v1682_v12 = vpop.f32.mrb[18].mxu0 }
 0x475   :  { %v1686_v14 = vmul.f32 0.35355338, %v1682_v12  ;;  %1011 = vmax.xlane.f32.xlu0 %v1010_v13  ;;  %v4463_v15 = vpop.f32.mrb[19].mxu0 }
 0x477   :  { %v1687_v16 = vsel %vm423_vm3, %v1686_v14, -inf }
 0x478   :  { %1688 = vmax.xlane.f32.xlu1 %v1687_v16 }
 0x479   :  { %1181 = vmax.xlane.f32.xlu0 %v1180_v18 }
 0x47d   :  { %1517 = vmax.xlane.f32.xlu0 %v1516_v19 }
 0x4f1   :  { %v840_v21 = vpop.xlane.xlu1 %839 }
 0x4f2   :  { %v841_v22 = vsub.f32 %v837_v53, %v840_v21 }
 0x4f4   :  { %v842_v24 = vmul.f32 1.442695, %v841_v22 }
 0x4f6   :  { %4683 = vpow2.f32 %v842_v24 }
 0x4fd   :  { %v1346_v25 = vpop.xlane.xlu1 %1345 }
 0x4fe   :  { %v667_v27 = vpop.xlane.xlu0 %666  ;;  %v1347_v29 = vsub.f32 %v1343_v63, %v1346_v25 }
 0x4ff   :  { %v668_v39 = vsub.f32 %v664_v4, %v667_v27 }
 0x500   :  { %v5051_v28 = vpop.eup %4683  ;;  %v1348_v33 = vmul.f32 1.442695, %v1347_v29 }
 0x501   :  { %v844_v30 = vsel %vm423_vm3, %v5051_v28, 0.0  ;;  %v669_v44 = vmul.f32 1.442695, %v668_v39 }
 0x502   :  { %v1012_v31 = vpop.xlane.xlu0 %1011  ;;  %845 = vadd.xlane.f32.xlu1 %v844_v30 }
 0x503   :  { %v1013_v32 = vsub.f32 %v1009_v7, %v1012_v31 }
 0x505   :  { %v1014_v34 = vmul.f32 1.442695, %v1013_v32  ;;  %v1689_v35 = vpop.xlane.xlu1 %1688  ;;  %v4655_v32 = vld [vmem:[%s5497_s9] sm:$0xff]  }
 0x506   :  { %v1690_v36 = vsub.f32 %v1686_v14, %v1689_v35  ;;  %v1182_v37 = vpop.xlane.xlu0 %1181  ;;  %4470 = vmatpush3.bf16.msra.mxu0 %v4655_v32 }
 0x507   :  { %4685 = vpow2.f32 %v1014_v34  ;;  %v1183_v38 = vsub.f32 %v1179_v11, %v1182_v37  ;;  %4471 = vmatprep.subr.bf16.mxu0 %v4768_v20 }
 0x508   :  { %4687 = vpow2.f32 %v1348_v33  ;;  %v1691_v40 = vmul.f32 1.442695, %v1690_v36  ;;  %v4656_v33 = vld [vmem:[%s5497_s9 + $0x8] sm:$0xff]  }
 0x509   :  { %v1184_v41 = vmul.f32 1.442695, %v1183_v38 }
 0x50a   :  { %v1518_v42 = vpop.xlane.xlu0 %1517  ;;  %4472 = vmatpush3.bf16.msra.mxu0 %v4656_v33 }
 0x50b   :  { %4689 = vpow2.f32 %v1184_v41  ;;  %v1519_v43 = vsub.f32 %v1515_v17, %v1518_v42  ;;  %4485 = vmatprep.subr.bf16.mxu0 %v4768_v20 }
 0x50c   :  { %4691 = vpow2.f32 %v1691_v40 }
 0x50d   :  { %v1520_v45 = vmul.f32 1.442695, %v1519_v43 }
 0x50f   :  { %4693 = vpow2.f32 %v1520_v45 }
 0x510   :  { %4695 = vpow2.f32 %v669_v44 }
 0x511   :  { %v4686_v46 = vpop.eup %4685 }
 0x512   :  { %v1016_v47 = vsel %vm423_vm3, %v4686_v46, 0.0  ;;  %v5056_v48 = vpop.eup %4687 }
 0x513   :  { %1017 = vadd.xlane.f32.xlu0 %v1016_v47  ;;  %v1350_v50 = vsel %vm423_vm3, %v5056_v48, 0.0 }
 0x515   :  { %v4690_v49 = vpop.eup %4689 }
 0x516   :  { %v1186_v51 = vsel %vm423_vm3, %v4690_v49, 0.0  ;;  %v5061_v52 = vpop.eup %4691 }
 0x517   :  { %1351 = vadd.xlane.f32.xlu0 %v1350_v50  ;;  %1187 = vadd.xlane.f32.xlu1 %v1186_v51  ;;  %v1693_v55 = vsel %vm423_vm3, %v5061_v52, 0.0 }
 0x519   :  { %v5063_v53 = vpop.eup %4693 }
 0x51a   :  { %v1522_v54 = vsel %vm423_vm3, %v5063_v53, 0.0  ;;  %v4696_v56 = vpop.eup %4695 }
 0x51b   :  { %1523 = vadd.xlane.f32.xlu1 %v1522_v54  ;;  %1694 = vadd.xlane.f32.xlu0 %v1693_v55  ;;  %v671_v57 = vsel %vm423_vm3, %v4696_v56, 0.0 }
 0x51f   :  { %672 = vadd.xlane.f32.xlu0 %v671_v57 }
 0x52c   :  { %677 = vrot.lane.b32.xlu1 %v4982_v23, %s4770_s7 }
 0x530   :  { %1021 = vrot.lane.b32.xlu1 %v4982_v23, %s4772_s26 }
 0x534   :  { %1356 = vrot.lane.b32.xlu1 %v4984_v26, %s4770_s7 }
 0x535   :  { %849 = vrot.lane.b32.xlu0 %v4982_v23, %s4771_s1 }
 0x538   :  { %1698 = vrot.lane.b32.xlu1 %v4984_v26, %s4772_s26 }
 0x539   :  { %1527 = vrot.lane.b32.xlu0 %v4984_v26, %s4771_s1 }
 0x58f   :  { %v846_v58 = vpop.xlane.xlu1 %845 }
 0x5a0   :  { %v1018_v59 = vpop.xlane.xlu0 %1017 }
 0x5a4   :  { %v1352_v60 = vpop.xlane.xlu0 %1351  ;;  %v1188_v61 = vpop.xlane.xlu1 %1187 }
 0x5a8   :  { %v1695_v62 = vpop.xlane.xlu0 %1694  ;;  %v1524_v63 = vpop.xlane.xlu1 %1523 }
 0x5ac   :  { %v673_v0 = vpop.xlane.xlu0 %672  ;;  %v678_v3 = vpop.permute.xlu1 %677 }
 0x5ad   :  { %4697 = vrcp.f32 %v673_v0  ;;  %4405 = vmatpush3.msra.mxu1 %v678_v3 }
 0x5ae   :  { %4414 = vmatprep.subr.mxu1 %v4768_v20  ;;  %4699 = vrcp.f32 %v846_v58 }
 0x5af   :  { %4701 = vrcp.f32 %v1018_v59 }
 0x5b0   :  { %4703 = vrcp.f32 %v1188_v61  ;;  %v850_v6 = vpop.permute.xlu0 %849  ;;  %v1022_v9 = vpop.permute.xlu1 %1021 }
 0x5b1   :  { %4705 = vrcp.f32 %v1352_v60 }
 0x5b2   :  { %4707 = vrcp.f32 %v1524_v63 }
 0x5b3   :  { %4709 = vrcp.f32 %v1695_v62 }
 0x5b4   :  { %v1357_v14 = vpop.permute.xlu1 %1356 }
 0x5b7   :  { %v4698_v23 = vpop.eup %4697 }
 0x5b8   :  { %v675_v4 = vmul.f32 %v4698_v23, %v4696_v56  ;;  %v4700_v5 = vpop.eup %4699  ;;  %v1699_v19 = vpop.permute.xlu1 %1698 }
 0x5b9   :  { %v848_v7 = vmul.f32 %v4700_v5, %v5051_v28  ;;  %v4702_v8 = vpop.eup %4701 }
 0x5ba   :  { %4407 = vmatmul.mubr.msk.f32.vlgmr.msra.gmra.mrb[10].mxu1 %vm423_vm3, %v675_v4  ;;  %v1020_v10 = vmul.f32 %v4702_v8, %v4686_v46  ;;  %v4704_v11 = vpop.eup %4703 }
 0x5bb   :  { %4415 = vmatpush3.msra.mxu1 %v850_v6  ;;  %4416 = vmatprep.mubr.msk.f32.mxu1 %vm4769_vm0, %v4768_v20  ;;  %v1190_v12 = vmul.f32 %v4704_v11, %v4690_v49  ;;  %v4706_v13 = vpop.eup %4705  ;;  %v4141_v49 = vld [vmem:[%s5498_s10] ss:$0 sm:$0xff]  ;;  %v4658_v6 = vld [vmem:[%s5499_s13 + $0x8] sm:$0xff]  }
 0x5bc   :  { %4424 = vmatprep.subr.mxu1 %v4768_v20  ;;  %v1354_v15 = vmul.f32 %v4706_v13, %v5056_v48  ;;  %v4708_v16 = vpop.eup %4707 }
 0x5bd   :  { %v1526_v17 = vmul.f32 %v4708_v16, %v5063_v53  ;;  %v4710_v18 = vpop.eup %4709 }
 0x5be   :  { %4417 = vmatmul.mubr.msk.f32.vlgmr.msra.gmra.mrb[12].mxu1 %vm423_vm3, %v848_v7  ;;  %v1697_v21 = vmul.f32 %v4710_v18, %v5061_v52  ;;  %v4146_v18 = vld [vmem:[%s5501_s12] ss:$0 sm:$0xff] }
 0x5bf   :  { %4425 = vmatpush3.msra.mxu1 %v1022_v9  ;;  %4426 = vmatprep.mubr.msk.f32.mxu1 %vm4769_vm0, %v4768_v20 }
 0x5c0   :  { %4434 = vmatprep.subr.mxu1 %v4768_v20 }
 0x5c2   :  { %4427 = vmatmul.mubr.msk.f32.vlgmr.msra.gmra.mrb[14].mxu1 %vm423_vm3, %v1020_v10 }
 0x5c3   :  { %4435 = vmatpush3.msra.mxu1 %v4984_v26  ;;  %4436 = vmatprep.mubr.msk.f32.mxu1 %vm4769_vm0, %v4768_v20  ;;  %v1528_v26 = vpop.permute.xlu0 %1527 }
 0x5c4   :  { %4444 = vmatprep.subr.mxu1 %v4768_v20 }
 0x5c6   :  { %4437 = vmatmul.mubr.msk.f32.vlgmr.msra.gmra.mrb[16].mxu1 %vm423_vm3, %v1190_v12 }
 0x5c7   :  { %4445 = vmatpush3.msra.mxu1 %v1357_v14  ;;  %4446 = vmatprep.mubr.msk.f32.mxu1 %vm4769_vm0, %v4768_v20 }
 0x5c8   :  { %4454 = vmatprep.subr.mxu1 %v4768_v20 }
 0x5ca   :  { %4447 = vmatmul.mubr.msk.f32.vlgmr.msra.gmra.mrb[18].mxu1 %vm423_vm3, %v1354_v15  ;;  %v4145_v15 = vld [vmem:[%s5500_s11] ss:$0 sm:$0xff] }
 0x5cb   :  { %4455 = vmatpush3.msra.mxu1 %v1528_v26  ;;  %4456 = vmatprep.mubr.msk.f32.mxu1 %vm4769_vm0, %v4768_v20 }
 0x5cc   :  { %4464 = vmatprep.subr.mxu1 %v4768_v20 }
 0x5ce   :  { %4457 = vmatmul.mubr.msk.f32.vlgmr.msra.gmra.mrb[20].mxu1 %vm423_vm3, %v1526_v17 }
 0x5cf   :  { %4465 = vmatpush3.msra.mxu1 %v1699_v19  ;;  %4466 = vmatprep.mubr.msk.f32.mxu1 %vm4769_vm0, %v4768_v20 }
 0x5d0   :  { %4477 = vmatprep.subr.bf16.mxu1 %v4768_v20 }
 0x5d2   :  { %4467 = vmatmul.mubr.msk.f32.vlgmr.msra.gmra.mrb[22].mxu1 %vm423_vm3, %v1697_v21 }
 0x5d3   :  { %4481 = vmatprep.mubr.msk.bf16.mxu1 %vm4769_vm0, %v4768_v20 }
 0x68d   :  { %v749_v22 = vpop.f32.mrb[10].mxu1 }
 0x68e   :  { %754 = vrot.lane.b32.xlu0 %v749_v22, %s4773_s30  ;;  %v4408_v24 = vpop.f32.mrb[11].mxu1 }
 0x691   :  { %v921_v25 = vpop.f32.mrb[12].mxu1 }
 0x692   :  { %926 = vrot.lane.b32.xlu0 %v921_v25, %s5517_s23  ;;  %v4418_v27 = vpop.f32.mrb[13].mxu1  ;;  %v4659_v25 = vld [vmem:[%s5502_s15] sm:$0xff]  }
 0x693   :  { %v4660_v27 = vld [vmem:[%s5502_s15 + $0x8] sm:$0xff]  }
 0x695   :  { %v1093_v28 = vpop.f32.mrb[14].mxu1 }
 0x696   :  { %1098 = vrot.lane.b32.xlu0 %v1093_v28, %s5515_s3  ;;  %v4428_v29 = vpop.f32.mrb[15].mxu1  ;;  %v4661_v28 = vld [vmem:[%s5502_s15 + $0x10] sm:$0xff]  }
 0x697   :  { %v4662_v29 = vld [vmem:[%s5502_s15 + $0x18] sm:$0xff]  }
 0x699   :  { %v1260_v30 = vpop.f32.mrb[16].mxu1 }
 0x69a   :  { %1264 = vst.msk [vmem:[#allocation2 + $0x8] sm:$0xff] %vm423_vm3, %v1260_v30  ;;  %v4438_v31 = vpop.f32.mrb[17].mxu1  ;;  %v4147_v30 = vld [vmem:[%s5503_s14] ss:$0 sm:$0xff] }
 0x69d   :  { %v1428_v34 = vpop.f32.mrb[18].mxu1 }
 0x69e   :  { %1433 = vrot.lane.b32.xlu1 %v1428_v34, %s4773_s30  ;;  %v4448_v35 = vpop.f32.mrb[19].mxu1 }
 0x6a1   :  { %v1599_v36 = vpop.f32.mrb[20].mxu1 }
 0x6a2   :  { %1604 = vrot.lane.b32.xlu1 %v1599_v36, %s5517_s23  ;;  %v4458_v37 = vpop.f32.mrb[21].mxu1 }
 0x6a5   :  { %v1770_v38 = vpop.f32.mrb[22].mxu1 }
 0x6a6   :  { %1775 = vrot.lane.b32.xlu1 %v1770_v38, %s5515_s3  ;;  %v4468_v39 = vpop.f32.mrb[23].mxu1 }
 0x700   :  { %v755_v40 = vpop.permute.xlu0 %754 }
 0x701   :  { %758 = vst.msk [vmem:[#allocation2] sm:$0xff] %vm757_vm4, %v755_v40 }
 0x704   :  { %v927_v41 = vpop.permute.xlu0 %926 }
 0x705   :  { %930 = vst.msk [vmem:[#allocation2] sm:$0xff] %vm929_vm5, %v927_v41 }
 0x708   :  { %v1099_v42 = vpop.permute.xlu0 %1098 }
 0x709   :  { %1102 = vst.msk [vmem:[#allocation2] sm:$0xff] %vm1101_vm6, %v1099_v42 }
 0x710   :  { %v1434_v43 = vpop.permute.xlu1 %1433  ;;  %v1779_v46 = vld [vmem:[#allocation2] sm:$0xff] }
 0x711   :  { %1436 = vst.msk [vmem:[#allocation2 + $0x8] sm:$0xff] %vm757_vm4, %v1434_v43 }
 0x714   :  { %v1605_v44 = vpop.permute.xlu1 %1604 }
 0x715   :  { %1607 = vst.msk [vmem:[#allocation2 + $0x8] sm:$0xff] %vm929_vm5, %v1605_v44 }
 0x718   :  { %v1776_v45 = vpop.permute.xlu1 %1775 }
 0x719   :  { %1778 = vst.msk [vmem:[#allocation2 + $0x8] sm:$0xff] %vm1101_vm6, %v1776_v45 }
 0x720   :  { %v1780_v47 = vld [vmem:[#allocation2 + $0x8] sm:$0xff] }
 0x721   :  { %v1781_v48 = vpack.c.bf16 %v1780_v47, %v1779_v46 }
 0x723   :  { %4474 = vmatmul.mubr.msk.bf16.vlgmr.msra.gmra.mrb[20].mxu0 %vm250_vm2, %v1781_v48 }
 0x724   :  { %4493 = vmatprep.mubr.msk.bf16.mxu0 %vm4769_vm0, %v4768_v20  ;;  %4486 = vmatpush3.bf16.msra.mxu0 %v4659_v25 }
 0x725   :  { %4487 = vmatprep.subr.bf16.mxu0 %v4768_v20 }
 0x728   :  { %4488 = vmatpush3.bf16.msra.mxu0 %v4660_v27 }
 0x729   :  { %4489 = vmatprep.subr.bf16.mxu0 %v4768_v20 }
 0x72c   :  { %4490 = vmatpush3.bf16.msra.mxu0 %v4661_v28 }
 0x72d   :  { %4491 = vmatprep.subr.bf16.mxu0 %v4768_v20 }
 0x730   :  { %4492 = vmatpush3.bf16.msra.mxu0 %v4662_v29 }
 0x731   :  { %4513 = vmatprep.subr.bf16.mxu0 %v4768_v20 }
 0x7f6   :  { %v1842_v50 = vpop.f32.mrb[20].mxu0 }
 0x7f7   :  { %v1843_v51 = vadd.f32 %v4141_v49, %v1842_v50  ;;  %v4475_v52 = vpop.f32.mrb[21].mxu0 }
 0x7f8   :  { %v1845_v53 = vpop.f32.mrb[22].mxu0 }
 0x7f9   :  { %v1846_v54 = vadd.f32 %v4141_v49, %v1845_v53  ;;  %v4476_v55 = vpop.f32.mrb[23].mxu0  ;;  %v1849_v56 = vadd.f32 %v1843_v51, %v4944_v2 }
 0x7fb   :  { %v1853_v57 = vsel %vm250_vm2, %v1849_v56, 0.0  ;;  %v1850_v58 = vadd.f32 %v1846_v54, %v4942_v1  ;;  %v4657_v1 = vld [vmem:[%s5499_s13] sm:$0xff]  }
 0x7fc   :  { %1854 = vadd.xlane.f32.xlu0 %v1853_v57  ;;  %4478 = vmatpush3.bf16.msra.mxu1 %v4657_v1 }
 0x7fd   :  { %v1856_v59 = vsel %vm250_vm2, %v1850_v58, 0.0  ;;  %4479 = vmatprep.subr.bf16.mxu1 %v4768_v20 }
 0x7fe   :  { %1857 = vadd.xlane.f32.xlu1 %v1856_v59 }
 0x800   :  { %4480 = vmatpush3.bf16.msra.mxu1 %v4658_v6 }
 0x801   :  { %4497 = vmatprep.subr.bf16.mxu1 %v4768_v20 }
 0x889   :  { %v1855_v60 = vpop.xlane.xlu0 %1854 }
 0x88a   :  { %v1860_v61 = vmul.f32 0.03125, %v1855_v60 }
 0x88b   :  { %v1858_v62 = vpop.xlane.xlu1 %1857 }
 0x88c   :  { %v1862_v63 = vsub.f32 %v1849_v56, %v1860_v61  ;;  %v1861_v0 = vmul.f32 0.03125, %v1858_v62  ;;  %v4151_v56 = vld [vmem:[%s5504_s16] ss:$0 sm:$0xff] }
 0x88e   :  { %v1863_v3 = vsub.f32 %v1850_v58, %v1861_v0  ;;  %v1864_v23 = vmul.f32 %v1862_v63, %v1862_v63 }
 0x890   :  { %v1866_v4 = vsel %vm250_vm2, %v1864_v23, 0.0  ;;  %v1865_v5 = vmul.f32 %v1863_v3, %v1863_v3 }
 0x891   :  { %1867 = vadd.xlane.f32.xlu0 %v1866_v4 }
 0x892   :  { %v1869_v2 = vsel %vm250_vm2, %v1865_v5, 0.0 }
 0x895   :  { %1870 = vadd.xlane.f32.xlu0 %v1869_v2 }
 0x91e   :  { %v1868_v7 = vpop.xlane.xlu0 %1867 }
 0x91f   :  { %v1872_v8 = vmul.f32 0.03125, %v1868_v7 }
 0x921   :  { %v1874_v9 = vadd.f32 1e-12, %v1872_v8 }
 0x922   :  { %v1871_v10 = vpop.xlane.xlu0 %1870 }
 0x923   :  { %4711 = vrsqrt.f32 %v1874_v9  ;;  %v1873_v11 = vmul.f32 0.03125, %v1871_v10 }
 0x925   :  { %v1875_v12 = vadd.f32 1e-12, %v1873_v11 }
 0x927   :  { %4713 = vrsqrt.f32 %v1875_v12  ;;  %v4663_v12 = vld [vmem:[%s5526_s0 + $0x10] sm:$0xff]  }
 0x92d   :  { %v4712_v13 = vpop.eup %4711 }
 0x92e   :  { %v1878_v14 = vmul.f32 %v4712_v13, %v1862_v63  ;;  %v4664_v13 = vld [vmem:[%s5530_s22 + $0x10] sm:$0xff]  }
 0x930   :  { %v1886_v26 = vmul.f32 %v4145_v15, %v1878_v14  ;;  %v4665_v14 = vld [vmem:[%s5526_s0 + $0x18] sm:$0xff]  }
 0x931   :  { %v4714_v16 = vpop.eup %4713 }
 0x932   :  { %v1879_v17 = vmul.f32 %v4714_v16, %v1863_v3  ;;  %v1894_v21 = vadd.f32 %v4146_v18, %v1886_v26 }
 0x934   :  { %v1887_v19 = vmul.f32 %v4145_v15, %v1879_v17  ;;  %v4666_v15 = vld [vmem:[%s5530_s22 + $0x18] sm:$0xff]  }
 0x936   :  { %v1895_v22 = vadd.f32 %v4146_v18, %v1887_v19 }
 0x938   :  { %v1896_v24 = vpack.c.bf16 %v1895_v22, %v1894_v21 }
 0x93a   :  { %4482 = vmatmul.mubr.msk.bf16.vlgmr.msra.gmra.mrb[24].mxu1 %vm250_vm2, %v1896_v24  ;;  %v4157_v24 = vld [vmem:[%s5505_s17] ss:$0 sm:$0xff] }
 0x93b   :  { %4501 = vmatprep.mubr.msk.bf16.mxu1 %vm4769_vm0, %v4768_v20  ;;  %4498 = vmatpush3.bf16.msra.mxu1 %v4663_v12 }
 0x93c   :  { %4499 = vmatprep.subr.bf16.mxu1 %v4768_v20 }
 0x93f   :  { %4500 = vmatpush3.bf16.msra.mxu1 %v4665_v14 }
 0x940   :  { %4505 = vmatprep.subr.bf16.mxu1 %v4768_v20 }
 0xa0d   :  { %v1957_v31 = vpop.f32.mrb[24].mxu1 }
 0xa0e   :  { %v1958_v32 = vadd.f32 %v4147_v30, %v1957_v31  ;;  %v4483_v33 = vpop.f32.mrb[25].mxu1 }
 0xa0f   :  { %v1960_v34 = vpop.f32.mrb[26].mxu1 }
 0xa10   :  { %v1966_v35 = vmul.f32 0.044715, %v1958_v32  ;;  %v1961_v36 = vadd.f32 %v4147_v30, %v1960_v34  ;;  %v4484_v37 = vpop.f32.mrb[27].mxu1  ;;  %v1964_v50 = vmul.f32 0.5, %v1958_v32  ;;  %v4158_v30 = vld [vmem:[%s5506_s18] ss:$0 sm:$0xff] }
 0xa11   :  { %v4667_v34 = vld [vmem:[%s5527_s2 + $0x10] sm:$0xff]   ;;  %v4164_v37 = vld [vmem:[%s5494_s4 + $0x1] ss:$0 sm:$0xff]  ;;  %s5531_s4 = smov 16  }
 0xa12   :  { %v1968_v38 = vmul.f32 %v1966_v35, %v1958_v32  ;;  %v1967_v39 = vmul.f32 0.044715, %v1961_v36  ;;  %v1965_v51 = vmul.f32 0.5, %v1961_v36 }
 0xa14   :  { %v1970_v40 = vmul.f32 %v1968_v38, %v1958_v32  ;;  %v1969_v41 = vmul.f32 %v1967_v39, %v1961_v36 }
 0xa16   :  { %v1972_v42 = vadd.f32 %v1970_v40, %v1958_v32  ;;  %v1971_v43 = vmul.f32 %v1969_v41, %v1961_v36 }
 0xa18   :  { %v1974_v44 = vmul.f32 0.7978846, %v1972_v42  ;;  %v1973_v45 = vadd.f32 %v1971_v43, %v1961_v36  ;;  %v4668_v36 = vld [vmem:[%s5527_s2 + $0x18] sm:$0xff]   ;;  %v4182_v43 = vld [vmem:[%s5496_s8 + $0x1] ss:$0 sm:$0xff] }
 0xa1a   :  { %4715 = vtanh.f32 %v1974_v44  ;;  %v1975_v46 = vmul.f32 0.7978846, %v1973_v45 }
 0xa1c   :  { %4717 = vtanh.f32 %v1975_v46 }
 0xa24   :  { %v4716_v47 = vpop.eup %4715 }
 0xa25   :  { %v1978_v48 = vadd.f32 1.0, %v4716_v47 }
 0xa26   :  { %v4718_v49 = vpop.eup %4717 }
 0xa27   :  { %v1979_v52 = vadd.f32 1.0, %v4718_v49  ;;  %v1980_v53 = vmul.f32 %v1978_v48, %v1964_v50  ;;  %v4173_v49 = vld [vmem:[%s5495_s6 + $0x1] ss:$0 sm:$0xff]  ;;  %s5532_s6 = smov 24  }
 0xa29   :  { %v1981_v54 = vmul.f32 %v1979_v52, %v1965_v51 }
 0xa2b   :  { %v1982_v55 = vpack.c.bf16 %v1981_v54, %v1980_v53 }
 0xa2d   :  { %4494 = vmatmul.mubr.msk.bf16.vlgmr.msra.gmra.mrb[24].mxu0 %vm2022_vm7, %v1982_v55 }
 0xa2e   :  { %4517 = vmatprep.mubr.msk.bf16.mxu0 %vm4769_vm0, %v4768_v20  ;;  %4514 = vmatpush3.bf16.msra.mxu0 %v4664_v13 }
 0xa2f   :  { %4515 = vmatprep.subr.bf16.mxu0 %v4768_v20 }
 0xa32   :  { %4516 = vmatpush3.bf16.msra.mxu0 %v4666_v15 }
 0xa33   :  { %4531 = vmatprep.subr.mxu0 %v4768_v20 }
 0xb00   :  { %v2060_v57 = vpop.f32.mrb[24].mxu0 }
 0xb01   :  { %v2061_v58 = vadd.f32 %v4151_v56, %v2060_v57  ;;  %v4495_v59 = vpop.f32.mrb[25].mxu0 }
 0xb02   :  { %v2063_v60 = vpop.f32.mrb[26].mxu0 }
 0xb03   :  { %v2064_v61 = vadd.f32 %v4151_v56, %v2063_v60  ;;  %v4496_v62 = vpop.f32.mrb[27].mxu0  ;;  %v2067_v63 = vadd.f32 %v2061_v58, %v1894_v21 }
 0xb05   :  { %v2071_v0 = vsel %vm250_vm2, %v2067_v63, 0.0  ;;  %v2068_v3 = vadd.f32 %v2064_v61, %v1895_v22 }
 0xb06   :  { %2072 = vadd.xlane.f32.xlu1 %v2071_v0 }
 0xb07   :  { %v2074_v23 = vsel %vm250_vm2, %v2068_v3, 0.0 }
 0xb08   :  { %2075 = vadd.xlane.f32.xlu0 %v2074_v23 }
 0xb93   :  { %v2073_v4 = vpop.xlane.xlu1 %2072 }
 0xb94   :  { %v2077_v5 = vmul.f32 0.03125, %v2073_v4 }
 0xb95   :  { %v2076_v2 = vpop.xlane.xlu0 %2075 }
 0xb96   :  { %v2079_v1 = vsub.f32 %v2067_v63, %v2077_v5  ;;  %v2078_v6 = vmul.f32 0.03125, %v2076_v2 }
 0xb98   :  { %v2080_v7 = vsub.f32 %v2068_v3, %v2078_v6  ;;  %v2081_v8 = vmul.f32 %v2079_v1, %v2079_v1 }
 0xb9a   :  { %v2083_v9 = vsel %vm250_vm2, %v2081_v8, 0.0  ;;  %v2082_v10 = vmul.f32 %v2080_v7, %v2080_v7 }
 0xb9b   :  { %2084 = vadd.xlane.f32.xlu1 %v2083_v9 }
 0xb9c   :  { %v2086_v11 = vsel %vm250_vm2, %v2082_v10, 0.0 }
 0xb9d   :  { %2087 = vadd.xlane.f32.xlu0 %v2086_v11 }
 0xc28   :  { %v2085_v16 = vpop.xlane.xlu1 %2084 }
 0xc29   :  { %v2089_v26 = vmul.f32 0.03125, %v2085_v16 }
 0xc2a   :  { %v2088_v17 = vpop.xlane.xlu0 %2087 }
 0xc2b   :  { %v2091_v18 = vadd.f32 1e-12, %v2089_v26  ;;  %v2090_v19 = vmul.f32 0.03125, %v2088_v17 }
 0xc2d   :  { %4719 = vrsqrt.f32 %v2091_v18  ;;  %v2092_v21 = vadd.f32 1e-12, %v2090_v19 }
 0xc2f   :  { %4721 = vrsqrt.f32 %v2092_v21 }
 0xc37   :  { %v4720_v22 = vpop.eup %4719 }
 0xc38   :  { %v2095_v25 = vmul.f32 %v4720_v22, %v2079_v1 }
 0xc39   :  { %v4722_v27 = vpop.eup %4721 }
 0xc3a   :  { %v2103_v28 = vmul.f32 %v4157_v24, %v2095_v25  ;;  %v2096_v29 = vmul.f32 %v4722_v27, %v2080_v7 }
 0xc3c   :  { %v2104_v31 = vmul.f32 %v4157_v24, %v2096_v29  ;;  %v5216_v32 = vadd.f32 %v4158_v30, %v2103_v28 }
 0xc3e   :  { %v5218_v33 = vadd.f32 %v4158_v30, %v2104_v31 }
 0xc40   :  { %v2113_v35 = vpack.c.bf16 %v5218_v33, %v5216_v32 }
 0xc42   :  { %4502 = vmatmul.mubr.msk.bf16.vlgmr.msra.gmra.mrb[28].mxu1 %vm250_vm2, %v2113_v35  ;;  %4518 = vmatmul.mubr.msk.bf16.vlgmr.msra.gmra.mrb[28].mxu0 %vm250_vm2, %v2113_v35 }
 0xc43   :  { %4506 = vmatpush3.bf16.msra.mxu1 %v4667_v34  ;;  %4509 = vmatprep.mubr.msk.bf16.mxu1 %vm4769_vm0, %v4768_v20 }
 0xc44   :  { %4507 = vmatprep.subr.bf16.mxu1 %v4768_v20  ;;  %4533 = vmatprep.mubr.msk.f32.mxu0 %vm4769_vm0, %v4768_v20 }
 0xc47   :  { %4508 = vmatpush3.bf16.msra.mxu1 %v4668_v36 }
 0xc48   :  { %4521 = vmatprep.subr.mxu1 %v4768_v20 }
 0xc4a   :  { %4510 = vmatmul.mubr.msk.bf16.vlgmr.msra.gmra.mrb[32].mxu1 %vm250_vm2, %v2113_v35 }
 0xc4b   :  { %4523 = vmatprep.mubr.msk.f32.mxu1 %vm4769_vm0, %v4768_v20 }
 0xd15   :  { %v2176_v38 = vpop.f32.mrb[28].mxu1  ;;  %v2308_v39 = vpop.f32.mrb[28].mxu0 }
 0xd16   :  { %v2177_v40 = vadd.f32 %v4164_v37, %v2176_v38  ;;  %v4503_v41 = vpop.f32.mrb[29].mxu1  ;;  %v4519_v42 = vpop.f32.mrb[29].mxu0  ;;  %v5255_v55 = vadd.f32 %v4182_v43, %v2308_v39 }
 0xd17   :  { %v2179_v44 = vpop.f32.mrb[30].mxu1  ;;  %v2311_v45 = vpop.f32.mrb[30].mxu0 }
 0xd18   :  { %v5245_v46 = vadd.f32 %v4182_v43, %v2311_v45  ;;  %2477 = vrot.lane.b32.xlu0 %v2177_v40, %s4770_s7  ;;  %v4504_v47 = vpop.f32.mrb[31].mxu1  ;;  %v4520_v48 = vpop.f32.mrb[31].mxu0  ;;  %v2180_v57 = vadd.f32 %v4164_v37, %v2179_v44 }
 0xd1d   :  { %v2242_v50 = vpop.f32.mrb[32].mxu1 }
 0xd1e   :  { %v2243_v51 = vadd.f32 %v4173_v49, %v2242_v50  ;;  %v4511_v52 = vpop.f32.mrb[33].mxu1 }
 0xd1f   :  { %v2245_v53 = vpop.f32.mrb[34].mxu1 }
 0xd20   :  { %2822 = vrot.lane.b32.xlu0 %v2243_v51, %s4772_s26  ;;  %2479 = vrot.lane.b32.xlu1 %v2243_v51, %s4770_s7  ;;  %v4512_v54 = vpop.f32.mrb[35].mxu1  ;;  %v2246_v56 = vadd.f32 %v4173_v49, %v2245_v53 }
 0xd21   :  { %4522 = vmatpush3.xpose.msk.msra.mxu1 %vm423_vm3, %v2243_v51 }
 0xd22   :  { %4526 = vmatprep.subr.mxu1 %v4768_v20 }
 0xd24   :  { %4524 = vmatmul.mubr.msk.f32.vlgmr.msra.gmra.mrb[36].mxu1 %vm423_vm3, %v2177_v40  ;;  %2651 = vrot.lane.b32.xlu1 %v2243_v51, %s4771_s1 }
 0xd25   :  { %3155 = vrot.lane.b32.xlu0 %v2246_v56, %s4770_s7  ;;  %4527 = vmatpush3.msra.mxu1 %v5255_v55 }
 0xd26   :  { %4528 = vmatprep.mubr.msk.f32.mxu1 %vm4769_vm0, %v4768_v20  ;;  %4536 = vmatprep.subr.mxu1 %v4768_v20 }
 0xd28   :  { %2649 = vrot.lane.b32.xlu1 %v2177_v40, %s4771_s1 }
 0xd29   :  { %3327 = vrot.lane.b32.xlu0 %v2246_v56, %s4771_s1 }
 0xd2c   :  { %2820 = vrot.lane.b32.xlu1 %v2177_v40, %s4772_s26 }
 0xd2d   :  { %3498 = vrot.lane.b32.xlu0 %v2246_v56, %s4772_s26 }
 0xd30   :  { %3153 = vrot.lane.b32.xlu1 %v2180_v57, %s4770_s7 }
 0xd34   :  { %3325 = vrot.lane.b32.xlu1 %v2180_v57, %s4771_s1 }
 0xd38   :  { %3496 = vrot.lane.b32.xlu1 %v2180_v57, %s4772_s26 }
 0xd8a   :  { %v2478_v59 = vpop.permute.xlu0 %2477 }
 0xd92   :  { %v2480_v58 = vpop.permute.xlu1 %2479  ;;  %v2823_v61 = vpop.permute.xlu0 %2822 }
 0xd93   :  { %4532 = vmatpush3.xpose.msk.msra.mxu0 %vm423_vm3, %v2480_v58 }
 0xd94   :  { %4541 = vmatprep.subr.mxu0 %v4768_v20 }
 0xd96   :  { %4534 = vmatmul.mubr.msk.f32.vlgmr.msra.gmra.mrb[32].mxu0 %vm423_vm3, %v2478_v59  ;;  %v2652_v60 = vpop.permute.xlu1 %2651 }
 0xd97   :  { %4542 = vmatpush3.xpose.msk.msra.mxu0 %vm423_vm3, %v2652_v60  ;;  %4543 = vmatprep.mubr.msk.f32.mxu0 %vm4769_vm0, %v4768_v20  ;;  %v3156_v0 = vpop.permute.xlu0 %3155 }
 0xd98   :  { %4551 = vmatprep.subr.mxu0 %v4768_v20 }
 0xd9a   :  { %v2650_v62 = vpop.permute.xlu1 %2649 }
 0xd9b   :  { %4544 = vmatmul.mubr.msk.f32.vlgmr.msra.gmra.mrb[34].mxu0 %vm423_vm3, %v2650_v62  ;;  %v3328_v23 = vpop.permute.xlu0 %3327 }
 0xd9c   :  { %4552 = vmatpush3.xpose.msk.msra.mxu0 %vm423_vm3, %v2823_v61  ;;  %4553 = vmatprep.mubr.msk.f32.mxu0 %vm4769_vm0, %v4768_v20 }
 0xd9d   :  { %4561 = vmatprep.subr.mxu0 %v4768_v20 }
 0xd9e   :  { %v2821_v63 = vpop.permute.xlu1 %2820 }
 0xd9f   :  { %4554 = vmatmul.mubr.msk.f32.vlgmr.msra.gmra.mrb[36].mxu0 %vm423_vm3, %v2821_v63  ;;  %v3499_v5 = vpop.permute.xlu0 %3498 }
 0xda0   :  { %4562 = vmatpush3.xpose.msk.msra.mxu0 %vm423_vm3, %v2246_v56  ;;  %4563 = vmatprep.mubr.msk.f32.mxu0 %vm4769_vm0, %v4768_v20 }
 0xda1   :  { %4571 = vmatprep.subr.mxu0 %v4768_v20 }
 0xda2   :  { %v3154_v3 = vpop.permute.xlu1 %3153 }
 0xda3   :  { %4564 = vmatmul.mubr.msk.f32.vlgmr.msra.gmra.mrb[38].mxu0 %vm423_vm3, %v2180_v57 }
 0xda4   :  { %4572 = vmatpush3.xpose.msk.msra.mxu0 %vm423_vm3, %v3156_v0  ;;  %4573 = vmatprep.mubr.msk.f32.mxu0 %vm4769_vm0, %v4768_v20 }
 0xda5   :  { %4581 = vmatprep.subr.mxu0 %v4768_v20 }
 0xda6   :  { %v3326_v4 = vpop.permute.xlu1 %3325 }
 0xda7   :  { %4574 = vmatmul.mubr.msk.f32.vlgmr.msra.gmra.mrb[40].mxu0 %vm423_vm3, %v3154_v3 }
 0xda8   :  { %4582 = vmatpush3.xpose.msk.msra.mxu0 %vm423_vm3, %v3328_v23  ;;  %4583 = vmatprep.mubr.msk.f32.mxu0 %vm4769_vm0, %v4768_v20 }
 0xda9   :  { %4591 = vmatprep.subr.mxu0 %v4768_v20 }
 0xdaa   :  { %v3497_v2 = vpop.permute.xlu1 %3496 }
 0xdab   :  { %4584 = vmatmul.mubr.msk.f32.vlgmr.msra.gmra.mrb[42].mxu0 %vm423_vm3, %v3326_v4 }
 0xdac   :  { %4592 = vmatpush3.xpose.msk.msra.mxu0 %vm423_vm3, %v3499_v5  ;;  %4593 = vmatprep.mubr.msk.f32.mxu0 %vm4769_vm0, %v4768_v20 }
 0xdad   :  { %4601 = vmatprep.subr.bf16.mxu0 %v4768_v20 }
 0xdaf   :  { %4594 = vmatmul.mubr.msk.f32.vlgmr.msra.gmra.mrb[44].mxu0 %vm423_vm3, %v3497_v2 }
 0xdb0   :  { %4605 = vmatprep.mubr.msk.bf16.mxu0 %vm4769_vm0, %v4768_v20 }
 0xdf7   :  { %v2387_v1 = vpop.f32.mrb[36].mxu1 }
 0xdf8   :  { %v2391_v6 = vmul.f32 0.35355338, %v2387_v1  ;;  %v4525_v7 = vpop.f32.mrb[37].mxu1 }
 0xdfa   :  { %v2392_v8 = vsel %vm423_vm3, %v2391_v6, -inf }
 0xdfb   :  { %2393 = vmax.xlane.f32.xlu0 %v2392_v8 }
 0xe69   :  { %v2551_v9 = vpop.f32.mrb[32].mxu0 }
 0xe6a   :  { %v2555_v10 = vmul.f32 0.35355338, %v2551_v9  ;;  %v4535_v11 = vpop.f32.mrb[33].mxu0 }
 0xe6c   :  { %v2556_v12 = vsel %vm423_vm3, %v2555_v10, -inf }
 0xe6d   :  { %2557 = vmax.xlane.f32.xlu1 %v2556_v12 }
 0xe6e   :  { %v2723_v13 = vpop.f32.mrb[34].mxu0 }
 0xe6f   :  { %v2727_v14 = vmul.f32 0.35355338, %v2723_v13  ;;  %v4545_v15 = vpop.f32.mrb[35].mxu0 }
 0xe71   :  { %v2728_v16 = vsel %vm423_vm3, %v2727_v14, -inf }
 0xe72   :  { %2729 = vmax.xlane.f32.xlu0 %v2728_v16  ;;  %v2894_v26 = vpop.f32.mrb[36].mxu0 }
 0xe73   :  { %v2898_v17 = vmul.f32 0.35355338, %v2894_v26  ;;  %v4555_v18 = vpop.f32.mrb[37].mxu0 }
 0xe75   :  { %v2899_v19 = vsel %vm423_vm3, %v2898_v17, -inf }
 0xe76   :  { %2900 = vmax.xlane.f32.xlu0 %v2899_v19  ;;  %v3063_v21 = vpop.f32.mrb[38].mxu0 }
 0xe77   :  { %v3067_v22 = vmul.f32 0.35355338, %v3063_v21  ;;  %v4565_v24 = vpop.f32.mrb[39].mxu0 }
 0xe79   :  { %v3068_v25 = vsel %vm423_vm3, %v3067_v22, -inf }
 0xe7a   :  { %3069 = vmax.xlane.f32.xlu1 %v3068_v25  ;;  %v3227_v27 = vpop.f32.mrb[40].mxu0 }
 0xe7b   :  { %v3231_v28 = vmul.f32 0.35355338, %v3227_v27  ;;  %v4575_v29 = vpop.f32.mrb[41].mxu0 }
 0xe7d   :  { %v3232_v30 = vsel %vm423_vm3, %v3231_v28, -inf }
 0xe7e   :  { %3233 = vmax.xlane.f32.xlu0 %v3232_v30  ;;  %v3399_v31 = vpop.f32.mrb[42].mxu0 }
 0xe7f   :  { %v3403_v34 = vmul.f32 0.35355338, %v3399_v31  ;;  %v4585_v35 = vpop.f32.mrb[43].mxu0 }
 0xe81   :  { %v3404_v36 = vsel %vm423_vm3, %v3403_v34, -inf }
 0xe82   :  { %3405 = vmax.xlane.f32.xlu1 %v3404_v36  ;;  %v3570_v37 = vpop.f32.mrb[44].mxu0 }
 0xe83   :  { %v3574_v38 = vmul.f32 0.35355338, %v3570_v37  ;;  %v4595_v39 = vpop.f32.mrb[45].mxu0 }
 0xe85   :  { %v3575_v40 = vsel %vm423_vm3, %v3574_v38, -inf }
 0xe86   :  { %3576 = vmax.xlane.f32.xlu0 %v3575_v40 }
 0xe88   :  { %v2394_v41 = vpop.xlane.xlu0 %2393 }
 0xe89   :  { %v2395_v42 = vsub.f32 %v2391_v6, %v2394_v41 }
 0xe8b   :  { %v2396_v43 = vmul.f32 1.442695, %v2395_v42 }
 0xe8d   :  { %4723 = vpow2.f32 %v2396_v43 }
 0xe93   :  { %2568 = vrot.lane.b32.xlu1 %v5255_v55, %s4770_s7 }
 0xe97   :  { %v4724_v44 = vpop.eup %4723 }
 0xe98   :  { %v2398_v45 = vsel %vm423_vm3, %v4724_v44, 0.0 }
 0xeb7   :  { %2399 = vadd.xlane.f32.xlu1 %v2398_v45 }
 0xec8   :  { %2910 = vrot.lane.b32.xlu1 %v5255_v55, %s4772_s26 }
 0xefa   :  { %v2558_v47 = vpop.xlane.xlu1 %2557 }
 0xefb   :  { %v2559_v48 = vsub.f32 %v2555_v10, %v2558_v47 }
 0xefd   :  { %v2560_v49 = vmul.f32 1.442695, %v2559_v48 }
 0xeff   :  { %4725 = vpow2.f32 %v2560_v49  ;;  %v2730_v50 = vpop.xlane.xlu0 %2729 }
 0xf00   :  { %v2731_v51 = vsub.f32 %v2727_v14, %v2730_v50 }
 0xf02   :  { %v2732_v52 = vmul.f32 1.442695, %v2731_v51 }
 0xf03   :  { %v2901_v58 = vpop.xlane.xlu0 %2900 }
 0xf04   :  { %4727 = vpow2.f32 %v2732_v52  ;;  %v2902_v59 = vsub.f32 %v2898_v17, %v2901_v58 }
 0xf06   :  { %v2903_v62 = vmul.f32 1.442695, %v2902_v59 }
 0xf07   :  { %v3070_v61 = vpop.xlane.xlu1 %3069 }
 0xf08   :  { %v3071_v0 = vsub.f32 %v3067_v22, %v3070_v61  ;;  %4729 = vpow2.f32 %v2903_v62  ;;  %v4669_v61 = vld [vmem:[%s5497_s9 + $0x10] sm:$0xff]  }
 0xf09   :  { %v4726_v53 = vpop.eup %4725  ;;  %4602 = vmatpush3.bf16.msra.mxu0 %v4669_v61 }
 0xf0a   :  { %v2562_v54 = vsel %vm423_vm3, %v4726_v53, 0.0  ;;  %v3072_v2 = vmul.f32 1.442695, %v3071_v0  ;;  %4603 = vmatprep.subr.bf16.mxu0 %v4768_v20 }
 0xf0b   :  { %2563 = vadd.xlane.f32.xlu0 %v2562_v54  ;;  %v3234_v60 = vpop.xlane.xlu0 %3233 }
 0xf0c   :  { %v3235_v63 = vsub.f32 %v3231_v28, %v3234_v60 }
 0xf0e   :  { %v5320_v56 = vpop.eup %4727  ;;  %v3236_v4 = vmul.f32 1.442695, %v3235_v63  ;;  %v4670_v63 = vld [vmem:[%s5497_s9 + $0x18] sm:$0xff]  }
 0xf0f   :  { %v2734_v57 = vsel %vm423_vm3, %v5320_v56, 0.0  ;;  %v3406_v23 = vpop.xlane.xlu1 %3405  ;;  %4604 = vmatpush3.bf16.msra.mxu0 %v4670_v63 }
 0xf10   :  { %2735 = vadd.xlane.f32.xlu1 %v2734_v57  ;;  %v3407_v1 = vsub.f32 %v3403_v34, %v3406_v23  ;;  %4731 = vpow2.f32 %v3236_v4  ;;  %4617 = vmatprep.subr.bf16.mxu0 %v4768_v20 }
 0xf11   :  { %4733 = vpow2.f32 %v3072_v2 }
 0xf12   :  { %v3408_v7 = vmul.f32 1.442695, %v3407_v1 }
 0xf13   :  { %v3577_v3 = vpop.xlane.xlu0 %3576  ;;  %v2569_v10 = vpop.permute.xlu1 %2568 }
 0xf14   :  { %v3578_v5 = vsub.f32 %v3574_v38, %v3577_v3 }
 0xf16   :  { %v3579_v6 = vmul.f32 1.442695, %v3578_v5 }
 0xf18   :  { %4735 = vpow2.f32 %v3579_v6 }
 0xf19   :  { %4737 = vpow2.f32 %v3408_v7 }
 0xf21   :  { %3244 = vrot.lane.b32.xlu1 %v5245_v46, %s4770_s7  ;;  %2739 = vrot.lane.b32.xlu0 %v5255_v55, %s4771_s1  ;;  %v4730_v55 = vpop.eup %4729 }
 0xf22   :  { %v2905_v8 = vsel %vm423_vm3, %v4730_v55, 0.0  ;;  %v5329_v9 = vpop.eup %4731 }
 0xf23   :  { %v4734_v11 = vpop.eup %4733  ;;  %v3238_v12 = vsel %vm423_vm3, %v5329_v9, 0.0 }
 0xf24   :  { %v5333_v13 = vpop.eup %4735  ;;  %v3074_v15 = vsel %vm423_vm3, %v4734_v11, 0.0 }
 0xf25   :  { %v5336_v16 = vpop.eup %4737  ;;  %v3581_v26 = vsel %vm423_vm3, %v5333_v13, 0.0 }
 0xf26   :  { %v3410_v17 = vsel %vm423_vm3, %v5336_v16, 0.0 }
 0xf40   :  { %2906 = vadd.xlane.f32.xlu0 %v2905_v8 }
 0xf44   :  { %v2400_v14 = vpop.xlane.xlu1 %2399  ;;  %3239 = vadd.xlane.f32.xlu0 %v3238_v12 }
 0xf45   :  { %4739 = vrcp.f32 %v2400_v14  ;;  %3075 = vadd.xlane.f32.xlu1 %v3074_v15 }
 0xf48   :  { %3582 = vadd.xlane.f32.xlu0 %v3581_v26  ;;  %v2911_v22 = vpop.permute.xlu1 %2910 }
 0xf49   :  { %3411 = vadd.xlane.f32.xlu1 %v3410_v17 }
 0xf4f   :  { %v4740_v18 = vpop.eup %4739 }
 0xf50   :  { %v2402_v19 = vmul.f32 %v4740_v18, %v4724_v44 }
 0xf52   :  { %4529 = vmatmul.mubr.msk.f32.vlgmr.msra.gmra.mrb[38].mxu1 %vm423_vm3, %v2402_v19 }
 0xf53   :  { %4537 = vmatpush3.msra.mxu1 %v2569_v10  ;;  %4538 = vmatprep.mubr.msk.f32.mxu1 %vm4769_vm0, %v4768_v20 }
 0xf54   :  { %4546 = vmatprep.subr.mxu1 %v4768_v20 }
 0xf5a   :  { %3586 = vrot.lane.b32.xlu1 %v5245_v46, %s4772_s26 }
 0xf5e   :  { %3415 = vrot.lane.b32.xlu0 %v5245_v46, %s4771_s1 }
 0xf98   :  { %v2564_v21 = vpop.xlane.xlu0 %2563 }
 0xf99   :  { %4741 = vrcp.f32 %v2564_v21 }
 0xf9c   :  { %v2740_v28 = vpop.permute.xlu0 %2739 }
 0xf9d   :  { %v2736_v24 = vpop.xlane.xlu1 %2735 }
 0xf9e   :  { %4743 = vrcp.f32 %v2736_v24 }
 0xfa1   :  { %v3245_v34 = vpop.permute.xlu1 %3244 }
 0xfa3   :  { %v4742_v25 = vpop.eup %4741 }
 0xfa4   :  { %v2566_v27 = vmul.f32 %v4742_v25, %v4726_v53 }
 0xfa6   :  { %4539 = vmatmul.mubr.msk.f32.vlgmr.msra.gmra.mrb[40].mxu1 %vm423_vm3, %v2566_v27 }
 0xfa7   :  { %4547 = vmatpush3.msra.mxu1 %v2740_v28  ;;  %4548 = vmatprep.mubr.msk.f32.mxu1 %vm4769_vm0, %v4768_v20 }
 0xfa8   :  { %v4744_v29 = vpop.eup %4743  ;;  %4556 = vmatprep.subr.mxu1 %v4768_v20 }
 0xfa9   :  { %v2738_v30 = vmul.f32 %v4744_v29, %v5320_v56 }
 0xfab   :  { %4549 = vmatmul.mubr.msk.f32.vlgmr.msra.gmra.mrb[42].mxu1 %vm423_vm3, %v2738_v30 }
 0xfac   :  { %4557 = vmatpush3.msra.mxu1 %v2911_v22  ;;  %4558 = vmatprep.mubr.msk.f32.mxu1 %vm4769_vm0, %v4768_v20 }
 0xfad   :  { %4566 = vmatprep.subr.mxu1 %v4768_v20 }
 0xfcd   :  { %v2907_v31 = vpop.xlane.xlu0 %2906 }
 0xfce   :  { %4745 = vrcp.f32 %v2907_v31 }
 0xfd1   :  { %v3240_v35 = vpop.xlane.xlu0 %3239 }
 0xfd2   :  { %v3076_v36 = vpop.xlane.xlu1 %3075 }
 0xfd3   :  { %4747 = vrcp.f32 %v3076_v36 }
 0xfd4   :  { %4749 = vrcp.f32 %v3240_v35 }
 0xfd5   :  { %v3583_v40 = vpop.xlane.xlu0 %3582 }
 0xfd6   :  { %v3412_v37 = vpop.xlane.xlu1 %3411 }
 0xfd7   :  { %4751 = vrcp.f32 %v3412_v37  ;;  %v4672_v37 = vld [vmem:[%s5499_s13 + $0x18] sm:$0xff]  }
 0xfd8   :  { %v4746_v38 = vpop.eup %4745  ;;  %4753 = vrcp.f32 %v3583_v40 }
 0xfd9   :  { %v2909_v39 = vmul.f32 %v4746_v38, %v4730_v55  ;;  %v3416_v45 = vpop.permute.xlu0 %3415 }
 0xfda   :  { %v3587_v49 = vpop.permute.xlu1 %3586 }
 0xfdb   :  { %4559 = vmatmul.mubr.msk.f32.vlgmr.msra.gmra.mrb[44].mxu1 %vm423_vm3, %v2909_v39 }
 0xfdc   :  { %4567 = vmatpush3.msra.mxu1 %v5245_v46  ;;  %4568 = vmatprep.mubr.msk.f32.mxu1 %vm4769_vm0, %v4768_v20 }
 0xfdd   :  { %v4748_v41 = vpop.eup %4747  ;;  %4576 = vmatprep.subr.mxu1 %v4768_v20 }
 0xfde   :  { %v3078_v42 = vmul.f32 %v4748_v41, %v4734_v11  ;;  %v4750_v43 = vpop.eup %4749 }
 0xfdf   :  { %v3242_v44 = vmul.f32 %v4750_v43, %v5329_v9 }
 0xfe0   :  { %4569 = vmatmul.mubr.msk.f32.vlgmr.msra.gmra.mrb[46].mxu1 %vm423_vm3, %v3078_v42 }
 0xfe1   :  { %4577 = vmatpush3.msra.mxu1 %v3245_v34  ;;  %4578 = vmatprep.mubr.msk.f32.mxu1 %vm4769_vm0, %v4768_v20  ;;  %v4752_v46 = vpop.eup %4751 }
 0xfe2   :  { %4586 = vmatprep.subr.mxu1 %v4768_v20  ;;  %v3414_v47 = vmul.f32 %v4752_v46, %v5336_v16  ;;  %v4754_v48 = vpop.eup %4753 }
 0xfe3   :  { %v3585_v50 = vmul.f32 %v4754_v48, %v5333_v13  ;;  %v4215_v13 = vld [vmem:[%s5498_s10 + $0x1] ss:$0 sm:$0xff] }
 0xfe4   :  { %4579 = vmatmul.mubr.msk.f32.vlgmr.msra.gmra.mrb[48].mxu1 %vm423_vm3, %v3242_v44 }
 0xfe5   :  { %4587 = vmatpush3.msra.mxu1 %v3416_v45  ;;  %4588 = vmatprep.mubr.msk.f32.mxu1 %vm4769_vm0, %v4768_v20  ;;  %v4221_v45 = vld [vmem:[%s5500_s11 + $0x1] ss:$0 sm:$0xff] }
 0xfe6   :  { %4596 = vmatprep.subr.mxu1 %v4768_v20 }
 0xfe8   :  { %4589 = vmatmul.mubr.msk.f32.vlgmr.msra.gmra.mrb[50].mxu1 %vm423_vm3, %v3414_v47 }
 0xfe9   :  { %4597 = vmatpush3.msra.mxu1 %v3587_v49  ;;  %4598 = vmatprep.mubr.msk.f32.mxu1 %vm4769_vm0, %v4768_v20 }
 0xfea   :  { %4609 = vmatprep.subr.bf16.mxu1 %v4768_v20 }
 0xfec   :  { %4599 = vmatmul.mubr.msk.f32.vlgmr.msra.gmra.mrb[52].mxu1 %vm423_vm3, %v3585_v50  ;;  %v4222_v50 = vld [vmem:[%s5501_s12 + $0x1] ss:$0 sm:$0xff] }
 0xfed   :  { %4613 = vmatprep.mubr.msk.bf16.mxu1 %vm4769_vm0, %v4768_v20 }
0x1025   :  { %v2472_v51 = vpop.f32.mrb[38].mxu1 }
0x1026   :  { %2476 = vst.msk [vmem:[#allocation2] sm:$0xff] %vm423_vm3, %v2472_v51  ;;  %v4530_v52 = vpop.f32.mrb[39].mxu1 }
0x1079   :  { %v2640_v53 = vpop.f32.mrb[40].mxu1 }
0x107a   :  { %2645 = vrot.lane.b32.xlu0 %v2640_v53, %s4773_s30  ;;  %v4540_v54 = vpop.f32.mrb[41].mxu1 }
0x107e   :  { %v2811_v56 = vpop.f32.mrb[42].mxu1 }
0x107f   :  { %2816 = vrot.lane.b32.xlu0 %v2811_v56, %s5531_s4  ;;  %v4550_v57 = vpop.f32.mrb[43].mxu1  ;;  %v4673_v56 = vld [vmem:[%s5502_s15 + $0x20] sm:$0xff]  }
0x1080   :  { %v4674_v57 = vld [vmem:[%s5502_s15 + $0x28] sm:$0xff]  }
0x10ae   :  { %v2982_v58 = vpop.f32.mrb[44].mxu1 }
0x10af   :  { %2987 = vrot.lane.b32.xlu0 %v2982_v58, %s5532_s6  ;;  %v4560_v59 = vpop.f32.mrb[45].mxu1  ;;  %v4675_v58 = vld [vmem:[%s5502_s15 + $0x30] sm:$0xff]  }
0x10b0   :  { %v4676_v59 = vld [vmem:[%s5502_s15 + $0x38] sm:$0xff]  }
0x10b3   :  { %v3148_v60 = vpop.f32.mrb[46].mxu1 }
0x10b4   :  { %3152 = vst.msk [vmem:[#allocation2 + $0x8] sm:$0xff] %vm423_vm3, %v3148_v60  ;;  %v4570_v62 = vpop.f32.mrb[47].mxu1  ;;  %v4228_v60 = vld [vmem:[%s5503_s14 + $0x1] ss:$0 sm:$0xff] }
0x10b7   :  { %v3316_v0 = vpop.f32.mrb[48].mxu1 }
0x10b8   :  { %3321 = vrot.lane.b32.xlu1 %v3316_v0, %s4773_s30  ;;  %v4580_v3 = vpop.f32.mrb[49].mxu1 }
0x10bb   :  { %v3487_v23 = vpop.f32.mrb[50].mxu1 }
0x10bc   :  { %3492 = vrot.lane.b32.xlu1 %v3487_v23, %s5531_s4  ;;  %v4590_v4 = vpop.f32.mrb[51].mxu1 }
0x10bf   :  { %v3658_v5 = vpop.f32.mrb[52].mxu1 }
0x10c0   :  { %3663 = vrot.lane.b32.xlu1 %v3658_v5, %s5532_s6  ;;  %v4600_v2 = vpop.f32.mrb[53].mxu1 }
0x10ec   :  { %v2646_v1 = vpop.permute.xlu0 %2645 }
0x10ed   :  { %2648 = vst.msk [vmem:[#allocation2] sm:$0xff] %vm757_vm4, %v2646_v1 }
0x10f1   :  { %v2817_v6 = vpop.permute.xlu0 %2816 }
0x10f2   :  { %2819 = vst.msk [vmem:[#allocation2] sm:$0xff] %vm929_vm5, %v2817_v6 }
0x1121   :  { %v2988_v7 = vpop.permute.xlu0 %2987 }
0x1122   :  { %2990 = vst.msk [vmem:[#allocation2] sm:$0xff] %vm1101_vm6, %v2988_v7 }
0x1129   :  { %v3667_v10 = vld [vmem:[#allocation2] sm:$0xff] }
0x112a   :  { %v3322_v55 = vpop.permute.xlu1 %3321 }
0x112b   :  { %3324 = vst.msk [vmem:[#allocation2 + $0x8] sm:$0xff] %vm757_vm4, %v3322_v55 }
0x112e   :  { %v3493_v8 = vpop.permute.xlu1 %3492 }
0x112f   :  { %3495 = vst.msk [vmem:[#allocation2 + $0x8] sm:$0xff] %vm929_vm5, %v3493_v8 }
0x1132   :  { %v3664_v9 = vpop.permute.xlu1 %3663 }
0x1133   :  { %3666 = vst.msk [vmem:[#allocation2 + $0x8] sm:$0xff] %vm1101_vm6, %v3664_v9 }
0x113a   :  { %v3668_v11 = vld [vmem:[#allocation2 + $0x8] sm:$0xff] }
0x113b   :  { %v3669_v12 = vpack.c.bf16 %v3668_v11, %v3667_v10 }
0x113d   :  { %4606 = vmatmul.mubr.msk.bf16.vlgmr.msra.gmra.mrb[48].mxu0 %vm250_vm2, %v3669_v12 }
0x113e   :  { %4625 = vmatprep.mubr.msk.bf16.mxu0 %vm4769_vm0, %v4768_v20  ;;  %4618 = vmatpush3.bf16.msra.mxu0 %v4673_v56 }
0x113f   :  { %4619 = vmatprep.subr.bf16.mxu0 %v4768_v20 }
0x1142   :  { %4620 = vmatpush3.bf16.msra.mxu0 %v4674_v57 }
0x1143   :  { %4621 = vmatprep.subr.bf16.mxu0 %v4768_v20 }
0x1146   :  { %4622 = vmatpush3.bf16.msra.mxu0 %v4675_v58 }
0x1147   :  { %4623 = vmatprep.subr.bf16.mxu0 %v4768_v20 }
0x114a   :  { %4624 = vmatpush3.bf16.msra.mxu0 %v4676_v59 }
0x1210   :  { %v3732_v14 = vpop.f32.mrb[48].mxu0 }
0x1211   :  { %v3733_v15 = vadd.f32 %v4215_v13, %v3732_v14  ;;  %v4607_v16 = vpop.f32.mrb[49].mxu0 }
0x1212   :  { %v3735_v26 = vpop.f32.mrb[50].mxu0 }
0x1213   :  { %v3739_v17 = vadd.f32 %v3733_v15, %v5216_v32  ;;  %v3736_v18 = vadd.f32 %v4215_v13, %v3735_v26  ;;  %v4608_v19 = vpop.f32.mrb[51].mxu0 }
0x1214   :  { %v4241_v19 = vld [vmem:[%s5504_s16 + $0x1] ss:$0 sm:$0xff] }
0x1215   :  { %v3740_v21 = vadd.f32 %v3736_v18, %v5218_v33  ;;  %v3745_v22 = vsel %vm250_vm2, %v3739_v17, 0.0  ;;  %v4671_v33 = vld [vmem:[%s5499_s13 + $0x10] sm:$0xff]  }
0x1216   :  { %3746 = vadd.xlane.f32.xlu0 %v3745_v22  ;;  %4610 = vmatpush3.bf16.msra.mxu1 %v4671_v33 }
0x1217   :  { %v3748_v24 = vsel %vm250_vm2, %v3740_v21, 0.0  ;;  %4611 = vmatprep.subr.bf16.mxu1 %v4768_v20 }
0x1218   :  { %3749 = vadd.xlane.f32.xlu1 %v3748_v24 }
0x121a   :  { %4612 = vmatpush3.bf16.msra.mxu1 %v4672_v37 }
0x121b   :  { %4629 = vmatprep.subr.bf16.mxu1 %v4768_v20 }
0x12a3   :  { %v3747_v25 = vpop.xlane.xlu0 %3746 }
0x12a4   :  { %v3751_v27 = vmul.f32 0.03125, %v3747_v25 }
0x12a5   :  { %v3750_v28 = vpop.xlane.xlu1 %3749 }
0x12a6   :  { %v3753_v29 = vsub.f32 %v3739_v17, %v3751_v27  ;;  %v3752_v30 = vmul.f32 0.03125, %v3750_v28 }
0x12a8   :  { %v3754_v31 = vsub.f32 %v3740_v21, %v3752_v30  ;;  %v3755_v34 = vmul.f32 %v3753_v29, %v3753_v29 }
0x12aa   :  { %v3757_v35 = vsel %vm250_vm2, %v3755_v34, 0.0  ;;  %v3756_v32 = vmul.f32 %v3754_v31, %v3754_v31 }
0x12ab   :  { %3758 = vadd.xlane.f32.xlu0 %v3757_v35 }
0x12ac   :  { %v3760_v36 = vsel %vm250_vm2, %v3756_v32, 0.0 }
0x12af   :  { %3761 = vadd.xlane.f32.xlu0 %v3760_v36 }
0x1338   :  { %v3759_v38 = vpop.xlane.xlu0 %3758 }
0x1339   :  { %v3763_v39 = vmul.f32 0.03125, %v3759_v38 }
0x133b   :  { %v3765_v40 = vadd.f32 1e-12, %v3763_v39 }
0x133c   :  { %v3762_v41 = vpop.xlane.xlu0 %3761 }
0x133d   :  { %4755 = vrsqrt.f32 %v3765_v40  ;;  %v3764_v42 = vmul.f32 0.03125, %v3762_v41 }
0x133f   :  { %v3766_v43 = vadd.f32 1e-12, %v3764_v42 }
0x1341   :  { %4757 = vrsqrt.f32 %v3766_v43  ;;  %v4677_v43 = vld [vmem:[%s5507_s19] sm:$0xff]  }
0x1347   :  { %v4756_v44 = vpop.eup %4755 }
0x1348   :  { %v3769_v46 = vmul.f32 %v4756_v44, %v3753_v29  ;;  %v4678_v44 = vld [vmem:[%s5507_s19 + $0x8] sm:$0xff]  }
0x134a   :  { %v3777_v48 = vmul.f32 %v4221_v45, %v3769_v46 }
0x134b   :  { %v4758_v47 = vpop.eup %4757 }
0x134c   :  { %v3770_v49 = vmul.f32 %v4758_v47, %v3754_v31  ;;  %v3785_v52 = vadd.f32 %v4222_v50, %v3777_v48 }
0x134e   :  { %v3778_v51 = vmul.f32 %v4221_v45, %v3770_v49 }
0x1350   :  { %v3786_v53 = vadd.f32 %v4222_v50, %v3778_v51 }
0x1352   :  { %v3787_v54 = vpack.c.bf16 %v3786_v53, %v3785_v52 }
0x1354   :  { %4614 = vmatmul.mubr.msk.bf16.vlgmr.msra.gmra.mrb[56].mxu1 %vm250_vm2, %v3787_v54 }
0x1355   :  { %4633 = vmatprep.mubr.msk.bf16.mxu1 %vm4769_vm0, %v4768_v20  ;;  %4630 = vmatpush3.bf16.msra.mxu1 %v4677_v43  ;;  %vm4077_vm0 = vcmask 31744  }
0x1356   :  { %4631 = vmatprep.subr.bf16.mxu1 %v4768_v20  ;;  %v4250_v20 = vld [vmem:[%s5506_s18 + $0x1] ss:$0 sm:$0xff]  ;;  %s4776_s18 = smov 124  }
0x1359   :  { %4632 = vmatpush3.bf16.msra.mxu1 %v4678_v44 }
0x1427   :  { %v3850_v61 = vpop.f32.mrb[56].mxu1 }
0x1428   :  { %v3851_v62 = vadd.f32 %v4228_v60, %v3850_v61  ;;  %v4615_v63 = vpop.f32.mrb[57].mxu1 }
0x1429   :  { %v3853_v0 = vpop.f32.mrb[58].mxu1 }
0x142a   :  { %v3859_v3 = vmul.f32 0.044715, %v3851_v62  ;;  %v3854_v23 = vadd.f32 %v4228_v60, %v3853_v0  ;;  %v4616_v4 = vpop.f32.mrb[59].mxu1  ;;  %v3857_v14 = vmul.f32 0.5, %v3851_v62 }
0x142c   :  { %v3861_v5 = vmul.f32 %v3859_v3, %v3851_v62  ;;  %v3860_v2 = vmul.f32 0.044715, %v3854_v23  ;;  %v3858_v15 = vmul.f32 0.5, %v3854_v23 }
0x142e   :  { %v3863_v1 = vmul.f32 %v3861_v5, %v3851_v62  ;;  %v3862_v6 = vmul.f32 %v3860_v2, %v3854_v23 }
0x1430   :  { %v3865_v7 = vadd.f32 %v3863_v1, %v3851_v62  ;;  %v3864_v55 = vmul.f32 %v3862_v6, %v3854_v23  ;;  %v4251_v62 = vld [vmem:[%s5508_s20] ss:$0 sm:$0xff] }
0x1432   :  { %v3867_v8 = vmul.f32 0.7978846, %v3865_v7  ;;  %v3866_v9 = vadd.f32 %v3864_v55, %v3854_v23 }
0x1434   :  { %4759 = vtanh.f32 %v3867_v8  ;;  %v3868_v10 = vmul.f32 0.7978846, %v3866_v9 }
0x1436   :  { %4761 = vtanh.f32 %v3868_v10 }
0x143e   :  { %v4760_v11 = vpop.eup %4759 }
0x143f   :  { %v3871_v12 = vadd.f32 1.0, %v4760_v11 }
0x1440   :  { %v4762_v13 = vpop.eup %4761 }
0x1441   :  { %v3872_v16 = vadd.f32 1.0, %v4762_v13  ;;  %v3873_v26 = vmul.f32 %v3871_v12, %v3857_v14 }
0x1443   :  { %v3874_v17 = vmul.f32 %v3872_v16, %v3858_v15 }
0x1445   :  { %v3875_v18 = vpack.c.bf16 %v3874_v17, %v3873_v26 }
0x1447   :  { %4626 = vmatmul.mubr.msk.bf16.vlgmr.msra.gmra.mrb[52].mxu0 %vm2022_vm7, %v3875_v18 }
0x151a   :  { %v3954_v21 = vpop.f32.mrb[52].mxu0 }
0x151b   :  { %v3955_v22 = vadd.f32 %v4241_v19, %v3954_v21  ;;  %v4627_v24 = vpop.f32.mrb[53].mxu0 }
0x151c   :  { %v3957_v25 = vpop.f32.mrb[54].mxu0 }
0x151d   :  { %v3961_v27 = vadd.f32 %v3955_v22, %v3785_v52  ;;  %v3958_v28 = vadd.f32 %v4241_v19, %v3957_v25  ;;  %v4628_v29 = vpop.f32.mrb[55].mxu0  ;;  %v4249_v52 = vld [vmem:[%s5505_s17 + $0x1] ss:$0 sm:$0xff] }
0x151f   :  { %v3962_v30 = vadd.f32 %v3958_v28, %v3786_v53  ;;  %v3967_v31 = vsel %vm250_vm2, %v3961_v27, 0.0 }
0x1520   :  { %3968 = vadd.xlane.f32.xlu1 %v3967_v31 }
0x1521   :  { %v3970_v34 = vsel %vm250_vm2, %v3962_v30, 0.0 }
0x1522   :  { %3971 = vadd.xlane.f32.xlu0 %v3970_v34 }
0x15ad   :  { %v3969_v35 = vpop.xlane.xlu1 %3968 }
0x15ae   :  { %v3973_v32 = vmul.f32 0.03125, %v3969_v35 }
0x15af   :  { %v3972_v36 = vpop.xlane.xlu0 %3971 }
0x15b0   :  { %v3975_v33 = vsub.f32 %v3961_v27, %v3973_v32  ;;  %v3974_v37 = vmul.f32 0.03125, %v3972_v36 }
0x15b2   :  { %v3976_v38 = vsub.f32 %v3962_v30, %v3974_v37  ;;  %v3977_v39 = vmul.f32 %v3975_v33, %v3975_v33 }
0x15b4   :  { %v3979_v40 = vsel %vm250_vm2, %v3977_v39, 0.0  ;;  %v3978_v41 = vmul.f32 %v3976_v38, %v3976_v38 }
0x15b5   :  { %3980 = vadd.xlane.f32.xlu1 %v3979_v40 }
0x15b6   :  { %v3982_v42 = vsel %vm250_vm2, %v3978_v41, 0.0 }
0x15b7   :  { %3983 = vadd.xlane.f32.xlu0 %v3982_v42 }
0x1642   :  { %v3981_v46 = vpop.xlane.xlu1 %3980 }
0x1643   :  { %v3985_v45 = vmul.f32 0.03125, %v3981_v46 }
0x1644   :  { %v3984_v47 = vpop.xlane.xlu0 %3983 }
0x1645   :  { %v3987_v48 = vadd.f32 1e-12, %v3985_v45  ;;  %v3986_v49 = vmul.f32 0.03125, %v3984_v47 }
0x1647   :  { %4763 = vrsqrt.f32 %v3987_v48  ;;  %v3988_v50 = vadd.f32 1e-12, %v3986_v49 }
0x1649   :  { %4765 = vrsqrt.f32 %v3988_v50 }
0x1651   :  { %v4764_v51 = vpop.eup %4763 }
0x1652   :  { %v3991_v53 = vmul.f32 %v4764_v51, %v3975_v33 }
0x1653   :  { %v4766_v54 = vpop.eup %4765 }
0x1654   :  { %v3999_v56 = vmul.f32 %v4249_v52, %v3991_v53  ;;  %v3992_v57 = vmul.f32 %v4766_v54, %v3976_v38 }
0x1656   :  { %v4000_v58 = vmul.f32 %v4249_v52, %v3992_v57  ;;  %v4007_v59 = vadd.f32 %v4250_v20, %v3999_v56 }
0x1658   :  { %v4008_v60 = vadd.f32 %v4250_v20, %v4000_v58 }
0x165a   :  { %v4009_v61 = vpack.c.bf16 %v4008_v60, %v4007_v59 }
0x165c   :  { %4634 = vmatmul.mubr.msk.bf16.vlgmr.msra.gmra.mrb[60].mxu1 %vm250_vm2, %v4009_v61 }
0x172f   :  { %v4070_v63 = vpop.f32.mrb[60].mxu1 }
0x1730   :  { %v4071_v0 = vadd.f32 %v4251_v62, %v4070_v63  ;;  %v4635_v3 = vpop.f32.mrb[61].mxu1 }
0x1731   :  { %v4073_v23 = vpop.f32.mrb[62].mxu1 }
0x1732   :  { %4078 = vst.msk [vmem:[%s5509_s21] sm:$0xff] %vm4077_vm0, %v4071_v0  ;;  %v4074_v4 = vadd.f32 %v4251_v62, %v4073_v23  ;;  %4080 = vrot.lane.b32.xlu1 %v4071_v0, %s4776_s18  ;;  %v4636_v5 = vpop.f32.mrb[63].mxu1 }
0x1734   :  { %4256 = vst.msk [vmem:[%s5509_s21 + $0x10] sm:$0xff] %vm4077_vm0, %v4074_v4  ;;  %4088 = vrot.lane.b32.xlu0 %v4074_v4, %s4776_s18 }
0x17a4   :  { %v4081_v2 = vpop.permute.xlu1 %4080 }
0x17a5   :  { %4255 = vst.msk [vmem:[%s5509_s21 + $0x8] sm:$0xff] %vm4077_vm0, %v4081_v2 }
0x17a6   :  { %v4089_v1 = vpop.permute.xlu0 %4088 }
0x17a7   :  { %4257 = vst.msk [vmem:[%s5509_s21 + $0x18] sm:$0xff] %vm4077_vm0, %v4089_v1 }

</bundles_post_ra>
